<compile_context>
chip_gen: v7x
topology: tpu7x:2x2x1
jax: 0.10.0
libtpu: 0.0.40
codegen_flags: <defaults>
</compile_context>

<pallas_src>
import functools

import jax
import jax.numpy as jnp
from jax import lax
from jax.experimental import pallas as pl
from jax.experimental.pallas import tpu as pltpu


def _round_up(x, m):
    return ((x + m - 1) // m) * m


def _dsc_kernel(xp_ref, wd_ref, wp_ref, bias_ref, o_ref, *, H, W, K, use_bf16):
    """One batch tile per grid step.

    xp_ref  : (TILE_B, H+K-1, W+K-1, C_in_p)  zero-padded input tile (NHWC)
    wd_ref  : (K*K, C_in_p)                   depthwise filter taps
    wp_ref  : (C_in_p, C_out_p)               pointwise weights, BN scale folded in
    bias_ref: (1, C_out_p)                    folded (dw bias + pw bias + BN) bias
    o_ref   : (TILE_B, H, W, C_out_p)
    """
    TILE_B = o_ref.shape[0]
    C_in_p = xp_ref.shape[-1]
    C_out_p = o_ref.shape[-1]

    xp = xp_ref[...]            # (TILE_B, Hp, Wpp, C_in_p)
    wd = wd_ref[...]            # (K*K, C_in_p)

    # ---- depthwise KxK: shifted multiply-accumulate on the VPU (f32) ----
    # kh offsets are on a major dim (free); kw offsets are sublane-offset
    # slices (cheap relayout, correctness-proven).  A pltpu.roll-based shift
    # could move that work to the XLU slot as a further optimization.
    acc = jnp.zeros((TILE_B, H, W, C_in_p), jnp.float32)
    for kh in range(K):
        strip = xp[:, kh:kh + H, :, :]
        for kw in range(K):
            tap = wd[kh * K + kw][None, None, None, :]
            acc = acc + strip[:, :, kw:kw + W, :] * tap

    # ---- pointwise 1x1 conv (+ folded BN scale) as one big matmul (MXU) ----
    # W % 8 == 0 is guaranteed by the wrapper, so these reshapes are views.
    flat = acc.reshape(TILE_B * H * W, C_in_p)
    wmat = wp_ref[...]
    if use_bf16:
        flat = flat.astype(jnp.bfloat16)
        wmat = wmat.astype(jnp.bfloat16)
    y = jnp.dot(flat, wmat, preferred_element_type=jnp.float32)

    # ---- folded bias + ReLU, lane-dense store (C_out_p is a 128 multiple) ----
    y = jnp.maximum(y + bias_ref[0][None, :], 0.0)
    o_ref[...] = y.reshape(TILE_B, H, W, C_out_p)


def depthwise_separable_conv(x_nchw, params, *, kernel_size=3, padding=1,
                             dilation=1, eps=1e-5, use_bf16_mxu=False):
    """x_nchw: (N, C_in, H, W) float32. Returns (N, C_out, H, W)."""
    assert dilation == 1, "dilation=1 only in this kernel"
    K = kernel_size
    assert 2 * padding == K - 1, "kernel assumes 'same' conv: 2*padding == K-1"

    wd = params["depthwise_w"]       # (C_in, 1, K, K)   PyTorch layout
    bd = params["depthwise_b"]       # (C_in,)
    wp = params["pointwise_w"]       # (C_out, C_in, 1, 1)
    bp = params["pointwise_b"]       # (C_out,)
    gamma = params["bn_gamma"]       # (C_out,)
    beta = params["bn_beta"]         # (C_out,)
    rmean = params["bn_running_mean"]
    rvar = params["bn_running_var"]

    N, C_in, H, W = x_nchw.shape
    C_out = wp.shape[0]

    # ---- lane-dense channel padding (multiples of 128) ----
    LANE = 128
    C_in_p = _round_up(C_in, LANE)
    C_out_p = _round_up(C_out, LANE)

    # ---- spatial sizes (computed width rounded to 8 so reshapes are views) ----
    W_c = _round_up(W, 8)
    Hp = H + 2 * padding
    Wpp = W_c + K - 1

    # ---- batch tiling: largest TILE_B whose in+out blocks fit the budget ----
    bytes_in = Hp * Wpp * C_in_p * 4
    bytes_out = H * W_c * C_out_p * 4
    budget = 8 * 1024 * 1024
    TILE_B = max(1, min(N, budget // max(1, bytes_in + bytes_out)))
    NB = pl.cdiv(N, TILE_B)
    N_pad = NB * TILE_B

    # ---- input: NCHW -> NHWC, zero-pad batch / spatial / channels ----
    x = jnp.transpose(x_nchw, (0, 2, 3, 1)).astype(jnp.float32)
    x_pad = jnp.pad(
        x,
        ((0, N_pad - N),
         (padding, padding),
         (padding, padding + (W_c - W)),
         (0, C_in_p - C_in)))

    # ---- fold parameters ----
    # depthwise taps (K*K, C_in_p)
    wd_taps = jnp.transpose(wd[:, 0, :, :], (1, 2, 0)).reshape(K * K, C_in)
    wd_k = jnp.pad(wd_taps.astype(jnp.float32), ((0, 0), (0, C_in_p - C_in)))

    # pointwise weights with BN scale folded in: (C_in_p, C_out_p)
    wp_mat = jnp.transpose(wp[:, :, 0, 0], (1, 0)).astype(jnp.float32)  # (C_in, C_out)
    scale = gamma / jnp.sqrt(rvar + eps)                                # (C_out,)
    wp_eff = wp_mat * scale[None, :]
    wp_k = jnp.pad(wp_eff, ((0, C_in_p - C_in), (0, C_out_p - C_out)))

    # depthwise bias + pointwise bias + BN shift folded into one vector
    bias_eff = beta + scale * (bp + bd @ wp_mat - rmean)                # (C_out,)
    bias_k = jnp.pad(bias_eff, (0, C_out_p - C_out)).reshape(1, C_out_p)

    kernel = functools.partial(_dsc_kernel, H=H, W=W_c, K=K,
                               use_bf16=use_bf16_mxu)

    # double-buffered in/out blocks + headroom, capped for v7x's smaller VMEM
    vmem_needed = 2 * TILE_B * (bytes_in + bytes_out)
    vmem_limit = int(min(48 * 1024 * 1024,
                         max(16 * 1024 * 1024, 3 * vmem_needed)))

    out_nhwc = pl.pallas_call(
        kernel,
        out_shape=jax.ShapeDtypeStruct((N_pad, H, W_c, C_out_p), jnp.float32),
        grid_spec=pltpu.PrefetchScalarGridSpec(
            num_scalar_prefetch=0,
            grid=(NB,),
            in_specs=[
                pl.BlockSpec((TILE_B, Hp, Wpp, C_in_p), lambda b: (b, 0, 0, 0)),
                pl.BlockSpec((K * K, C_in_p), lambda b: (0, 0)),
                pl.BlockSpec((C_in_p, C_out_p), lambda b: (0, 0)),
                pl.BlockSpec((1, C_out_p), lambda b: (0, 0)),
            ],
            out_specs=pl.BlockSpec((TILE_B, H, W_c, C_out_p),
                                   lambda b: (b, 0, 0, 0)),
        ),
        compiler_params=pltpu.CompilerParams(
            dimension_semantics=("parallel",),
            vmem_limit_bytes=vmem_limit),
    )(x_pad, wd_k, wp_k, bias_k)

    # Crop padding, NHWC -> NCHW to match PyTorch output convention.
    out = out_nhwc[:N, :, :W, :C_out]
    return jnp.transpose(out, (0, 3, 1, 2))


def _reference(x_nchw, params, eps=1e-5):
    """Pure-JAX reference (lax.conv) for correctness checking."""
    wd = params["depthwise_w"]
    bd = params["depthwise_b"]
    wp = params["pointwise_w"]
    bp = params["pointwise_b"]
    C_in = x_nchw.shape[1]

    dw = lax.conv_general_dilated(
        x_nchw, wd, window_strides=(1, 1), padding=((1, 1), (1, 1)),
        dimension_numbers=("NCHW", "OIHW", "NCHW"),
        feature_group_count=C_in) + bd[None, :, None, None]
    pw = lax.conv_general_dilated(
        dw, wp, window_strides=(1, 1), padding="VALID",
        dimension_numbers=("NCHW", "OIHW", "NCHW")) + bp[None, :, None, None]
    scale = params["bn_gamma"] / jnp.sqrt(params["bn_running_var"] + eps)
    bias = params["bn_beta"] - params["bn_running_mean"] * scale
    y = pw * scale[None, :, None, None] + bias[None, :, None, None]
    return jnp.maximum(y, 0.0)


def init_params(key, nin, nout, kernel_size=3):
    ks = jax.random.split(key, 6)
    return {
        "depthwise_w": jax.random.normal(ks[0], (nin, 1, kernel_size, kernel_size),
                                         jnp.float32) * 0.1,
        "depthwise_b": jax.random.normal(ks[1], (nin,), jnp.float32) * 0.1,
        "pointwise_w": jax.random.normal(ks[2], (nout, nin, 1, 1), jnp.float32) * 0.1,
        "pointwise_b": jax.random.normal(ks[3], (nout,), jnp.float32) * 0.1,
        "bn_gamma": 1.0 + 0.1 * jax.random.normal(ks[4], (nout,), jnp.float32),
        "bn_beta": 0.1 * jax.random.normal(ks[5], (nout,), jnp.float32),
        "bn_running_mean": jnp.zeros((nout,), jnp.float32),
        "bn_running_var": jnp.ones((nout,), jnp.float32),
    }


if __name__ == "__main__":
    key = jax.random.PRNGKey(0)
    k_x, k_p = jax.random.split(key)

    N, C_in, C_out, H, W = 2, 4, 8, 16, 16
    x = jax.random.normal(k_x, (N, C_in, H, W), jnp.float32)
    params = init_params(k_p, C_in, C_out)

    ref = jax.block_until_ready(_reference(x, params))

    # f32 MXU path (exact-ish, matches PyTorch f32 semantics)
    out = jax.block_until_ready(depthwise_separable_conv(x, params))
    assert out.shape == (N, C_out, H, W)
    assert jnp.allclose(out, ref, atol=1e-4, rtol=1e-4), "mismatch vs reference (f32)"

    # bf16 MXU operand path (v6e/v7x-friendly), looser tolerance
    out_bf16 = jax.block_until_ready(
        depthwise_separable_conv(x, params, use_bf16_mxu=True))
    assert jnp.allclose(out_bf16, ref, atol=5e-2, rtol=5e-2), "mismatch vs reference (bf16)"

    print("KERNEL_OK")
</pallas_src>

<mosaic_0001>
module attributes {stable_mosaic.version = 11 : i64} {
  func.func @_dsc_kernel(%arg0: i32, %arg1: memref<2x18x18x128xf32, #tpu.memory_space<vmem>>, %arg2: memref<9x128xf32, #tpu.memory_space<vmem>>, %arg3: memref<128x128xf32, #tpu.memory_space<vmem>>, %arg4: memref<1x128xf32, #tpu.memory_space<vmem>>, %arg5: memref<2x16x16x128xf32, #tpu.memory_space<vmem>>) attributes {dimension_semantics = [#tpu.dimension_semantics<parallel>], iteration_bounds = array<i64: 1>, scalar_prefetch = 0 : i64, scratch_operands = 0 : i64, tpu.core_type = #tpu.core_type<tc>, window_params = [{transform_indices = @transform_0, window_bounds = array<i64: 2, 18, 18, 128>}, {pipeline_mode = #tpu.pipeline_mode<synchronous>, transform_indices = @transform_1, window_bounds = array<i64: 9, 128>}, {pipeline_mode = #tpu.pipeline_mode<synchronous>, transform_indices = @transform_2, window_bounds = array<i64: 128, 128>}, {pipeline_mode = #tpu.pipeline_mode<synchronous>, transform_indices = @transform_3, window_bounds = array<i64: 1, 128>}, {transform_indices = @transform_4, window_bounds = array<i64: 2, 16, 16, 128>}]} {
    %c0 = arith.constant 0 : index
    %c0_0 = arith.constant 0 : index
    %c0_1 = arith.constant 0 : index
    %c0_2 = arith.constant 0 : index
    %0 = vector.load %arg1[%c0, %c0_0, %c0_1, %c0_2] : memref<2x18x18x128xf32, #tpu.memory_space<vmem>>, vector<2x18x18x128xf32>
    %c0_3 = arith.constant 0 : index
    %c0_4 = arith.constant 0 : index
    %1 = vector.load %arg2[%c0_3, %c0_4] : memref<9x128xf32, #tpu.memory_space<vmem>>, vector<9x128xf32>
    %cst = arith.constant 0.000000e+00 : f32
    %2 = vector.broadcast %cst : f32 to vector<2x16x16x128xf32>
    %3 = vector.extract_strided_slice %0 {offsets = [0, 0, 0, 0], sizes = [2, 16, 18, 128], strides = [1, 1, 1, 1]} : vector<2x18x18x128xf32> to vector<2x16x18x128xf32>
    %4 = vector.extract_strided_slice %1 {offsets = [0, 0], sizes = [1, 128], strides = [1, 1]} : vector<9x128xf32> to vector<1x128xf32>
    %5 = vector.shape_cast %4 : vector<1x128xf32> to vector<128xf32>
    %6 = vector.shape_cast %5 : vector<128xf32> to vector<1x1x1x128xf32>
    %7 = vector.extract_strided_slice %3 {offsets = [0, 0, 0, 0], sizes = [2, 16, 16, 128], strides = [1, 1, 1, 1]} : vector<2x16x18x128xf32> to vector<2x16x16x128xf32>
    %8 = vector.broadcast %6 : vector<1x1x1x128xf32> to vector<2x16x16x128xf32>
    %9 = arith.mulf %7, %8 : vector<2x16x16x128xf32>
    %10 = arith.addf %2, %9 : vector<2x16x16x128xf32>
    %11 = vector.extract_strided_slice %1 {offsets = [1, 0], sizes = [1, 128], strides = [1, 1]} : vector<9x128xf32> to vector<1x128xf32>
    %12 = vector.shape_cast %11 : vector<1x128xf32> to vector<128xf32>
    %13 = vector.shape_cast %12 : vector<128xf32> to vector<1x1x1x128xf32>
    %14 = vector.extract_strided_slice %3 {offsets = [0, 0, 1, 0], sizes = [2, 16, 16, 128], strides = [1, 1, 1, 1]} : vector<2x16x18x128xf32> to vector<2x16x16x128xf32>
    %15 = vector.broadcast %13 : vector<1x1x1x128xf32> to vector<2x16x16x128xf32>
    %16 = arith.mulf %14, %15 : vector<2x16x16x128xf32>
    %17 = arith.addf %10, %16 : vector<2x16x16x128xf32>
    %18 = vector.extract_strided_slice %1 {offsets = [2, 0], sizes = [1, 128], strides = [1, 1]} : vector<9x128xf32> to vector<1x128xf32>
    %19 = vector.shape_cast %18 : vector<1x128xf32> to vector<128xf32>
    %20 = vector.shape_cast %19 : vector<128xf32> to vector<1x1x1x128xf32>
    %21 = vector.extract_strided_slice %3 {offsets = [0, 0, 2, 0], sizes = [2, 16, 16, 128], strides = [1, 1, 1, 1]} : vector<2x16x18x128xf32> to vector<2x16x16x128xf32>
    %22 = vector.broadcast %20 : vector<1x1x1x128xf32> to vector<2x16x16x128xf32>
    %23 = arith.mulf %21, %22 : vector<2x16x16x128xf32>
    %24 = arith.addf %17, %23 : vector<2x16x16x128xf32>
    %25 = vector.extract_strided_slice %0 {offsets = [0, 1, 0, 0], sizes = [2, 16, 18, 128], strides = [1, 1, 1, 1]} : vector<2x18x18x128xf32> to vector<2x16x18x128xf32>
    %26 = vector.extract_strided_slice %1 {offsets = [3, 0], sizes = [1, 128], strides = [1, 1]} : vector<9x128xf32> to vector<1x128xf32>
    %27 = vector.shape_cast %26 : vector<1x128xf32> to vector<128xf32>
    %28 = vector.shape_cast %27 : vector<128xf32> to vector<1x1x1x128xf32>
    %29 = vector.extract_strided_slice %25 {offsets = [0, 0, 0, 0], sizes = [2, 16, 16, 128], strides = [1, 1, 1, 1]} : vector<2x16x18x128xf32> to vector<2x16x16x128xf32>
    %30 = vector.broadcast %28 : vector<1x1x1x128xf32> to vector<2x16x16x128xf32>
    %31 = arith.mulf %29, %30 : vector<2x16x16x128xf32>
    %32 = arith.addf %24, %31 : vector<2x16x16x128xf32>
    %33 = vector.extract_strided_slice %1 {offsets = [4, 0], sizes = [1, 128], strides = [1, 1]} : vector<9x128xf32> to vector<1x128xf32>
    %34 = vector.shape_cast %33 : vector<1x128xf32> to vector<128xf32>
    %35 = vector.shape_cast %34 : vector<128xf32> to vector<1x1x1x128xf32>
    %36 = vector.extract_strided_slice %25 {offsets = [0, 0, 1, 0], sizes = [2, 16, 16, 128], strides = [1, 1, 1, 1]} : vector<2x16x18x128xf32> to vector<2x16x16x128xf32>
    %37 = vector.broadcast %35 : vector<1x1x1x128xf32> to vector<2x16x16x128xf32>
    %38 = arith.mulf %36, %37 : vector<2x16x16x128xf32>
    %39 = arith.addf %32, %38 : vector<2x16x16x128xf32>
    %40 = vector.extract_strided_slice %1 {offsets = [5, 0], sizes = [1, 128], strides = [1, 1]} : vector<9x128xf32> to vector<1x128xf32>
    %41 = vector.shape_cast %40 : vector<1x128xf32> to vector<128xf32>
    %42 = vector.shape_cast %41 : vector<128xf32> to vector<1x1x1x128xf32>
    %43 = vector.extract_strided_slice %25 {offsets = [0, 0, 2, 0], sizes = [2, 16, 16, 128], strides = [1, 1, 1, 1]} : vector<2x16x18x128xf32> to vector<2x16x16x128xf32>
    %44 = vector.broadcast %42 : vector<1x1x1x128xf32> to vector<2x16x16x128xf32>
    %45 = arith.mulf %43, %44 : vector<2x16x16x128xf32>
    %46 = arith.addf %39, %45 : vector<2x16x16x128xf32>
    %47 = vector.extract_strided_slice %0 {offsets = [0, 2, 0, 0], sizes = [2, 16, 18, 128], strides = [1, 1, 1, 1]} : vector<2x18x18x128xf32> to vector<2x16x18x128xf32>
    %48 = vector.extract_strided_slice %1 {offsets = [6, 0], sizes = [1, 128], strides = [1, 1]} : vector<9x128xf32> to vector<1x128xf32>
    %49 = vector.shape_cast %48 : vector<1x128xf32> to vector<128xf32>
    %50 = vector.shape_cast %49 : vector<128xf32> to vector<1x1x1x128xf32>
    %51 = vector.extract_strided_slice %47 {offsets = [0, 0, 0, 0], sizes = [2, 16, 16, 128], strides = [1, 1, 1, 1]} : vector<2x16x18x128xf32> to vector<2x16x16x128xf32>
    %52 = vector.broadcast %50 : vector<1x1x1x128xf32> to vector<2x16x16x128xf32>
    %53 = arith.mulf %51, %52 : vector<2x16x16x128xf32>
    %54 = arith.addf %46, %53 : vector<2x16x16x128xf32>
    %55 = vector.extract_strided_slice %1 {offsets = [7, 0], sizes = [1, 128], strides = [1, 1]} : vector<9x128xf32> to vector<1x128xf32>
    %56 = vector.shape_cast %55 : vector<1x128xf32> to vector<128xf32>
    %57 = vector.shape_cast %56 : vector<128xf32> to vector<1x1x1x128xf32>
    %58 = vector.extract_strided_slice %47 {offsets = [0, 0, 1, 0], sizes = [2, 16, 16, 128], strides = [1, 1, 1, 1]} : vector<2x16x18x128xf32> to vector<2x16x16x128xf32>
    %59 = vector.broadcast %57 : vector<1x1x1x128xf32> to vector<2x16x16x128xf32>
    %60 = arith.mulf %58, %59 : vector<2x16x16x128xf32>
    %61 = arith.addf %54, %60 : vector<2x16x16x128xf32>
    %62 = vector.extract_strided_slice %1 {offsets = [8, 0], sizes = [1, 128], strides = [1, 1]} : vector<9x128xf32> to vector<1x128xf32>
    %63 = vector.shape_cast %62 : vector<1x128xf32> to vector<128xf32>
    %64 = vector.shape_cast %63 : vector<128xf32> to vector<1x1x1x128xf32>
    %65 = vector.extract_strided_slice %47 {offsets = [0, 0, 2, 0], sizes = [2, 16, 16, 128], strides = [1, 1, 1, 1]} : vector<2x16x18x128xf32> to vector<2x16x16x128xf32>
    %66 = vector.broadcast %64 : vector<1x1x1x128xf32> to vector<2x16x16x128xf32>
    %67 = arith.mulf %65, %66 : vector<2x16x16x128xf32>
    %68 = arith.addf %61, %67 : vector<2x16x16x128xf32>
    %69 = vector.shape_cast %68 : vector<2x16x16x128xf32> to vector<512x128xf32>
    %c0_5 = arith.constant 0 : index
    %c0_6 = arith.constant 0 : index
    %70 = vector.load %arg3[%c0_5, %c0_6] : memref<128x128xf32, #tpu.memory_space<vmem>>, vector<128x128xf32>
    %cst_7 = arith.constant dense<0.000000e+00> : vector<512x128xf32>
    %71 = tpu.matmul %69, %70, %cst_7 {dimension_numbers = #tpu.dot_dimension_numbers<[1], [0], [0], [1], [0, 0, 1, 1], [], []>} : vector<512x128xf32>, vector<128x128xf32>, vector<512x128xf32> -> vector<512x128xf32>
    %c0_8 = arith.constant 0 : index
    %c0_9 = arith.constant 0 : index
    %72 = vector.load %arg4[%c0_8, %c0_9] : memref<1x128xf32, #tpu.memory_space<vmem>>, vector<1x128xf32>
    %73 = vector.shape_cast %72 : vector<1x128xf32> to vector<128xf32>
    %74 = vector.shape_cast %73 : vector<128xf32> to vector<1x128xf32>
    %75 = vector.broadcast %74 : vector<1x128xf32> to vector<512x128xf32>
    %76 = arith.addf %71, %75 : vector<512x128xf32>
    %cst_10 = arith.constant 0.000000e+00 : f32
    %77 = vector.broadcast %cst_10 : f32 to vector<512x128xf32>
    %78 = arith.maximumf %76, %77 : vector<512x128xf32>
    %79 = vector.shape_cast %78 : vector<512x128xf32> to vector<2x16x16x128xf32>
    %c0_11 = arith.constant 0 : index
    %c0_12 = arith.constant 0 : index
    %c0_13 = arith.constant 0 : index
    %c0_14 = arith.constant 0 : index
    %80 = vector.load %arg5[%c0_11, %c0_12, %c0_13, %c0_14] : memref<2x16x16x128xf32, #tpu.memory_space<vmem>>, vector<2x16x16x128xf32>
    tpu.vector_store %arg5[%c0_11, %c0_12, %c0_13, %c0_14], %79 {strides = array<i32>} : memref<2x16x16x128xf32, #tpu.memory_space<vmem>>, vector<2x16x16x128xf32>,
    return
  }
  func.func @transform_0(%arg0: i32) -> (i32, i32, i32, i32) {
    %c0_i32 = arith.constant 0 : i32
    %c0_i32_0 = arith.constant 0 : i32
    %c0_i32_1 = arith.constant 0 : i32
    %c0_i32_2 = arith.constant 0 : i32
    return %arg0, %c0_i32, %c0_i32_0, %c0_i32_1 : i32, i32, i32, i32
  }
  func.func @transform_1(%arg0: i32) -> (i32, i32) {
    %c0_i32 = arith.constant 0 : i32
    %c0_i32_0 = arith.constant 0 : i32
    %c0_i32_1 = arith.constant 0 : i32
    return %c0_i32, %c0_i32_0 : i32, i32
  }
  func.func @transform_2(%arg0: i32) -> (i32, i32) {
    %c0_i32 = arith.constant 0 : i32
    %c0_i32_0 = arith.constant 0 : i32
    %c0_i32_1 = arith.constant 0 : i32
    return %c0_i32, %c0_i32_0 : i32, i32
  }
  func.func @transform_3(%arg0: i32) -> (i32, i32) {
    %c0_i32 = arith.constant 0 : i32
    %c0_i32_0 = arith.constant 0 : i32
    %c0_i32_1 = arith.constant 0 : i32
    return %c0_i32, %c0_i32_0 : i32, i32
  }
  func.func @transform_4(%arg0: i32) -> (i32, i32, i32, i32) {
    %c0_i32 = arith.constant 0 : i32
    %c0_i32_0 = arith.constant 0 : i32
    %c0_i32_1 = arith.constant 0 : i32
    %c0_i32_2 = arith.constant 0 : i32
    return %arg0, %c0_i32, %c0_i32_0, %c0_i32_1 : i32, i32, i32, i32
  }
}

</mosaic_0001>

<bundles_post_ra>
// kernel: tpu_custom_call.1
= control target key start
LH: loop header
LB: loop body
LE: loop exit
PB: predicated region body
PF: predicated region fallthrough
CT: control target
= control target key end

     0   :  { %v128_v3 = vlaneseq  ;;  %vm456_vm0 = vcmask 1046528   ;;  %vm941_vm1 = vcmask 1045504   ;;  %s8394_s0 = inlined_call_operand.vmem [shape: f32[2,18,18,128], index: 0, kind: input, shape index: {}]   ;;  %s8395_s1 = inlined_call_operand.vmem [shape: f32[9,128], index: 1, kind: input, shape index: {}]   ;;  %s8396_s2 = inlined_call_operand.vmem [shape: f32[128,128], index: 2, kind: input, shape index: {}]   ;;  %s8397_s3 = inlined_call_operand.vmem [shape: f32[1,128], index: 3, kind: input, shape index: {}]   ;;  %s8398_s4 = inlined_call_operand.hbm [shape: f32[2,16,16,128], index: 4, kind: output, shape index: {}]  }
   0x1   :  { %v3430_v0 = vld [vmem:[%s8396_s2] sm:$0xff]  ;;  %v3431_v1 = vld [vmem:[%s8396_s2 + $0x8] sm:$0xff]  ;;  %v3432_v2 = vld [vmem:[%s8396_s2 + $0x10] sm:$0xff] }
   0x2   :  { %v4192_v4 = vpack.c.bf16 %v3431_v1, %v3430_v0  ;;  %v3433_v5 = vld [vmem:[%s8396_s2 + $0x18] sm:$0xff]  ;;  %v3434_v6 = vld [vmem:[%s8396_s2 + $0x20] sm:$0xff]  ;;  %v3435_v7 = vld [vmem:[%s8396_s2 + $0x28] sm:$0xff]  ;;  %v4326_v12 = vshrl.u32 %v128_v3, 7 }
   0x3   :  { %v4196_v8 = vpack.c.bf16 %v3433_v5, %v3432_v2  ;;  %v3436_v9 = vld [vmem:[%s8396_s2 + $0x30] sm:$0xff]  ;;  %v3437_v10 = vld [vmem:[%s8396_s2 + $0x38] sm:$0xff]  ;;  %v3438_v11 = vld [vmem:[%s8396_s2 + $0x40] sm:$0xff]  ;;  %v4200_v21 = vpack.c.bf16 %v3435_v7, %v3434_v6 }
   0x4   :  { %4193 = vmatprep.subr.bf16.mxu0 %v4192_v4  ;;  %4224 = vmatprep.subr.bf16.mxu1 %v4192_v4  ;;  %v3439_v13 = vld [vmem:[%s8396_s2 + $0x48] sm:$0xff]  ;;  %v3440_v14 = vld [vmem:[%s8396_s2 + $0x50] sm:$0xff]  ;;  %v3441_v15 = vld [vmem:[%s8396_s2 + $0x58] sm:$0xff]  ;;  %v130_v19 = vsub.s32 0, %v4326_v12  ;;  %v262_v20 = vsub.s32 1, %v4326_v12  ;;  %v747_v23 = vsub.s32 2, %v4326_v12  ;;  %v4204_v26 = vpack.c.bf16 %v3437_v10, %v3436_v9 }
   0x5   :  { %4195 = vmatpush3.bf16.msra.mxu0 %v4192_v4  ;;  %4232 = vmatpush3.bf16.msra.mxu1 %v4192_v4  ;;  %v3442_v16 = vld [vmem:[%s8396_s2 + $0x60] sm:$0xff]  ;;  %v3443_v17 = vld [vmem:[%s8396_s2 + $0x68] sm:$0xff]  ;;  %v3444_v18 = vld [vmem:[%s8396_s2 + $0x70] sm:$0xff]  ;;  %v1232_v24 = vsub.s32 3, %v4326_v12  ;;  %v1364_v25 = vsub.s32 4, %v4326_v12  ;;  %v1848_v27 = vsub.s32 5, %v4326_v12  ;;  %v4355_v28 = vpack.c.bf16 %v3439_v13, %v3438_v11 }
   0x6   :  { %4197 = vmatprep.subr.bf16.mxu0 %v4196_v8  ;;  %4225 = vmatprep.subr.bf16.mxu1 %v4196_v8  ;;  %v3445_v22 = vld [vmem:[%s8396_s2 + $0x78] sm:$0xff]  ;;  %v4357_v29 = vpack.c.bf16 %v3441_v15, %v3440_v14  ;;  %v4359_v30 = vpack.c.bf16 %v3443_v17, %v3442_v16  ;;  %v18_v32 = vld [vmem:[%s8394_s0] sm:$0xff]  ;;  %v4369_v33 = vld [vmem:[%s8394_s0 + $0x8] sm:$0xff]  ;;  %v2332_v38 = vsub.s32 6, %v4326_v12  ;;  %v2464_v42 = vsub.s32 7, %v4326_v12 }
   0x7   :  { %v4361_v31 = vpack.c.bf16 %v3445_v22, %v3444_v18  ;;  %v126_v34 = vld [vmem:[%s8395_s1] sm:$0xff]  ;;  %v4391_v43 = vld [vmem:[%s8394_s0 + $0x18] sm:$0xff]  ;;  %v4429_v61 = vld [vmem:[%s8395_s1 + $0x8] ss:$0 sm:$0xff] }
   0x8   :  { %v4374_v35 = vrot.slane %v126_v34, %v130_v19  ;;  %v4376_v36 = vrot.slane %v126_v34, %v262_v20  ;;  %v4378_v37 = vrot.slane %v126_v34, %v747_v23  ;;  %v4381_v39 = vrot.slane %v126_v34, %v1232_v24  ;;  %v4396_v44 = vld [vmem:[%s8394_s0 + $0x20] sm:$0xff]  ;;  %v4441_v2 = vld [vmem:[%s8394_s0 + $0x30] sm:$0xff]  ;;  %v4446_v3 = vld [vmem:[%s8394_s0 + $0x38] sm:$0xff] }
   0x9   :  { %4199 = vmatpush3.bf16.msra.mxu0 %v4196_v8  ;;  %4233 = vmatpush3.bf16.msra.mxu1 %v4196_v8  ;;  %v4383_v40 = vrot.slane %v126_v34, %v1364_v25  ;;  %v4385_v41 = vrot.slane %v126_v34, %v1848_v27  ;;  %v4434_v0 = vrot.slane %v126_v34, %v2332_v38  ;;  %v72_v11 = vld [vmem:[%s8394_s0 + $0x1b0] sm:$0xff]  ;;  %v4469_v12 = vld [vmem:[%s8394_s0 + $0x1b8] sm:$0xff] }
   0xa   :  { %4201 = vmatprep.subr.bf16.mxu0 %v4200_v21  ;;  %4226 = vmatprep.subr.bf16.mxu1 %v4200_v21  ;;  %v132_v45 = vmul.f32 %v4374_v35, %v18_v32  ;;  %v264_v46 = vmul.f32 %v4376_v36, %v18_v32  ;;  %v4402_v47 = vmul.f32 %v4376_v36, %v4369_v33 }
   0xb   :  { %v749_v48 = vmul.f32 %v4378_v37, %v18_v32  ;;  %v4407_v49 = vmul.f32 %v4378_v37, %v4369_v33  ;;  %v1234_v50 = vmul.f32 %v4381_v39, %v4391_v43  ;;  %v1366_v51 = vmul.f32 %v4383_v40, %v4391_v43 }
   0xc   :  { %v4415_v52 = vmul.f32 %v4383_v40, %v4396_v44  ;;  %v457_v53 = vrot.slane %v264_v46, 1  ;;  %v458_v54 = vrot.slane %v4402_v47, 1  ;;  %v1850_v56 = vmul.f32 %v4385_v41, %v4391_v43 }
   0xd   :  { %4203 = vmatpush3.bf16.msra.mxu0 %v4200_v21  ;;  %4234 = vmatpush3.bf16.msra.mxu1 %v4200_v21  ;;  %v942_v55 = vrot.slane %v749_v48, 2  ;;  %v943_v57 = vrot.slane %v4407_v49, 2  ;;  %v1558_v58 = vrot.slane %v1366_v51, 1  ;;  %v4424_v60 = vmul.f32 %v4385_v41, %v4396_v44 }
   0xe   :  { %4205 = vmatprep.subr.bf16.mxu0 %v4204_v26  ;;  %4227 = vmatprep.subr.bf16.mxu1 %v4204_v26  ;;  %v1559_v59 = vrot.slane %v4415_v52, 1  ;;  %v459_v62 = vsel %vm456_vm0, %v457_v53, %v458_v54  ;;  %v2042_v63 = vrot.slane %v1850_v56, 2  ;;  %v4436_v1 = vrot.slane %v126_v34, %v2464_v42 }
   0xf   :  { %v681_v4 = vadd.f32 %v459_v62, %v132_v45  ;;  %v944_v5 = vsel %vm941_vm1, %v942_v55, %v943_v57  ;;  %v2043_v7 = vrot.slane %v4424_v60, 2  ;;  %v2334_v8 = vmul.f32 %v4434_v0, %v4441_v2 }
  0x10   :  { %v1560_v6 = vsel %vm456_vm0, %v1558_v58, %v1559_v59  ;;  %v2466_v9 = vmul.f32 %v4436_v1, %v4441_v2  ;;  %v4461_v10 = vmul.f32 %v4436_v1, %v4446_v3  ;;  %v2950_v15 = vmul.f32 %v4429_v61, %v4441_v2 }
  0x11   :  { %4207 = vmatpush3.bf16.msra.mxu0 %v4204_v26  ;;  %4235 = vmatpush3.bf16.msra.mxu1 %v4204_v26  ;;  %v1166_v13 = vadd.f32 %v944_v5, %v681_v4  ;;  %v2044_v14 = vsel %vm941_vm1, %v2042_v63, %v2043_v7  ;;  %v4481_v18 = vmul.f32 %v4429_v61, %v4446_v3 }
  0x12   :  { %4209 = vmatprep.subr.bf16.mxu0 %v4355_v28  ;;  %4228 = vmatprep.subr.bf16.mxu1 %v4355_v28  ;;  %v2658_v16 = vrot.slane %v2466_v9, 1  ;;  %v2659_v17 = vrot.slane %v4461_v10, 1  ;;  %v164_v19 = vmul.f32 %v4374_v35, %v72_v11 }
  0x13   :  { %9 = vsyncpa [#allocation3], 0  ;;  %v1298_v20 = vadd.f32 %v1234_v50, %v1166_v13  ;;  %v3142_v21 = vrot.slane %v2950_v15, 2  ;;  %v312_v22 = vmul.f32 %v4376_v36, %v72_v11  ;;  %v4487_v23 = vmul.f32 %v4376_v36, %v4469_v12  ;;  %v4498_v26 = vld [vmem:[%s8394_s0 + $0x1c8] sm:$0xff]  ;;  %v4516_v46 = vld [vmem:[%s8394_s0 + $0x1d0] sm:$0xff] }
  0x14   :  { %v2660_v24 = vsel %vm456_vm0, %v2658_v16, %v2659_v17  ;;  %v3143_v25 = vrot.slane %v4481_v18, 2  ;;  %v797_v27 = vmul.f32 %v4378_v37, %v72_v11  ;;  %v4503_v32 = vmul.f32 %v4378_v37, %v4469_v12  ;;  %v4535_v62 = vld [vmem:[%s8394_s0 + $0x1e0] sm:$0xff]  ;;  %v4549_v9 = vld [vmem:[%s8394_s0 + $0x1e8] sm:$0xff]  ;;  %v4636_v49 = vld [vmem:[%s8394_s0 + $0x1d8] sm:$0x3] }
  0x15   :  { %4211 = vmatpush3.bf16.msra.mxu0 %v4355_v28  ;;  %4236 = vmatpush3.bf16.msra.mxu1 %v4355_v28  ;;  %v1782_v28 = vadd.f32 %v1560_v6, %v1298_v20  ;;  %v537_v34 = vrot.slane %v312_v22, 1  ;;  %v538_v38 = vrot.slane %v4487_v23, 1  ;;  %v1266_v42 = vmul.f32 %v4381_v39, %v4498_v26  ;;  %v4653_v10 = vld [vmem:[%s8394_s0 + $0x1f0] sm:$0x3] }
  0x16   :  { %4213 = vmatprep.subr.bf16.mxu0 %v4357_v29  ;;  %4229 = vmatprep.subr.bf16.mxu1 %v4357_v29  ;;  %v3144_v45 = vsel %vm941_vm1, %v3142_v21, %v3143_v25  ;;  %v1022_v48 = vrot.slane %v797_v27, 2  ;;  %v1023_v50 = vrot.slane %v4503_v32, 2  ;;  %v1414_v51 = vmul.f32 %v4383_v40, %v4498_v26 }
  0x17   :  { %v2266_v53 = vadd.f32 %v2044_v14, %v1782_v28  ;;  %v539_v55 = vsel %vm456_vm0, %v537_v34, %v538_v38  ;;  %v4526_v56 = vmul.f32 %v4383_v40, %v4516_v46  ;;  %v1898_v58 = vmul.f32 %v4385_v41, %v4498_v26  ;;  %v20_v28 = vld [vmem:[%s8394_s0 + $0x10] sm:$0x3] }
  0x18   :  { %v713_v63 = vadd.f32 %v539_v55, %v164_v19  ;;  %v1024_v4 = vsel %vm941_vm1, %v1022_v48, %v1023_v50  ;;  %v1638_v5 = vrot.slane %v1414_v51, 1  ;;  %v4542_v6 = vmul.f32 %v4385_v41, %v4516_v46 }
  0x19   :  { %4215 = vmatpush3.bf16.msra.mxu0 %v4357_v29  ;;  %4237 = vmatpush3.bf16.msra.mxu1 %v4357_v29  ;;  %v2398_v29 = vadd.f32 %v2334_v8, %v2266_v53  ;;  %v1639_v11 = vrot.slane %v4526_v56, 1  ;;  %v2122_v13 = vrot.slane %v1898_v58, 2  ;;  %v2366_v14 = vmul.f32 %v4434_v0, %v4535_v62 }
  0x1a   :  { %4217 = vmatprep.subr.bf16.mxu0 %v4359_v30  ;;  %4230 = vmatprep.subr.bf16.mxu1 %v4359_v30  ;;  %v1198_v15 = vadd.f32 %v1024_v4, %v713_v63  ;;  %v2123_v16 = vrot.slane %v4542_v6, 2  ;;  %v2514_v19 = vmul.f32 %v4436_v1, %v4535_v62  ;;  %v4559_v8 = vmul.f32 %v4436_v1, %v4549_v9  ;;  %v4590_v4 = vld [vmem:[%s8394_s0 + $0x28] sm:$0x3] }
  0x1b   :  { %v2882_v20 = vadd.f32 %v2660_v24, %v2398_v29  ;;  %v1640_v21 = vsel %vm456_vm0, %v1638_v5, %v1639_v11  ;;  %v2998_v22 = vmul.f32 %v4429_v61, %v4535_v62  ;;  %v4568_v27 = vmul.f32 %v4429_v61, %v4549_v9 }
  0x1c   :  { %v1330_v24 = vadd.f32 %v1266_v42, %v1198_v15  ;;  %v2124_v34 = vsel %vm941_vm1, %v2122_v13, %v2123_v16  ;;  %v2738_v48 = vrot.slane %v2514_v19, 1  ;;  %v2739_v51 = vrot.slane %v4559_v8, 1 }
  0x1d   :  { %4219 = vmatpush3.bf16.msra.mxu0 %v4359_v30  ;;  %4238 = vmatpush3.bf16.msra.mxu1 %v4359_v30  ;;  %v3366_v53 = vadd.f32 %v3144_v45, %v2882_v20  ;;  %v3222_v55 = vrot.slane %v2998_v22, 2  ;;  %v8399_v58 = vrot.slane %v4568_v27, 2  ;;  %v133_v63 = vmul.f32 %v4374_v35, %v4369_v33  ;;  %v4608_v20 = vld [vmem:[%s8394_s0 + $0x40] sm:$0x3] }
  0x1e   :  { %4221 = vmatprep.subr.bf16.mxu0 %v4361_v31  ;;  %4231 = vmatprep.subr.bf16.mxu1 %v4361_v31  ;;  %v1814_v30 = vadd.f32 %v1640_v21, %v1330_v24  ;;  %v2740_v42 = vsel %vm456_vm0, %v2738_v48, %v2739_v51  ;;  %v266_v5 = vmul.f32 %v4376_v36, %v20_v28 }
  0x1f   :  { %v751_v45 = vmul.f32 %v4378_v37, %v20_v28  ;;  %4096 = vmatprep.mubr.f32.mxu0 %v3366_v53  ;;  %v3224_v29 = vsel %vm941_vm1, %v3222_v55, %v8399_v58  ;;  %v1235_v33 = vmul.f32 %v4381_v39, %v4396_v44  ;;  %v1368_v13 = vmul.f32 %v4383_v40, %v4590_v4 }
  0x20   :  { %v1852_v15 = vmul.f32 %v4385_v41, %v4590_v4  ;;  %v2298_v19 = vadd.f32 %v2124_v34, %v1814_v30  ;;  %v460_v21 = vrot.slane %v266_v5, 1  ;;  %v2335_v28 = vmul.f32 %v4434_v0, %v4446_v3 }
  0x21   :  { %4223 = vmatpush3.bf16.msra.mxu0 %v4361_v31  ;;  %4239 = vmatpush3.bf16.msra.mxu1 %v4361_v31  ;;  %v945_v22 = vrot.slane %v751_v45, 2  ;;  %v1561_v24 = vrot.slane %v1368_v13, 1  ;;  %v2468_v53 = vmul.f32 %v4436_v1, %v4608_v20  ;;  %v2952_v55 = vmul.f32 %v4429_v61, %v4608_v20  ;;  %v74_v31 = vld [vmem:[%s8394_s0 + $0x1c0] sm:$0x3] }
  0x22   :  { %v2045_v48 = vrot.slane %v1852_v15, 2  ;;  %v2430_v34 = vadd.f32 %v2366_v14, %v2298_v19  ;;  %v461_v30 = vsel %vm456_vm0, %v458_v54, %v460_v21  ;;  %v165_v45 = vmul.f32 %v4374_v35, %v4469_v12 }
  0x23   :  { %v946_v5 = vsel %vm941_vm1, %v943_v57, %v945_v22  ;;  %v682_v13 = vadd.f32 %v461_v30, %v133_v63  ;;  %v1562_v15 = vsel %vm456_vm0, %v1559_v59, %v1561_v24  ;;  %v2661_v19 = vrot.slane %v2468_v53, 1 }
  0x24   :  { %v2046_v14 = vsel %vm941_vm1, %v2043_v7, %v2045_v48  ;;  %v2914_v47 = vadd.f32 %v2740_v42, %v2430_v34  ;;  %v3145_v58 = vrot.slane %v2952_v55, 2  ;;  %v314_v54 = vmul.f32 %v4376_v36, %v74_v31 }
  0x25   :  { %v799_v57 = vmul.f32 %v4378_v37, %v74_v31  ;;  %v1167_v12 = vadd.f32 %v946_v5, %v682_v13  ;;  %v2662_v52 = vsel %vm456_vm0, %v2659_v17, %v2661_v19  ;;  %v1267_v59 = vmul.f32 %v4381_v39, %v4516_v46 }
  0x26   :  { %v1416_v60 = vmul.f32 %v4383_v40, %v4636_v49  ;;  %v3398_v7 = vadd.f32 %v3224_v29, %v2914_v47  ;;  %v3146_v63 = vsel %vm941_vm1, %v3143_v25, %v3145_v58  ;;  %v540_v42 = vrot.slane %v314_v54, 1 }
  0x27   :  { %v1025_v21 = vrot.slane %v799_v57, 2  ;;  %v1299_v22 = vadd.f32 %v1235_v33, %v1167_v12  ;;  %v1900_v24 = vmul.f32 %v4385_v41, %v4636_v49  ;;  %v2367_v48 = vmul.f32 %v4434_v0, %v4549_v9 }
  0x28   :  { %v1641_v17 = vrot.slane %v1416_v60, 1  ;;  %4144 = vmatprep.mubr.f32.mxu1 %v3398_v7  ;;  %v541_v18 = vsel %vm456_vm0, %v538_v38, %v540_v42  ;;  %v2516_v58 = vmul.f32 %v4436_v1, %v4653_v10  ;;  %v3000_v29 = vmul.f32 %v4429_v61, %v4653_v10 }
  0x29   :  { %v1026_v25 = vsel %vm941_vm1, %v1023_v50, %v1025_v21  ;;  %v1783_v33 = vadd.f32 %v1562_v15, %v1299_v22  ;;  %v714_v53 = vadd.f32 %v541_v18, %v165_v45  ;;  %v2125_v31 = vrot.slane %v1900_v24, 2  ;;  %v4726_v18 = vld [vmem:[%s8394_s0 + $0x50] sm:$0xff] }
  0x2a   :  { %v1642_v55 = vsel %vm456_vm0, %v1639_v11, %v1641_v17  ;;  %v2741_v23 = vrot.slane %v2516_v58, 1  ;;  %v3225_v34 = vrot.slane %v3000_v29, 2  ;;  %v134_v32 = vmul.f32 %v4374_v35, %v4391_v43 }
  0x2b   :  { %v267_v38 = vmul.f32 %v4376_v36, %v4391_v43  ;;  %v2267_v50 = vadd.f32 %v2046_v14, %v1783_v33  ;;  %v1199_v30 = vadd.f32 %v1026_v25, %v714_v53  ;;  %v2126_v5 = vsel %vm941_vm1, %v2123_v16, %v2125_v31 }
  0x2c   :  { %v4681_v56 = vmul.f32 %v4376_v36, %v4396_v44  ;;  %v2742_v11 = vsel %vm456_vm0, %v2739_v51, %v2741_v23  ;;  %v8476_v45 = vrot.slane %v4568_v27, 2  ;;  %v752_v14 = vmul.f32 %v4378_v37, %v4391_v43 }
  0x2d   :  { %v462_v15 = vrot.slane %v267_v38, 1  ;;  %v2399_v19 = vadd.f32 %v2335_v28, %v2267_v50  ;;  %v1331_v6 = vadd.f32 %v1267_v59, %v1199_v30  ;;  %v4694_v47 = vmul.f32 %v4378_v37, %v4396_v44 }
  0x2e   :  { %v3226_v13 = vsel %vm941_vm1, %v8476_v45, %v3225_v34  ;;  %v463_v16 = vrot.slane %v4681_v56, 1  ;;  %v947_v54 = vrot.slane %v752_v14, 2  ;;  %v1236_v8 = vmul.f32 %v4381_v39, %v4441_v2 }
  0x2f   :  { %v1369_v27 = vmul.f32 %v4383_v40, %v4441_v2  ;;  %v4702_v51 = vmul.f32 %v4383_v40, %v4446_v3  ;;  %v2883_v43 = vadd.f32 %v2662_v52, %v2399_v19  ;;  %v1815_v28 = vadd.f32 %v1642_v55, %v1331_v6  ;;  %v4714_v52 = vld [vmem:[%s8394_s0 + $0x48] sm:$0xff] }
  0x30   :  { %v464_v57 = vsel %vm456_vm0, %v462_v15, %v463_v16  ;;  %v948_v12 = vrot.slane %v4694_v47, 2  ;;  %v1853_v42 = vmul.f32 %v4385_v41, %v4441_v2  ;;  %v4721_v24 = vmul.f32 %v4385_v41, %v4446_v3 }
  0x31   :  { %v683_v59 = vadd.f32 %v464_v57, %v134_v32  ;;  %v1563_v60 = vrot.slane %v1369_v27, 1  ;;  %v1564_v7 = vrot.slane %v4702_v51, 1  ;;  %v3367_v21 = vadd.f32 %v3146_v63, %v2883_v43 }
  0x32   :  { %v2299_v22 = vadd.f32 %v2126_v5, %v1815_v28  ;;  %v949_v17 = vsel %vm941_vm1, %v947_v54, %v948_v12  ;;  %v2047_v58 = vrot.slane %v1853_v42, 2  ;;  %v2336_v29 = vmul.f32 %v4434_v0, %v4714_v52 }
  0x33   :  { %v1168_v63 = vadd.f32 %v949_v17, %v683_v59  ;;  %v1565_v25 = vsel %vm456_vm0, %v1563_v60, %v1564_v7  ;;  %4097 = vmatmul.mubr.f32.vlgmr.msra.gmra.mrb[0].mxu0 %v3367_v21  ;;  %v2048_v53 = vrot.slane %v4721_v24, 2  ;;  %v2469_v55 = vmul.f32 %v4436_v1, %v4714_v52  ;;  %v4779_v21 = vld [vmem:[%s8394_s0 + $0x1f8] sm:$0xff] }
  0x34   :  { %v2431_v33 = vadd.f32 %v2367_v48, %v2299_v22  ;;  %v4738_v31 = vmul.f32 %v4436_v1, %v4726_v18  ;;  %v2953_v34 = vmul.f32 %v4429_v61, %v4714_v52  ;;  %v4744_v32 = vmul.f32 %v4429_v61, %v4726_v18 }
  0x35   :  { %v1300_v23 = vadd.f32 %v1236_v8, %v1168_v63  ;;  %v166_v48 = vmul.f32 %v4374_v35, %v4498_v26  ;;  %v2049_v50 = vsel %vm941_vm1, %v2047_v58, %v2048_v53  ;;  %v2663_v30 = vrot.slane %v2469_v55, 1 }
  0x36   :  { %v2915_v38 = vadd.f32 %v2742_v11, %v2431_v33  ;;  %v2664_v5 = vrot.slane %v4738_v31, 1  ;;  %v3147_v15 = vrot.slane %v2953_v34, 2  ;;  %v3148_v14 = vrot.slane %v4744_v32, 2 }
  0x37   :  { %v1784_v45 = vadd.f32 %v1565_v25, %v1300_v23  ;;  %v315_v19 = vmul.f32 %v4376_v36, %v4498_v26  ;;  %v4760_v11 = vmul.f32 %v4376_v36, %v4516_v46  ;;  %v800_v8 = vmul.f32 %v4378_v37, %v4498_v26  ;;  %v4800_v23 = vld [vmem:[%s8394_s0 + $0x200] sm:$0xff] }
  0x38   :  { %v3399_v6 = vadd.f32 %v3226_v13, %v2915_v38  ;;  %v2665_v54 = vsel %vm456_vm0, %v2663_v30, %v2664_v5  ;;  %v3149_v43 = vsel %vm941_vm1, %v3147_v15, %v3148_v14  ;;  %v4769_v13 = vmul.f32 %v4378_v37, %v4516_v46 }
  0x39   :  { %v2268_v27 = vadd.f32 %v2049_v50, %v1784_v45  ;;  %v542_v28 = vrot.slane %v315_v19, 1  ;;  %v543_v57 = vrot.slane %v4760_v11, 1  ;;  %v1027_v59 = vrot.slane %v800_v8, 2 }
  0x3a   :  { %4145 = vmatmul.mubr.f32.vlgmr.msra.gmra.mrb[0].mxu1 %v3399_v6  ;;  %v1268_v60 = vmul.f32 %v4381_v39, %v4535_v62  ;;  %v1417_v26 = vmul.f32 %v4383_v40, %v4535_v62  ;;  %v1028_v22 = vrot.slane %v4769_v13, 2  ;;  %v4784_v17 = vmul.f32 %v4383_v40, %v4549_v9 }
  0x3b   :  { %v2400_v42 = vadd.f32 %v2336_v29, %v2268_v27  ;;  %v1901_v63 = vmul.f32 %v4385_v41, %v4535_v62  ;;  %v544_v25 = vsel %vm456_vm0, %v542_v28, %v543_v57  ;;  %v4793_v29 = vmul.f32 %v4385_v41, %v4549_v9 }
  0x3c   :  { %v1643_v58 = vrot.slane %v1417_v26, 1  ;;  %v2368_v33 = vmul.f32 %v4434_v0, %v4779_v21  ;;  %v715_v34 = vadd.f32 %v544_v25, %v166_v48  ;;  %v1029_v38 = vsel %vm941_vm1, %v1027_v59, %v1028_v22 }
  0x3d   :  { %v2884_v55 = vadd.f32 %v2665_v54, %v2400_v42  ;;  %v8402_v50 = vrot.slane %v4784_v17, 1  ;;  %v2127_v30 = vrot.slane %v1901_v63, 2  ;;  %v8401_v45 = vrot.slane %v4793_v29, 2 }
  0x3e   :  { %v2517_v15 = vmul.f32 %v4436_v1, %v4779_v21  ;;  %v4811_v19 = vmul.f32 %v4436_v1, %v4800_v23  ;;  %v1200_v54 = vadd.f32 %v1029_v38, %v715_v34  ;;  %v3001_v8 = vmul.f32 %v4429_v61, %v4779_v21 }
  0x3f   :  { %v3368_v6 = vadd.f32 %v3149_v43, %v2884_v55  ;;  %v1645_v48 = vsel %vm456_vm0, %v1643_v58, %v8402_v50  ;;  %v2129_v27 = vsel %vm941_vm1, %v2127_v30, %v8401_v45  ;;  %v4824_v26 = vmul.f32 %v4429_v61, %v4800_v23 }
  0x40   :  { %v2743_v28 = vrot.slane %v2517_v15, 1  ;;  %v8400_v59 = vrot.slane %v4811_v19, 1  ;;  %v1332_v43 = vadd.f32 %v1268_v60, %v1200_v54  ;;  %v3227_v42 = vrot.slane %v3001_v8, 2 }
  0x41   :  { %4099 = vmatprep.mubr.f32.mxu0 %v3368_v6  ;;  %v135_v63 = vmul.f32 %v4374_v35, %v4396_v44  ;;  %v269_v25 = vmul.f32 %v4376_v36, %v4590_v4  ;;  %v8403_v55 = vrot.slane %v4824_v26, 2  ;;  %v754_v34 = vmul.f32 %v4378_v37, %v4590_v4  ;;  %v4841_v44 = vld [vmem:[%s8394_s0 + $0x58] sm:$0x3] }
  0x42   :  { %v2745_v58 = vsel %vm456_vm0, %v2743_v28, %v8400_v59  ;;  %v1237_v38 = vmul.f32 %v4381_v39, %v4446_v3  ;;  %v1816_v60 = vadd.f32 %v1645_v48, %v1332_v43  ;;  %v1371_v15 = vmul.f32 %v4383_v40, %v4608_v20 }
  0x43   :  { %v465_v30 = vrot.slane %v269_v25, 1  ;;  %v1855_v6 = vmul.f32 %v4385_v41, %v4608_v20  ;;  %v3229_v4 = vsel %vm941_vm1, %v3227_v42, %v8403_v55  ;;  %v950_v54 = vrot.slane %v754_v34, 2 }
  0x44   :  { %v2337_v48 = vmul.f32 %v4434_v0, %v4726_v18  ;;  %v2471_v8 = vmul.f32 %v4436_v1, %v4841_v44  ;;  %v2300_v28 = vadd.f32 %v2129_v27, %v1816_v60  ;;  %v1566_v25 = vrot.slane %v1371_v15, 1 }
  0x45   :  { %v466_v43 = vsel %vm456_vm0, %v463_v16, %v465_v30  ;;  %v2050_v59 = vrot.slane %v1855_v6, 2  ;;  %v951_v50 = vsel %vm941_vm1, %v948_v12, %v950_v54  ;;  %v2955_v34 = vmul.f32 %v4429_v61, %v4841_v44 }
  0x46   :  { %v684_v45 = vadd.f32 %v466_v43, %v135_v63  ;;  %v2666_v42 = vrot.slane %v2471_v8, 1  ;;  %v2432_v55 = vadd.f32 %v2368_v33, %v2300_v28  ;;  %v1567_v27 = vsel %vm456_vm0, %v1564_v7, %v1566_v25 }
  0x47   :  { %v2051_v56 = vsel %vm941_vm1, %v2048_v53, %v2050_v59  ;;  %v167_v16 = vmul.f32 %v4374_v35, %v4516_v46  ;;  %v3150_v12 = vrot.slane %v2955_v34, 2  ;;  %v317_v33 = vmul.f32 %v4376_v36, %v4636_v49 }
  0x48   :  { %v1169_v63 = vadd.f32 %v951_v50, %v684_v45  ;;  %v2667_v47 = vsel %vm456_vm0, %v2664_v5, %v2666_v42  ;;  %v2916_v60 = vadd.f32 %v2745_v58, %v2432_v55  ;;  %v802_v51 = vmul.f32 %v4378_v37, %v4636_v49  ;;  %v4889_v49 = vld [vmem:[%s8394_s0 + $0x208] sm:$0x3] }
  0x49   :  { %v1269_v7 = vmul.f32 %v4381_v39, %v4549_v9  ;;  %v1419_v24 = vmul.f32 %v4383_v40, %v4653_v10  ;;  %v3151_v53 = vsel %vm941_vm1, %v3148_v14, %v3150_v12  ;;  %v545_v31 = vrot.slane %v317_v33, 1 }
  0x4a   :  { %v1301_v46 = vadd.f32 %v1237_v38, %v1169_v63  ;;  %v1903_v5 = vmul.f32 %v4385_v41, %v4653_v10  ;;  %v3400_v50 = vadd.f32 %v3229_v4, %v2916_v60  ;;  %v1030_v45 = vrot.slane %v802_v51, 2 }
  0x4b   :  { %v1646_v59 = vrot.slane %v1419_v24, 1  ;;  %v2369_v58 = vmul.f32 %v4434_v0, %v4800_v23  ;;  %v546_v32 = vsel %vm456_vm0, %v543_v57, %v545_v31  ;;  %v2519_v38 = vmul.f32 %v4436_v1, %v4889_v49 }
  0x4c   :  { %v1785_v55 = vadd.f32 %v1567_v27, %v1301_v46  ;;  %v2130_v14 = vrot.slane %v1903_v5, 2  ;;  %4147 = vmatprep.mubr.f32.mxu1 %v3400_v50  ;;  %v716_v30 = vadd.f32 %v546_v32, %v167_v16  ;;  %v1031_v15 = vsel %vm941_vm1, %v1028_v22, %v1030_v45 }
  0x4d   :  { %v8477_v6 = vrot.slane %v4784_v17, 1  ;;  %v3003_v54 = vmul.f32 %v4429_v61, %v4889_v49  ;;  %v8478_v57 = vrot.slane %v4793_v29, 2  ;;  %v2746_v28 = vrot.slane %v2519_v38, 1 }
  0x4e   :  { %v2269_v11 = vadd.f32 %v2051_v56, %v1785_v55  ;;  %v136_v43 = vmul.f32 %v4374_v35, %v4441_v2  ;;  %v1201_v25 = vadd.f32 %v1031_v15, %v716_v30  ;;  %v270_v22 = vmul.f32 %v4376_v36, %v4441_v2 }
  0x4f   :  { %v1647_v4 = vsel %vm456_vm0, %v8477_v6, %v1646_v59  ;;  %v2131_v8 = vsel %vm941_vm1, %v8478_v57, %v2130_v14  ;;  %v3230_v13 = vrot.slane %v3003_v54, 2  ;;  %v4915_v17 = vmul.f32 %v4376_v36, %v4446_v3  ;;  %v4950_v59 = vld [vmem:[%s8394_s0 + $0x60] sm:$0xff]  ;;  %v4960_v14 = vld [vmem:[%s8394_s0 + $0x68] sm:$0xff] }
  0x50   :  { %v2401_v42 = vadd.f32 %v2337_v48, %v2269_v11  ;;  %v8479_v34 = vrot.slane %v4811_v19, 1  ;;  %v755_v27 = vmul.f32 %v4378_v37, %v4441_v2  ;;  %v4924_v56 = vmul.f32 %v4378_v37, %v4446_v3 }
  0x51   :  { %v1333_v16 = vadd.f32 %v1269_v7, %v1201_v25  ;;  %v8480_v63 = vrot.slane %v4824_v26, 2  ;;  %v467_v33 = vrot.slane %v270_v22, 1  ;;  %v468_v60 = vrot.slane %v4915_v17, 1 }
  0x52   :  { %v2747_v29 = vsel %vm456_vm0, %v8479_v34, %v2746_v28  ;;  %v2885_v48 = vadd.f32 %v2667_v47, %v2401_v42  ;;  %v952_v51 = vrot.slane %v755_v27, 2  ;;  %v953_v19 = vrot.slane %v4924_v56, 2 }
  0x53   :  { %v3231_v12 = vsel %vm941_vm1, %v8480_v63, %v3230_v13  ;;  %v1238_v24 = vmul.f32 %v4381_v39, %v4714_v52  ;;  %v1817_v2 = vadd.f32 %v1647_v4, %v1333_v16  ;;  %v469_v46 = vsel %vm456_vm0, %v467_v33, %v468_v60 }
  0x54   :  { %v1372_v26 = vmul.f32 %v4383_v40, %v4714_v52  ;;  %v4940_v7 = vmul.f32 %v4383_v40, %v4726_v18  ;;  %v3369_v31 = vadd.f32 %v3151_v53, %v2885_v48  ;;  %v685_v47 = vadd.f32 %v469_v46, %v136_v43 }
  0x55   :  { %v954_v5 = vsel %vm941_vm1, %v952_v51, %v953_v19  ;;  %v1856_v50 = vmul.f32 %v4385_v41, %v4714_v52  ;;  %v2301_v45 = vadd.f32 %v2131_v8, %v1817_v2  ;;  %v4955_v53 = vmul.f32 %v4385_v41, %v4726_v18 }
  0x56   :  { %v1568_v55 = vrot.slane %v1372_v26, 1  ;;  %v1569_v32 = vrot.slane %v4940_v7, 1  ;;  %4100 = vmatmul.mubr.f32.gmra.mrb[2].mxu0 %v3369_v31  ;;  %v1170_v38 = vadd.f32 %v954_v5, %v685_v47  ;;  %v2338_v15 = vmul.f32 %v4434_v0, %v4950_v59 }
  0x57   :  { %v2052_v30 = vrot.slane %v1856_v50, 2  ;;  %v2472_v6 = vmul.f32 %v4436_v1, %v4950_v59  ;;  %v2433_v4 = vadd.f32 %v2369_v58, %v2301_v45  ;;  %v2053_v11 = vrot.slane %v4955_v53, 2  ;;  %v5013_v50 = vld [vmem:[%s8394_s0 + $0x210] sm:$0xff] }
  0x58   :  { %v1570_v54 = vsel %vm456_vm0, %v1568_v55, %v1569_v32  ;;  %v4972_v57 = vmul.f32 %v4436_v1, %v4960_v14  ;;  %v1302_v8 = vadd.f32 %v1238_v24, %v1170_v38  ;;  %v2956_v43 = vmul.f32 %v4429_v61, %v4950_v59 }
  0x59   :  { %v2668_v28 = vrot.slane %v2472_v6, 1  ;;  %v4978_v25 = vmul.f32 %v4429_v61, %v4960_v14  ;;  %v2917_v58 = vadd.f32 %v2747_v29, %v2433_v4  ;;  %v2054_v13 = vsel %vm941_vm1, %v2052_v30, %v2053_v11 }
  0x5a   :  { %v2669_v22 = vrot.slane %v4972_v57, 1  ;;  %v168_v42 = vmul.f32 %v4374_v35, %v4535_v62  ;;  %v1786_v34 = vadd.f32 %v1570_v54, %v1302_v8  ;;  %v3152_v27 = vrot.slane %v2956_v43, 2  ;;  %v5034_v8 = vld [vmem:[%s8394_s0 + $0x218] sm:$0xff] }
  0x5b   :  { %v3153_v16 = vrot.slane %v4978_v25, 2  ;;  %v318_v63 = vmul.f32 %v4376_v36, %v4535_v62  ;;  %v3401_v33 = vadd.f32 %v3231_v12, %v2917_v58  ;;  %v4994_v48 = vmul.f32 %v4376_v36, %v4549_v9 }
  0x5c   :  { %v2670_v29 = vsel %vm456_vm0, %v2668_v28, %v2669_v22  ;;  %v803_v51 = vmul.f32 %v4378_v37, %v4535_v62  ;;  %v2270_v24 = vadd.f32 %v2054_v13, %v1786_v34  ;;  %v5003_v12 = vmul.f32 %v4378_v37, %v4549_v9 }
  0x5d   :  { %v3154_v2 = vsel %vm941_vm1, %v3152_v27, %v3153_v16  ;;  %v547_v46 = vrot.slane %v318_v63, 1  ;;  %4148 = vmatmul.mubr.f32.gmra.mrb[2].mxu1 %v3401_v33  ;;  %v548_v26 = vrot.slane %v4994_v48, 1  ;;  %v1270_v47 = vmul.f32 %v4381_v39, %v4779_v21 }
  0x5e   :  { %v1032_v31 = vrot.slane %v803_v51, 2  ;;  %v1420_v62 = vmul.f32 %v4383_v40, %v4779_v21  ;;  %v2402_v5 = vadd.f32 %v2338_v15, %v2270_v24  ;;  %v1033_v45 = vrot.slane %v5003_v12, 2 }
  0x5f   :  { %v5018_v55 = vmul.f32 %v4383_v40, %v4800_v23  ;;  %v1904_v38 = vmul.f32 %v4385_v41, %v4779_v21  ;;  %v549_v30 = vsel %vm456_vm0, %v547_v46, %v548_v26  ;;  %v5027_v15 = vmul.f32 %v4385_v41, %v4800_v23 }
  0x60   :  { %v1648_v6 = vrot.slane %v1420_v62, 1  ;;  %v2370_v4 = vmul.f32 %v4434_v0, %v5013_v50  ;;  %v2886_v54 = vadd.f32 %v2670_v29, %v2402_v5  ;;  %v717_v28 = vadd.f32 %v549_v30, %v168_v42 }
  0x61   :  { %v1034_v43 = vsel %vm941_vm1, %v1032_v31, %v1033_v45  ;;  %v8406_v58 = vrot.slane %v5018_v55, 1  ;;  %v2132_v13 = vrot.slane %v1904_v38, 2  ;;  %v8405_v34 = vrot.slane %v5027_v15, 2 }
  0x62   :  { %v2520_v27 = vmul.f32 %v4436_v1, %v5013_v50  ;;  %v5045_v63 = vmul.f32 %v4436_v1, %v5034_v8  ;;  %v3370_v33 = vadd.f32 %v3154_v2, %v2886_v54  ;;  %v1202_v29 = vadd.f32 %v1034_v43, %v717_v28 }
  0x63   :  { %v1650_v42 = vsel %vm456_vm0, %v1648_v6, %v8406_v58  ;;  %v3004_v51 = vmul.f32 %v4429_v61, %v5013_v50  ;;  %v2134_v24 = vsel %vm941_vm1, %v2132_v13, %v8405_v34  ;;  %v5058_v62 = vmul.f32 %v4429_v61, %v5034_v8 }
  0x64   :  { %v2748_v46 = vrot.slane %v2520_v27, 1  ;;  %v8404_v31 = vrot.slane %v5045_v63, 1  ;;  %4102 = vmatprep.mubr.f32.mxu0 %v3370_v33  ;;  %v1334_v2 = vadd.f32 %v1270_v47, %v1202_v29  ;;  %v137_v38 = vmul.f32 %v4374_v35, %v4446_v3  ;;  %v5075_v3 = vld [vmem:[%s8394_s0 + $0x70] sm:$0x3] }
  0x65   :  { %v3232_v5 = vrot.slane %v3004_v51, 2  ;;  %v272_v30 = vmul.f32 %v4376_v36, %v4608_v20  ;;  %v8407_v54 = vrot.slane %v5058_v62, 2  ;;  %v757_v28 = vmul.f32 %v4378_v37, %v4608_v20 }
  0x66   :  { %v2750_v6 = vsel %vm456_vm0, %v2748_v46, %v8404_v31  ;;  %v1239_v43 = vmul.f32 %v4381_v39, %v4726_v18  ;;  %v1818_v47 = vadd.f32 %v1650_v42, %v1334_v2  ;;  %v1374_v27 = vmul.f32 %v4383_v40, %v4841_v44 }
  0x67   :  { %v470_v13 = vrot.slane %v272_v30, 1  ;;  %v1858_v33 = vmul.f32 %v4385_v41, %v4841_v44  ;;  %v3234_v20 = vsel %vm941_vm1, %v3232_v5, %v8407_v54  ;;  %v955_v29 = vrot.slane %v757_v28, 2 }
  0x68   :  { %v2339_v42 = vmul.f32 %v4434_v0, %v4960_v14  ;;  %v2474_v51 = vmul.f32 %v4436_v1, %v5075_v3  ;;  %v2302_v46 = vadd.f32 %v2134_v24, %v1818_v47  ;;  %v1571_v30 = vrot.slane %v1374_v27, 1 }
  0x69   :  { %v471_v2 = vsel %vm456_vm0, %v468_v60, %v470_v13  ;;  %v2055_v31 = vrot.slane %v1858_v33, 2  ;;  %v956_v58 = vsel %vm941_vm1, %v953_v19, %v955_v29  ;;  %v2958_v28 = vmul.f32 %v4429_v61, %v5075_v3 }
  0x6a   :  { %v686_v34 = vadd.f32 %v471_v2, %v137_v38  ;;  %v2671_v5 = vrot.slane %v2474_v51, 1  ;;  %v2434_v54 = vadd.f32 %v2370_v4, %v2302_v46  ;;  %v1572_v24 = vsel %vm456_vm0, %v1569_v32, %v1571_v30 }
  0x6b   :  { %v2056_v17 = vsel %vm941_vm1, %v2053_v11, %v2055_v31  ;;  %v169_v60 = vmul.f32 %v4374_v35, %v4549_v9  ;;  %v3155_v19 = vrot.slane %v2958_v28, 2  ;;  %v320_v4 = vmul.f32 %v4376_v36, %v4653_v10 }
  0x6c   :  { %v1171_v38 = vadd.f32 %v956_v58, %v686_v34  ;;  %v2672_v56 = vsel %vm456_vm0, %v2669_v22, %v2671_v5  ;;  %v2918_v47 = vadd.f32 %v2750_v6, %v2434_v54  ;;  %v805_v7 = vmul.f32 %v4378_v37, %v4653_v10  ;;  %v5123_v10 = vld [vmem:[%s8394_s0 + $0x220] sm:$0x3] }
  0x6d   :  { %v1271_v32 = vmul.f32 %v4381_v39, %v4800_v23  ;;  %v1422_v53 = vmul.f32 %v4383_v40, %v4889_v49  ;;  %v3156_v11 = vsel %vm941_vm1, %v3153_v16, %v3155_v19  ;;  %v550_v57 = vrot.slane %v320_v4, 1 }
  0x6e   :  { %v1303_v9 = vadd.f32 %v1239_v43, %v1171_v38  ;;  %v1906_v22 = vmul.f32 %v4385_v41, %v4889_v49  ;;  %v3402_v58 = vadd.f32 %v3234_v20, %v2918_v47  ;;  %v1035_v34 = vrot.slane %v805_v7, 2 }
  0x6f   :  { %v1651_v31 = vrot.slane %v1422_v53, 1  ;;  %v2371_v6 = vmul.f32 %v4434_v0, %v5034_v8  ;;  %v551_v25 = vsel %vm456_vm0, %v548_v26, %v550_v57  ;;  %v2522_v43 = vmul.f32 %v4436_v1, %v5123_v10 }
  0x70   :  { %v1787_v54 = vadd.f32 %v1572_v24, %v1303_v9  ;;  %v2135_v16 = vrot.slane %v1906_v22, 2  ;;  %4150 = vmatprep.mubr.f32.mxu1 %v3402_v58  ;;  %v718_v13 = vadd.f32 %v551_v25, %v169_v60  ;;  %v1036_v27 = vsel %vm941_vm1, %v1033_v45, %v1035_v34 }
  0x71   :  { %v8481_v33 = vrot.slane %v5018_v55, 1  ;;  %v3006_v29 = vmul.f32 %v4429_v61, %v5123_v10  ;;  %v8482_v26 = vrot.slane %v5027_v15, 2  ;;  %v2751_v46 = vrot.slane %v2522_v43, 1 }
  0x72   :  { %v2271_v48 = vadd.f32 %v2056_v17, %v1787_v54  ;;  %v138_v2 = vmul.f32 %v4374_v35, %v4714_v52  ;;  %v1203_v30 = vadd.f32 %v1036_v27, %v718_v13  ;;  %v273_v45 = vmul.f32 %v4376_v36, %v4714_v52 }
  0x73   :  { %v1652_v20 = vsel %vm456_vm0, %v8481_v33, %v1651_v31  ;;  %v2136_v51 = vsel %vm941_vm1, %v8482_v26, %v2135_v16  ;;  %v3235_v12 = vrot.slane %v3006_v29, 2  ;;  %v5149_v55 = vmul.f32 %v4376_v36, %v4726_v18  ;;  %v5184_v31 = vld [vmem:[%s8394_s0 + $0x78] sm:$0xff]  ;;  %v5194_v16 = vld [vmem:[%s8394_s0 + $0x80] sm:$0xff] }
  0x74   :  { %v2403_v5 = vadd.f32 %v2339_v42, %v2271_v48  ;;  %v8483_v28 = vrot.slane %v5045_v63, 1  ;;  %v758_v24 = vmul.f32 %v4378_v37, %v4714_v52  ;;  %v5158_v17 = vmul.f32 %v4378_v37, %v4726_v18 }
  0x75   :  { %v1335_v60 = vadd.f32 %v1271_v32, %v1203_v30  ;;  %v8484_v38 = vrot.slane %v5058_v62, 2  ;;  %v472_v4 = vrot.slane %v273_v45, 1  ;;  %v473_v47 = vrot.slane %v5149_v55, 1 }
  0x76   :  { %v2752_v15 = vsel %vm456_vm0, %v8483_v28, %v2751_v46  ;;  %v2887_v42 = vadd.f32 %v2672_v56, %v2403_v5  ;;  %v957_v7 = vrot.slane %v758_v24, 2  ;;  %v958_v63 = vrot.slane %v5158_v17, 2 }
  0x77   :  { %v3236_v19 = vsel %vm941_vm1, %v8484_v38, %v3235_v12  ;;  %v1240_v53 = vmul.f32 %v4381_v39, %v4950_v59  ;;  %v1819_v52 = vadd.f32 %v1652_v20, %v1335_v60  ;;  %v474_v9 = vsel %vm456_vm0, %v472_v4, %v473_v47 }
  0x78   :  { %v1375_v62 = vmul.f32 %v4383_v40, %v4950_v59  ;;  %v5174_v32 = vmul.f32 %v4383_v40, %v4960_v14  ;;  %v3371_v57 = vadd.f32 %v3156_v11, %v2887_v42  ;;  %v687_v56 = vadd.f32 %v474_v9, %v138_v2 }
  0x79   :  { %v959_v22 = vsel %vm941_vm1, %v957_v7, %v958_v63  ;;  %v1859_v58 = vmul.f32 %v4385_v41, %v4950_v59  ;;  %v2303_v34 = vadd.f32 %v2136_v51, %v1819_v52  ;;  %v5189_v11 = vmul.f32 %v4385_v41, %v4960_v14 }
  0x7a   :  { %v1573_v54 = vrot.slane %v1375_v62, 1  ;;  %v1574_v25 = vrot.slane %v5174_v32, 1  ;;  %4103 = vmatmul.mubr.f32.gmra.mrb[4].mxu0 %v3371_v57  ;;  %v1172_v43 = vadd.f32 %v959_v22, %v687_v56  ;;  %v2340_v27 = vmul.f32 %v4434_v0, %v5184_v31  ;;  %v5247_v22 = vld [vmem:[%s8394_s0 + $0x228] sm:$0xff] }
  0x7b   :  { %v2057_v13 = vrot.slane %v1859_v58, 2  ;;  %v2475_v33 = vmul.f32 %v4436_v1, %v5184_v31  ;;  %v2435_v20 = vadd.f32 %v2371_v6, %v2303_v34  ;;  %v2058_v48 = vrot.slane %v5189_v11, 2 }
  0x7c   :  { %v1575_v29 = vsel %vm456_vm0, %v1573_v54, %v1574_v25  ;;  %v5206_v26 = vmul.f32 %v4436_v1, %v5194_v16  ;;  %v1304_v51 = vadd.f32 %v1240_v53, %v1172_v43  ;;  %v2959_v2 = vmul.f32 %v4429_v61, %v5184_v31 }
  0x7d   :  { %v2673_v46 = vrot.slane %v2475_v33, 1  ;;  %v5212_v30 = vmul.f32 %v4429_v61, %v5194_v16  ;;  %v2919_v6 = vadd.f32 %v2752_v15, %v2435_v20  ;;  %v2059_v12 = vsel %vm941_vm1, %v2057_v13, %v2058_v48 }
  0x7e   :  { %v2674_v45 = vrot.slane %v5206_v26, 1  ;;  %v170_v5 = vmul.f32 %v4374_v35, %v4779_v21  ;;  %v1788_v28 = vadd.f32 %v1575_v29, %v1304_v51  ;;  %v3157_v24 = vrot.slane %v2959_v2, 2  ;;  %v5268_v29 = vld [vmem:[%s8394_s0 + $0x230] sm:$0xff] }
  0x7f   :  { %v3158_v60 = vrot.slane %v5212_v30, 2  ;;  %v321_v38 = vmul.f32 %v4376_v36, %v4779_v21  ;;  %v3403_v4 = vadd.f32 %v3236_v19, %v2919_v6  ;;  %v5228_v15 = vmul.f32 %v4376_v36, %v4800_v23 }
  0x80   :  { %v2675_v61 = vsel %vm456_vm0, %v2673_v46, %v2674_v45  ;;  %v806_v42 = vmul.f32 %v4378_v37, %v4779_v21  ;;  %v2272_v7 = vadd.f32 %v2059_v12, %v1788_v28  ;;  %v5237_v19 = vmul.f32 %v4378_v37, %v4800_v23 }
  0x81   :  { %v3159_v53 = vsel %vm941_vm1, %v3157_v24, %v3158_v60  ;;  %v552_v52 = vrot.slane %v321_v38, 1  ;;  %4151 = vmatmul.mubr.f32.gmra.mrb[4].mxu1 %v3403_v4  ;;  %v553_v9 = vrot.slane %v5228_v15, 1  ;;  %v1272_v57 = vmul.f32 %v4381_v39, %v5013_v50 }
  0x82   :  { %v1037_v62 = vrot.slane %v806_v42, 2  ;;  %v1423_v21 = vmul.f32 %v4383_v40, %v5013_v50  ;;  %v2404_v56 = vadd.f32 %v2340_v27, %v2272_v7  ;;  %v1038_v58 = vrot.slane %v5237_v19, 2 }
  0x83   :  { %v5252_v34 = vmul.f32 %v4383_v40, %v5034_v8  ;;  %v1907_v54 = vmul.f32 %v4385_v41, %v5013_v50  ;;  %v554_v43 = vsel %vm456_vm0, %v552_v52, %v553_v9  ;;  %v5261_v27 = vmul.f32 %v4385_v41, %v5034_v8 }
  0x84   :  { %v1653_v13 = vrot.slane %v1423_v21, 1  ;;  %v2372_v33 = vmul.f32 %v4434_v0, %v5247_v22  ;;  %v2888_v20 = vadd.f32 %v2675_v61, %v2404_v56  ;;  %v719_v51 = vadd.f32 %v554_v43, %v170_v5  ;;  %v5287_v61 = vld [vmem:[%s8395_s1 + $0x8] ss:$0 sm:$0xff] }
  0x85   :  { %v1039_v46 = vsel %vm941_vm1, %v1037_v62, %v1038_v58  ;;  %v8410_v2 = vrot.slane %v5252_v34, 1  ;;  %v2137_v6 = vrot.slane %v1907_v54, 2  ;;  %v8409_v12 = vrot.slane %v5261_v27, 2 }
  0x86   :  { %v2523_v28 = vmul.f32 %v4436_v1, %v5247_v22  ;;  %v5279_v24 = vmul.f32 %v4436_v1, %v5268_v29  ;;  %v3372_v38 = vadd.f32 %v3159_v53, %v2888_v20  ;;  %v1204_v4 = vadd.f32 %v1039_v46, %v719_v51 }
  0x87   :  { %v1655_v5 = vsel %vm456_vm0, %v1653_v13, %v8410_v2  ;;  %v3007_v42 = vmul.f32 %v5287_v61, %v5247_v22  ;;  %v2139_v7 = vsel %vm941_vm1, %v2137_v6, %v8409_v12  ;;  %v5297_v62 = vmul.f32 %v5287_v61, %v5268_v29 }
  0x88   :  { %v2753_v52 = vrot.slane %v2523_v28, 1  ;;  %v8408_v53 = vrot.slane %v5279_v24, 1  ;;  %4105 = vmatprep.mubr.f32.mxu0 %v3372_v38  ;;  %v1336_v21 = vadd.f32 %v1272_v57, %v1204_v4  ;;  %v139_v54 = vmul.f32 %v4374_v35, %v4726_v18  ;;  %v5314_v18 = vld [vmem:[%s8394_s0 + $0x88] sm:$0x3] }
  0x89   :  { %v3237_v56 = vrot.slane %v3007_v42, 2  ;;  %v275_v43 = vmul.f32 %v4376_v36, %v4841_v44  ;;  %v8411_v20 = vrot.slane %v5297_v62, 2  ;;  %v760_v51 = vmul.f32 %v4378_v37, %v4841_v44 }
  0x8a   :  { %v2755_v13 = vsel %vm456_vm0, %v2753_v52, %v8408_v53  ;;  %v1241_v46 = vmul.f32 %v4381_v39, %v4960_v14  ;;  %v1820_v57 = vadd.f32 %v1655_v5, %v1336_v21  ;;  %v1377_v28 = vmul.f32 %v4383_v40, %v5075_v3 }
  0x8b   :  { %v475_v6 = vrot.slane %v275_v43, 1  ;;  %v1861_v38 = vmul.f32 %v4385_v41, %v5075_v3  ;;  %v3239_v44 = vsel %vm941_vm1, %v3237_v56, %v8411_v20  ;;  %v960_v4 = vrot.slane %v760_v51, 2 }
  0x8c   :  { %v2341_v5 = vmul.f32 %v4434_v0, %v5194_v16  ;;  %v2477_v42 = vmul.f32 %v4436_v1, %v5314_v18  ;;  %v2304_v52 = vadd.f32 %v2139_v7, %v1820_v57  ;;  %v1576_v43 = vrot.slane %v1377_v28, 1 }
  0x8d   :  { %v476_v21 = vsel %vm456_vm0, %v473_v47, %v475_v6  ;;  %v2060_v53 = vrot.slane %v1861_v38, 2  ;;  %v961_v2 = vsel %vm941_vm1, %v958_v63, %v960_v4  ;;  %v2961_v51 = vmul.f32 %v5287_v61, %v5314_v18 }
  0x8e   :  { %v688_v12 = vadd.f32 %v476_v21, %v139_v54  ;;  %v2676_v56 = vrot.slane %v2477_v42, 1  ;;  %v2436_v20 = vadd.f32 %v2372_v33, %v2304_v52  ;;  %v1577_v7 = vsel %vm456_vm0, %v1574_v25, %v1576_v43 }
  0x8f   :  { %v2061_v55 = vsel %vm941_vm1, %v2058_v48, %v2060_v53  ;;  %v171_v47 = vmul.f32 %v4374_v35, %v4800_v23  ;;  %v3160_v63 = vrot.slane %v2961_v51, 2  ;;  %v323_v33 = vmul.f32 %v4376_v36, %v4889_v49 }
  0x90   :  { %v1173_v54 = vadd.f32 %v961_v2, %v688_v12  ;;  %v2677_v17 = vsel %vm456_vm0, %v2674_v45, %v2676_v56  ;;  %v2920_v57 = vadd.f32 %v2755_v13, %v2436_v20  ;;  %v808_v32 = vmul.f32 %v4378_v37, %v4889_v49  ;;  %v5362_v49 = vld [vmem:[%s8394_s0 + $0x238] sm:$0x3] }
  0x91   :  { %v1273_v25 = vmul.f32 %v4381_v39, %v5034_v8  ;;  %v1425_v11 = vmul.f32 %v4383_v40, %v5123_v10  ;;  %v3161_v48 = vsel %vm941_vm1, %v3158_v60, %v3160_v63  ;;  %v555_v26 = vrot.slane %v323_v33, 1 }
  0x92   :  { %v1305_v23 = vadd.f32 %v1241_v46, %v1173_v54  ;;  %v1909_v45 = vmul.f32 %v4385_v41, %v5123_v10  ;;  %v3404_v2 = vadd.f32 %v3239_v44, %v2920_v57  ;;  %v1040_v12 = vrot.slane %v808_v32, 2 }
  0x93   :  { %v1656_v53 = vrot.slane %v1425_v11, 1  ;;  %v2373_v13 = vmul.f32 %v4434_v0, %v5268_v29  ;;  %v556_v30 = vsel %vm456_vm0, %v553_v9, %v555_v26  ;;  %v2525_v46 = vmul.f32 %v4436_v1, %v5362_v49 }
  0x94   :  { %v1789_v20 = vadd.f32 %v1577_v7, %v1305_v23  ;;  %v2140_v60 = vrot.slane %v1909_v45, 2  ;;  %4153 = vmatprep.mubr.f32.mxu1 %v3404_v2  ;;  %v720_v6 = vadd.f32 %v556_v30, %v171_v47  ;;  %v1041_v28 = vsel %vm941_vm1, %v1038_v58, %v1040_v12 }
  0x95   :  { %v8485_v38 = vrot.slane %v5252_v34, 1  ;;  %v3009_v4 = vmul.f32 %v5287_v61, %v5362_v49  ;;  %v8486_v9 = vrot.slane %v5261_v27, 2  ;;  %v2756_v52 = vrot.slane %v2525_v46, 1 }
  0x96   :  { %v2273_v15 = vadd.f32 %v2061_v55, %v1789_v20  ;;  %v140_v21 = vmul.f32 %v4374_v35, %v4950_v59  ;;  %v1205_v43 = vadd.f32 %v1041_v28, %v720_v6  ;;  %v276_v58 = vmul.f32 %v4376_v36, %v4950_v59 }
  0x97   :  { %v1657_v44 = vsel %vm456_vm0, %v8485_v38, %v1656_v53  ;;  %v2141_v42 = vsel %vm941_vm1, %v8486_v9, %v2140_v60  ;;  %v3240_v19 = vrot.slane %v3009_v4, 2  ;;  %v5388_v34 = vmul.f32 %v4376_v36, %v4960_v14  ;;  %v5423_v53 = vld [vmem:[%s8394_s0 + $0x90] sm:$0xff]  ;;  %v5433_v60 = vld [vmem:[%s8394_s0 + $0x98] sm:$0xff] }
  0x98   :  { %v2405_v56 = vadd.f32 %v2341_v5, %v2273_v15  ;;  %v8487_v51 = vrot.slane %v5279_v24, 1  ;;  %v761_v7 = vmul.f32 %v4378_v37, %v4950_v59  ;;  %v5397_v55 = vmul.f32 %v4378_v37, %v4960_v14 }
  0x99   :  { %v1337_v47 = vadd.f32 %v1273_v25, %v1205_v43  ;;  %v8488_v54 = vrot.slane %v5297_v62, 2  ;;  %v477_v33 = vrot.slane %v276_v58, 1  ;;  %v478_v57 = vrot.slane %v5388_v34, 1 }
  0x9a   :  { %v2757_v27 = vsel %vm456_vm0, %v8487_v51, %v2756_v52  ;;  %v2889_v5 = vadd.f32 %v2677_v17, %v2405_v56  ;;  %v962_v32 = vrot.slane %v761_v7, 2  ;;  %v963_v24 = vrot.slane %v5397_v55, 2 }
  0x9b   :  { %v3241_v63 = vsel %vm941_vm1, %v8488_v54, %v3240_v19  ;;  %v1242_v11 = vmul.f32 %v4381_v39, %v5184_v31  ;;  %v1821_v59 = vadd.f32 %v1657_v44, %v1337_v47  ;;  %v479_v23 = vsel %vm456_vm0, %v477_v33, %v478_v57 }
  0x9c   :  { %v1378_v62 = vmul.f32 %v4383_v40, %v5184_v31  ;;  %v5413_v25 = vmul.f32 %v4383_v40, %v5194_v16  ;;  %v3373_v26 = vadd.f32 %v3161_v48, %v2889_v5  ;;  %v689_v17 = vadd.f32 %v479_v23, %v140_v21 }
  0x9d   :  { %v964_v45 = vsel %vm941_vm1, %v962_v32, %v963_v24  ;;  %v1862_v2 = vmul.f32 %v4385_v41, %v5184_v31  ;;  %v2305_v12 = vadd.f32 %v2141_v42, %v1821_v59  ;;  %v5428_v48 = vmul.f32 %v4385_v41, %v5194_v16 }
  0x9e   :  { %v1578_v20 = vrot.slane %v1378_v62, 1  ;;  %v1579_v30 = vrot.slane %v5413_v25, 1  ;;  %4106 = vmatmul.mubr.f32.gmra.mrb[6].mxu0 %v3373_v26  ;;  %v1174_v46 = vadd.f32 %v964_v45, %v689_v17  ;;  %v2342_v28 = vmul.f32 %v4434_v0, %v5423_v53 }
  0x9f   :  { %v2062_v6 = vrot.slane %v1862_v2, 2  ;;  %v2478_v38 = vmul.f32 %v4436_v1, %v5423_v53  ;;  %v2437_v44 = vadd.f32 %v2373_v13, %v2305_v12  ;;  %v2063_v15 = vrot.slane %v5428_v48, 2  ;;  %v5486_v2 = vld [vmem:[%s8394_s0 + $0x240] sm:$0xff] }
  0xa0   :  { %v1580_v4 = vsel %vm456_vm0, %v1578_v20, %v1579_v30  ;;  %v5445_v9 = vmul.f32 %v4436_v1, %v5433_v60  ;;  %v1306_v42 = vadd.f32 %v1242_v11, %v1174_v46  ;;  %v2962_v21 = vmul.f32 %v5287_v61, %v5423_v53 }
  0xa1   :  { %v2678_v52 = vrot.slane %v2478_v38, 1  ;;  %v5451_v43 = vmul.f32 %v5287_v61, %v5433_v60  ;;  %v2921_v13 = vadd.f32 %v2757_v27, %v2437_v44  ;;  %v2064_v19 = vsel %vm941_vm1, %v2062_v6, %v2063_v15 }
  0xa2   :  { %v2679_v58 = vrot.slane %v5445_v9, 1  ;;  %v172_v56 = vmul.f32 %v4374_v35, %v5013_v50  ;;  %v1790_v51 = vadd.f32 %v1580_v4, %v1306_v42  ;;  %v3162_v7 = vrot.slane %v2962_v21, 2  ;;  %v5507_v42 = vld [vmem:[%s8394_s0 + $0x248] sm:$0xff] }
  0xa3   :  { %v3163_v47 = vrot.slane %v5451_v43, 2  ;;  %v324_v54 = vmul.f32 %v4376_v36, %v5013_v50  ;;  %v3405_v33 = vadd.f32 %v3241_v63, %v2921_v13  ;;  %v5467_v5 = vmul.f32 %v4376_v36, %v5034_v8 }
  0xa4   :  { %v2680_v27 = vsel %vm456_vm0, %v2678_v52, %v2679_v58  ;;  %v809_v32 = vmul.f32 %v4378_v37, %v5013_v50  ;;  %v2274_v11 = vadd.f32 %v2064_v19, %v1790_v51  ;;  %v5476_v63 = vmul.f32 %v4378_v37, %v5034_v8 }
  0xa5   :  { %v3164_v59 = vsel %vm941_vm1, %v3162_v7, %v3163_v47  ;;  %v557_v23 = vrot.slane %v324_v54, 1  ;;  %4154 = vmatmul.mubr.f32.gmra.mrb[6].mxu1 %v3405_v33  ;;  %v558_v62 = vrot.slane %v5467_v5, 1  ;;  %v1274_v17 = vmul.f32 %v4381_v39, %v5247_v22 }
  0xa6   :  { %v1042_v26 = vrot.slane %v809_v32, 2  ;;  %v1426_v50 = vmul.f32 %v4383_v40, %v5247_v22  ;;  %v2406_v45 = vadd.f32 %v2342_v28, %v2274_v11  ;;  %v1043_v12 = vrot.slane %v5476_v63, 2 }
  0xa7   :  { %v5491_v20 = vmul.f32 %v4383_v40, %v5268_v29  ;;  %v1910_v46 = vmul.f32 %v4385_v41, %v5247_v22  ;;  %v559_v6 = vsel %vm456_vm0, %v557_v23, %v558_v62  ;;  %v5500_v28 = vmul.f32 %v4385_v41, %v5268_v29 }
  0xa8   :  { %v1658_v38 = vrot.slane %v1426_v50, 1  ;;  %v2374_v44 = vmul.f32 %v4434_v0, %v5486_v2  ;;  %v2890_v4 = vadd.f32 %v2680_v27, %v2406_v45  ;;  %v721_v52 = vadd.f32 %v559_v6, %v172_v56 }
  0xa9   :  { %v1044_v21 = vsel %vm941_vm1, %v1042_v26, %v1043_v12  ;;  %v8414_v13 = vrot.slane %v5491_v20, 1  ;;  %v2142_v19 = vrot.slane %v1910_v46, 2  ;;  %v8413_v51 = vrot.slane %v5500_v28, 2 }
  0xaa   :  { %v2526_v7 = vmul.f32 %v4436_v1, %v5486_v2  ;;  %v5518_v54 = vmul.f32 %v4436_v1, %v5507_v42  ;;  %v3374_v33 = vadd.f32 %v3164_v59, %v2890_v4  ;;  %v1206_v27 = vadd.f32 %v1044_v21, %v721_v52 }
  0xab   :  { %v1660_v56 = vsel %vm456_vm0, %v1658_v38, %v8414_v13  ;;  %v3010_v32 = vmul.f32 %v5287_v61, %v5486_v2  ;;  %v2144_v11 = vsel %vm941_vm1, %v2142_v19, %v8413_v51  ;;  %v5531_v50 = vmul.f32 %v5287_v61, %v5507_v42 }
  0xac   :  { %v2758_v23 = vrot.slane %v2526_v7, 1  ;;  %v8412_v26 = vrot.slane %v5518_v54, 1  ;;  %4108 = vmatprep.mubr.f32.mxu0 %v3374_v33  ;;  %v1338_v59 = vadd.f32 %v1274_v17, %v1206_v27  ;;  %v141_v46 = vmul.f32 %v4374_v35, %v4960_v14  ;;  %v5548_v14 = vld [vmem:[%s8394_s0 + $0xa0] sm:$0x3] }
  0xad   :  { %v3242_v45 = vrot.slane %v3010_v32, 2  ;;  %v278_v6 = vmul.f32 %v4376_v36, %v5075_v3  ;;  %v8415_v4 = vrot.slane %v5531_v50, 2  ;;  %v763_v52 = vmul.f32 %v4378_v37, %v5075_v3 }
  0xae   :  { %v2760_v38 = vsel %vm456_vm0, %v2758_v23, %v8412_v26  ;;  %v1243_v21 = vmul.f32 %v4381_v39, %v5194_v16  ;;  %v1822_v17 = vadd.f32 %v1660_v56, %v1338_v59  ;;  %v1380_v7 = vmul.f32 %v4383_v40, %v5314_v18 }
  0xaf   :  { %v480_v19 = vrot.slane %v278_v6, 1  ;;  %v1864_v33 = vmul.f32 %v4385_v41, %v5314_v18  ;;  %v3244_v3 = vsel %vm941_vm1, %v3242_v45, %v8415_v4  ;;  %v965_v27 = vrot.slane %v763_v52, 2 }
  0xb0   :  { %v2343_v56 = vmul.f32 %v4434_v0, %v5433_v60  ;;  %v2480_v32 = vmul.f32 %v4436_v1, %v5548_v14  ;;  %v2306_v23 = vadd.f32 %v2144_v11, %v1822_v17  ;;  %v1581_v6 = vrot.slane %v1380_v7, 1 }
  0xb1   :  { %v481_v59 = vsel %vm456_vm0, %v478_v57, %v480_v19  ;;  %v2065_v26 = vrot.slane %v1864_v33, 2  ;;  %v966_v13 = vsel %vm941_vm1, %v963_v24, %v965_v27  ;;  %v2964_v52 = vmul.f32 %v5287_v61, %v5548_v14 }
  0xb2   :  { %v690_v51 = vadd.f32 %v481_v59, %v141_v46  ;;  %v2681_v45 = vrot.slane %v2480_v32, 1  ;;  %v2438_v4 = vadd.f32 %v2374_v44, %v2306_v23  ;;  %v1582_v11 = vsel %vm456_vm0, %v1579_v30, %v1581_v6 }
  0xb3   :  { %v2066_v34 = vsel %vm941_vm1, %v2063_v15, %v2065_v26  ;;  %v173_v57 = vmul.f32 %v4374_v35, %v5034_v8  ;;  %v3165_v24 = vrot.slane %v2964_v52, 2  ;;  %v326_v44 = vmul.f32 %v4376_v36, %v5123_v10 }
  0xb4   :  { %v1175_v46 = vadd.f32 %v966_v13, %v690_v51  ;;  %v2682_v55 = vsel %vm456_vm0, %v2679_v58, %v2681_v45  ;;  %v2922_v17 = vadd.f32 %v2760_v38, %v2438_v4  ;;  %v811_v25 = vmul.f32 %v4378_v37, %v5123_v10  ;;  %v5596_v10 = vld [vmem:[%s8394_s0 + $0x250] sm:$0x3] }
  0xb5   :  { %v1275_v30 = vmul.f32 %v4381_v39, %v5268_v29  ;;  %v1428_v48 = vmul.f32 %v4383_v40, %v5362_v49  ;;  %v3166_v15 = vsel %vm941_vm1, %v3163_v47, %v3165_v24  ;;  %v560_v9 = vrot.slane %v326_v44, 1 }
  0xb6   :  { %v1307_v8 = vadd.f32 %v1243_v21, %v1175_v46  ;;  %v1912_v58 = vmul.f32 %v4385_v41, %v5362_v49  ;;  %v3406_v13 = vadd.f32 %v3244_v3, %v2922_v17  ;;  %v1045_v51 = vrot.slane %v811_v25, 2 }
  0xb7   :  { %v1661_v26 = vrot.slane %v1428_v48, 1  ;;  %v2375_v38 = vmul.f32 %v4434_v0, %v5507_v42  ;;  %v561_v43 = vsel %vm456_vm0, %v558_v62, %v560_v9  ;;  %v2528_v21 = vmul.f32 %v4436_v1, %v5596_v10 }
  0xb8   :  { %v1791_v4 = vadd.f32 %v1582_v11, %v1307_v8  ;;  %v2145_v47 = vrot.slane %v1912_v58, 2  ;;  %4156 = vmatprep.mubr.f32.mxu1 %v3406_v13  ;;  %v722_v19 = vadd.f32 %v561_v43, %v173_v57  ;;  %v1046_v7 = vsel %vm941_vm1, %v1043_v12, %v1045_v51 }
  0xb9   :  { %v8489_v33 = vrot.slane %v5491_v20, 1  ;;  %v3012_v27 = vmul.f32 %v5287_v61, %v5596_v10  ;;  %v8490_v62 = vrot.slane %v5500_v28, 2  ;;  %v2761_v23 = vrot.slane %v2528_v21, 1 }
  0xba   :  { %v2275_v5 = vadd.f32 %v2066_v34, %v1791_v4  ;;  %v142_v59 = vmul.f32 %v4374_v35, %v5184_v31  ;;  %v1207_v6 = vadd.f32 %v1046_v7, %v722_v19  ;;  %v279_v12 = vmul.f32 %v4376_v36, %v5184_v31 }
  0xbb   :  { %v1662_v3 = vsel %vm456_vm0, %v8489_v33, %v1661_v26  ;;  %v2146_v32 = vsel %vm941_vm1, %v8490_v62, %v2145_v47  ;;  %v3245_v63 = vrot.slane %v3012_v27, 2  ;;  %v5622_v20 = vmul.f32 %v4376_v36, %v5194_v16  ;;  %v5657_v26 = vld [vmem:[%s8394_s0 + $0xa8] sm:$0xff]  ;;  %v5667_v47 = vld [vmem:[%s8394_s0 + $0xb0] sm:$0xff] }
  0xbc   :  { %v2407_v45 = vadd.f32 %v2343_v56, %v2275_v5  ;;  %v8491_v52 = vrot.slane %v5518_v54, 1  ;;  %v764_v11 = vmul.f32 %v4378_v37, %v5184_v31  ;;  %v5631_v34 = vmul.f32 %v4378_v37, %v5194_v16 }
  0xbd   :  { %v1339_v57 = vadd.f32 %v1275_v30, %v1207_v6  ;;  %v8492_v46 = vrot.slane %v5531_v50, 2  ;;  %v482_v44 = vrot.slane %v279_v12, 1  ;;  %v483_v17 = vrot.slane %v5622_v20, 1 }
  0xbe   :  { %v2762_v28 = vsel %vm456_vm0, %v8491_v52, %v2761_v23  ;;  %v2891_v56 = vadd.f32 %v2682_v55, %v2407_v45  ;;  %v967_v25 = vrot.slane %v764_v11, 2  ;;  %v968_v54 = vrot.slane %v5631_v34, 2 }
  0xbf   :  { %v3246_v24 = vsel %vm941_vm1, %v8492_v46, %v3245_v63  ;;  %v1244_v48 = vmul.f32 %v4381_v39, %v5423_v53  ;;  %v1823_v31 = vadd.f32 %v1662_v3, %v1339_v57  ;;  %v484_v8 = vsel %vm456_vm0, %v482_v44, %v483_v17 }
  0xc0   :  { %v1381_v50 = vmul.f32 %v4383_v40, %v5423_v53  ;;  %v5647_v30 = vmul.f32 %v4383_v40, %v5433_v60  ;;  %v3375_v9 = vadd.f32 %v3166_v15, %v2891_v56  ;;  %v691_v55 = vadd.f32 %v484_v8, %v142_v59 }
  0xc1   :  { %v969_v58 = vsel %vm941_vm1, %v967_v25, %v968_v54  ;;  %v1865_v13 = vmul.f32 %v4385_v41, %v5423_v53  ;;  %v2307_v51 = vadd.f32 %v2146_v32, %v1823_v31  ;;  %v5662_v15 = vmul.f32 %v4385_v41, %v5433_v60 }
  0xc2   :  { %v1583_v4 = vrot.slane %v1381_v50, 1  ;;  %v1584_v43 = vrot.slane %v5647_v30, 1  ;;  %4109 = vmatmul.mubr.f32.gmra.mrb[8].mxu0 %v3375_v9  ;;  %v1176_v21 = vadd.f32 %v969_v58, %v691_v55  ;;  %v2344_v7 = vmul.f32 %v4434_v0, %v5657_v26 }
  0xc3   :  { %v2067_v19 = vrot.slane %v1865_v13, 2  ;;  %v2481_v33 = vmul.f32 %v4436_v1, %v5657_v26  ;;  %v2439_v3 = vadd.f32 %v2375_v38, %v2307_v51  ;;  %v2068_v5 = vrot.slane %v5662_v15, 2  ;;  %v5720_v13 = vld [vmem:[%s8394_s0 + $0x258] sm:$0xff] }
  0xc4   :  { %v1585_v27 = vsel %vm456_vm0, %v1583_v4, %v1584_v43  ;;  %v5679_v62 = vmul.f32 %v4436_v1, %v5667_v47  ;;  %v1308_v32 = vadd.f32 %v1244_v48, %v1176_v21  ;;  %v2965_v59 = vmul.f32 %v5287_v61, %v5657_v26 }
  0xc5   :  { %v2683_v23 = vrot.slane %v2481_v33, 1  ;;  %v5685_v6 = vmul.f32 %v5287_v61, %v5667_v47  ;;  %v2923_v38 = vadd.f32 %v2762_v28, %v2439_v3  ;;  %v2069_v63 = vsel %vm941_vm1, %v2067_v19, %v2068_v5 }
  0xc6   :  { %v2684_v12 = vrot.slane %v5679_v62, 1  ;;  %v174_v45 = vmul.f32 %v4374_v35, %v5247_v22  ;;  %v1792_v52 = vadd.f32 %v1585_v27, %v1308_v32  ;;  %v3167_v11 = vrot.slane %v2965_v59, 2  ;;  %v5741_v32 = vld [vmem:[%s8394_s0 + $0x260] sm:$0xff] }
  0xc7   :  { %v3168_v57 = vrot.slane %v5685_v6, 2  ;;  %v327_v46 = vmul.f32 %v4376_v36, %v5247_v22  ;;  %v3407_v44 = vadd.f32 %v3246_v24, %v2923_v38  ;;  %v5701_v56 = vmul.f32 %v4376_v36, %v5268_v29 }
  0xc8   :  { %v2685_v28 = vsel %vm456_vm0, %v2683_v23, %v2684_v12  ;;  %v812_v25 = vmul.f32 %v4378_v37, %v5247_v22  ;;  %v2276_v48 = vadd.f32 %v2069_v63, %v1792_v52  ;;  %v5710_v24 = vmul.f32 %v4378_v37, %v5268_v29 }
  0xc9   :  { %v3169_v31 = vsel %vm941_vm1, %v3167_v11, %v3168_v57  ;;  %v562_v8 = vrot.slane %v327_v46, 1  ;;  %4157 = vmatmul.mubr.f32.gmra.mrb[8].mxu1 %v3407_v44  ;;  %v563_v50 = vrot.slane %v5701_v56, 1  ;;  %v1276_v55 = vmul.f32 %v4381_v39, %v5486_v2 }
  0xca   :  { %v1047_v9 = vrot.slane %v812_v25, 2  ;;  %v1429_v22 = vmul.f32 %v4383_v40, %v5486_v2  ;;  %v2408_v58 = vadd.f32 %v2344_v7, %v2276_v48  ;;  %v1048_v51 = vrot.slane %v5710_v24, 2 }
  0xcb   :  { %v5725_v4 = vmul.f32 %v4383_v40, %v5507_v42  ;;  %v1913_v21 = vmul.f32 %v4385_v41, %v5486_v2  ;;  %v564_v19 = vsel %vm456_vm0, %v562_v8, %v563_v50  ;;  %v5734_v7 = vmul.f32 %v4385_v41, %v5507_v42 }
  0xcc   :  { %v1663_v33 = vrot.slane %v1429_v22, 1  ;;  %v2376_v3 = vmul.f32 %v4434_v0, %v5720_v13  ;;  %v2892_v27 = vadd.f32 %v2685_v28, %v2408_v58  ;;  %v723_v23 = vadd.f32 %v564_v19, %v174_v45 }
  0xcd   :  { %v1049_v59 = vsel %vm941_vm1, %v1047_v9, %v1048_v51  ;;  %v8418_v38 = vrot.slane %v5725_v4, 1  ;;  %v2147_v63 = vrot.slane %v1913_v21, 2  ;;  %v8417_v52 = vrot.slane %v5734_v7, 2 }
  0xce   :  { %v2529_v11 = vmul.f32 %v4436_v1, %v5720_v13  ;;  %v5752_v46 = vmul.f32 %v4436_v1, %v5741_v32  ;;  %v3376_v44 = vadd.f32 %v3169_v31, %v2892_v27  ;;  %v1208_v28 = vadd.f32 %v1049_v59, %v723_v23 }
  0xcf   :  { %v1665_v45 = vsel %vm456_vm0, %v1663_v33, %v8418_v38  ;;  %v3013_v25 = vmul.f32 %v5287_v61, %v5720_v13  ;;  %v2149_v48 = vsel %vm941_vm1, %v2147_v63, %v8417_v52  ;;  %v5765_v22 = vmul.f32 %v5287_v61, %v5741_v32 }
  0xd0   :  { %v2763_v8 = vrot.slane %v2529_v11, 1  ;;  %v8416_v9 = vrot.slane %v5752_v46, 1  ;;  %4111 = vmatprep.mubr.f32.mxu0 %v3376_v44  ;;  %v1340_v31 = vadd.f32 %v1276_v55, %v1208_v28  ;;  %v143_v21 = vmul.f32 %v4374_v35, %v5194_v16  ;;  %v5782_v16 = vld [vmem:[%s8394_s0 + $0xb8] sm:$0x3] }
  0xd1   :  { %v3247_v58 = vrot.slane %v3013_v25, 2  ;;  %v281_v19 = vmul.f32 %v4376_v36, %v5314_v18  ;;  %v8419_v27 = vrot.slane %v5765_v22, 2  ;;  %v766_v23 = vmul.f32 %v4378_v37, %v5314_v18 }
  0xd2   :  { %v2765_v33 = vsel %vm456_vm0, %v2763_v8, %v8416_v9  ;;  %v1245_v59 = vmul.f32 %v4381_v39, %v5433_v60  ;;  %v1824_v55 = vadd.f32 %v1665_v45, %v1340_v31  ;;  %v1383_v11 = vmul.f32 %v4383_v40, %v5548_v14 }
  0xd3   :  { %v485_v63 = vrot.slane %v281_v19, 1  ;;  %v1867_v44 = vmul.f32 %v4385_v41, %v5548_v14  ;;  %v3249_v18 = vsel %vm941_vm1, %v3247_v58, %v8419_v27  ;;  %v970_v28 = vrot.slane %v766_v23, 2 }
  0xd4   :  { %v2345_v45 = vmul.f32 %v4434_v0, %v5667_v47  ;;  %v2483_v25 = vmul.f32 %v4436_v1, %v5782_v16  ;;  %v2308_v8 = vadd.f32 %v2149_v48, %v1824_v55  ;;  %v1586_v19 = vrot.slane %v1383_v11, 1 }
  0xd5   :  { %v486_v31 = vsel %vm456_vm0, %v483_v17, %v485_v63  ;;  %v2070_v9 = vrot.slane %v1867_v44, 2  ;;  %v971_v38 = vsel %vm941_vm1, %v968_v54, %v970_v28  ;;  %v2967_v23 = vmul.f32 %v5287_v61, %v5782_v16 }
  0xd6   :  { %v692_v52 = vadd.f32 %v486_v31, %v143_v21  ;;  %v2686_v58 = vrot.slane %v2483_v25, 1  ;;  %v2440_v27 = vadd.f32 %v2376_v3, %v2308_v8  ;;  %v1587_v48 = vsel %vm456_vm0, %v1584_v43, %v1586_v19 }
  0xd7   :  { %v2071_v20 = vsel %vm941_vm1, %v2068_v5, %v2070_v9  ;;  %v175_v17 = vmul.f32 %v4374_v35, %v5268_v29  ;;  %v3170_v54 = vrot.slane %v2967_v23, 2  ;;  %v329_v3 = vmul.f32 %v4376_v36, %v5362_v49 }
  0xd8   :  { %v1177_v21 = vadd.f32 %v971_v38, %v692_v52  ;;  %v2687_v34 = vsel %vm456_vm0, %v2684_v12, %v2686_v58  ;;  %v2924_v55 = vadd.f32 %v2765_v33, %v2440_v27  ;;  %v814_v30 = vmul.f32 %v4378_v37, %v5362_v49  ;;  %v5830_v49 = vld [vmem:[%s8394_s0 + $0x268] sm:$0x3] }
  0xd9   :  { %v1277_v43 = vmul.f32 %v4381_v39, %v5507_v42  ;;  %v1431_v15 = vmul.f32 %v4383_v40, %v5596_v10  ;;  %v3171_v5 = vsel %vm941_vm1, %v3168_v57, %v3170_v54  ;;  %v565_v62 = vrot.slane %v329_v3, 1 }
  0xda   :  { %v1309_v29 = vadd.f32 %v1245_v59, %v1177_v21  ;;  %v1915_v12 = vmul.f32 %v4385_v41, %v5596_v10  ;;  %v3408_v38 = vadd.f32 %v3249_v18, %v2924_v55  ;;  %v1050_v52 = vrot.slane %v814_v30, 2 }
  0xdb   :  { %v1666_v9 = vrot.slane %v1431_v15, 1  ;;  %v2377_v33 = vmul.f32 %v4434_v0, %v5741_v32  ;;  %v566_v6 = vsel %vm456_vm0, %v563_v50, %v565_v62  ;;  %v2531_v59 = vmul.f32 %v4436_v1, %v5830_v49 }
  0xdc   :  { %v1793_v27 = vadd.f32 %v1587_v48, %v1309_v29  ;;  %v2150_v57 = vrot.slane %v1915_v12, 2  ;;  %4159 = vmatprep.mubr.f32.mxu1 %v3408_v38  ;;  %v724_v63 = vadd.f32 %v566_v6, %v175_v17  ;;  %v1051_v11 = vsel %vm941_vm1, %v1048_v51, %v1050_v52 }
  0xdd   :  { %v8493_v44 = vrot.slane %v5725_v4, 1  ;;  %v3015_v28 = vmul.f32 %v5287_v61, %v5830_v49  ;;  %v8494_v50 = vrot.slane %v5734_v7, 2  ;;  %v2766_v8 = vrot.slane %v2531_v59, 1 }
  0xde   :  { %v2277_v56 = vadd.f32 %v2071_v20, %v1793_v27  ;;  %v144_v31 = vmul.f32 %v4374_v35, %v5423_v53  ;;  %v1209_v19 = vadd.f32 %v1051_v11, %v724_v63  ;;  %v282_v51 = vmul.f32 %v4376_v36, %v5423_v53 }
  0xdf   :  { %v1667_v18 = vsel %vm456_vm0, %v8493_v44, %v1666_v9  ;;  %v2151_v25 = vsel %vm941_vm1, %v8494_v50, %v2150_v57  ;;  %v3250_v24 = vrot.slane %v3015_v28, 2  ;;  %v5856_v4 = vmul.f32 %v4376_v36, %v5433_v60  ;;  %v5891_v9 = vld [vmem:[%s8394_s0 + $0xc0] sm:$0xff]  ;;  %v5901_v57 = vld [vmem:[%s8394_s0 + $0xc8] sm:$0xff] }
  0xe0   :  { %v2409_v58 = vadd.f32 %v2345_v45, %v2277_v56  ;;  %v8495_v23 = vrot.slane %v5752_v46, 1  ;;  %v767_v48 = vmul.f32 %v4378_v37, %v5423_v53  ;;  %v5865_v20 = vmul.f32 %v4378_v37, %v5433_v60 }
  0xe1   :  { %v1341_v17 = vadd.f32 %v1277_v43, %v1209_v19  ;;  %v8496_v21 = vrot.slane %v5765_v22, 2  ;;  %v487_v3 = vrot.slane %v282_v51, 1  ;;  %v488_v55 = vrot.slane %v5856_v4, 1 }
  0xe2   :  { %v2767_v7 = vsel %vm456_vm0, %v8495_v23, %v2766_v8  ;;  %v2893_v45 = vadd.f32 %v2687_v34, %v2409_v58  ;;  %v972_v30 = vrot.slane %v767_v48, 2  ;;  %v973_v46 = vrot.slane %v5865_v20, 2 }
  0xe3   :  { %v3251_v54 = vsel %vm941_vm1, %v8496_v21, %v3250_v24  ;;  %v1246_v15 = vmul.f32 %v4381_v39, %v5657_v26  ;;  %v1825_v53 = vadd.f32 %v1667_v18, %v1341_v17  ;;  %v489_v29 = vsel %vm456_vm0, %v487_v3, %v488_v55 }
  0xe4   :  { %v1384_v22 = vmul.f32 %v4383_v40, %v5657_v26  ;;  %v5881_v43 = vmul.f32 %v4383_v40, %v5667_v47  ;;  %v3377_v62 = vadd.f32 %v3171_v5, %v2893_v45  ;;  %v693_v34 = vadd.f32 %v489_v29, %v144_v31 }
  0xe5   :  { %v974_v12 = vsel %vm941_vm1, %v972_v30, %v973_v46  ;;  %v1868_v38 = vmul.f32 %v4385_v41, %v5657_v26  ;;  %v2309_v52 = vadd.f32 %v2151_v25, %v1825_v53  ;;  %v5896_v5 = vmul.f32 %v4385_v41, %v5667_v47 }
  0xe6   :  { %v1588_v27 = vrot.slane %v1384_v22, 1  ;;  %v1589_v6 = vrot.slane %v5881_v43, 1  ;;  %4112 = vmatmul.mubr.f32.gmra.mrb[10].mxu0 %v3377_v62  ;;  %v1178_v59 = vadd.f32 %v974_v12, %v693_v34  ;;  %v2346_v11 = vmul.f32 %v4434_v0, %v5891_v9 }
  0xe7   :  { %v2072_v63 = vrot.slane %v1868_v38, 2  ;;  %v2484_v44 = vmul.f32 %v4436_v1, %v5891_v9  ;;  %v2441_v18 = vadd.f32 %v2377_v33, %v2309_v52  ;;  %v2073_v56 = vrot.slane %v5896_v5, 2  ;;  %v5954_v38 = vld [vmem:[%s8394_s0 + $0x270] sm:$0xff] }
  0xe8   :  { %v1590_v28 = vsel %vm456_vm0, %v1588_v27, %v1589_v6  ;;  %v5913_v50 = vmul.f32 %v4436_v1, %v5901_v57  ;;  %v1310_v25 = vadd.f32 %v1246_v15, %v1178_v59  ;;  %v2968_v31 = vmul.f32 %v5287_v61, %v5891_v9 }
  0xe9   :  { %v2688_v8 = vrot.slane %v2484_v44, 1  ;;  %v5919_v19 = vmul.f32 %v5287_v61, %v5901_v57  ;;  %v2925_v33 = vadd.f32 %v2767_v7, %v2441_v18  ;;  %v2074_v24 = vsel %vm941_vm1, %v2072_v63, %v2073_v56 }
  0xea   :  { %v2689_v51 = vrot.slane %v5913_v50, 1  ;;  %v176_v58 = vmul.f32 %v4374_v35, %v5486_v2  ;;  %v1794_v23 = vadd.f32 %v1590_v28, %v1310_v25  ;;  %v3172_v48 = vrot.slane %v2968_v31, 2  ;;  %v5975_v25 = vld [vmem:[%s8394_s0 + $0x278] sm:$0xff] }
  0xeb   :  { %v3173_v17 = vrot.slane %v5919_v19, 2  ;;  %v330_v21 = vmul.f32 %v4376_v36, %v5486_v2  ;;  %v3409_v3 = vadd.f32 %v3251_v54, %v2925_v33  ;;  %v5935_v45 = vmul.f32 %v4376_v36, %v5507_v42 }
  0xec   :  { %v2690_v7 = vsel %vm456_vm0, %v2688_v8, %v2689_v51  ;;  %v815_v30 = vmul.f32 %v4378_v37, %v5486_v2  ;;  %v2278_v15 = vadd.f32 %v2074_v24, %v1794_v23  ;;  %v5944_v54 = vmul.f32 %v4378_v37, %v5507_v42 }
  0xed   :  { %v3174_v53 = vsel %vm941_vm1, %v3172_v48, %v3173_v17  ;;  %v567_v29 = vrot.slane %v330_v21, 1  ;;  %4160 = vmatmul.mubr.f32.gmra.mrb[10].mxu1 %v3409_v3  ;;  %v568_v22 = vrot.slane %v5935_v45, 1  ;;  %v1278_v34 = vmul.f32 %v4381_v39, %v5720_v13 }
  0xee   :  { %v1052_v62 = vrot.slane %v815_v30, 2  ;;  %v1432_v2 = vmul.f32 %v4383_v40, %v5720_v13  ;;  %v2410_v12 = vadd.f32 %v2346_v11, %v2278_v15  ;;  %v1053_v52 = vrot.slane %v5944_v54, 2 }
  0xef   :  { %v5959_v27 = vmul.f32 %v4383_v40, %v5741_v32  ;;  %v1916_v59 = vmul.f32 %v4385_v41, %v5720_v13  ;;  %v569_v63 = vsel %vm456_vm0, %v567_v29, %v568_v22  ;;  %v5968_v11 = vmul.f32 %v4385_v41, %v5741_v32 }
  0xf0   :  { %v1668_v44 = vrot.slane %v1432_v2, 1  ;;  %v2378_v18 = vmul.f32 %v4434_v0, %v5954_v38  ;;  %v2894_v28 = vadd.f32 %v2690_v7, %v2410_v12  ;;  %v725_v8 = vadd.f32 %v569_v63, %v176_v58 }
  0xf1   :  { %v1054_v31 = vsel %vm941_vm1, %v1052_v62, %v1053_v52  ;;  %v8422_v33 = vrot.slane %v5959_v27, 1  ;;  %v2152_v24 = vrot.slane %v1916_v59, 2  ;;  %v8421_v23 = vrot.slane %v5968_v11, 2 }
  0xf2   :  { %v2532_v48 = vmul.f32 %v4436_v1, %v5954_v38  ;;  %v5986_v21 = vmul.f32 %v4436_v1, %v5975_v25  ;;  %v3378_v3 = vadd.f32 %v3174_v53, %v2894_v28  ;;  %v1210_v7 = vadd.f32 %v1054_v31, %v725_v8 }
  0xf3   :  { %v1670_v58 = vsel %vm456_vm0, %v1668_v44, %v8422_v33  ;;  %v3016_v30 = vmul.f32 %v5287_v61, %v5954_v38  ;;  %v2154_v15 = vsel %vm941_vm1, %v2152_v24, %v8421_v23  ;;  %v5999_v2 = vmul.f32 %v5287_v61, %v5975_v25 }
  0xf4   :  { %v2768_v29 = vrot.slane %v2532_v48, 1  ;;  %v8420_v62 = vrot.slane %v5986_v21, 1  ;;  %4114 = vmatprep.mubr.f32.mxu0 %v3378_v3  ;;  %v1342_v53 = vadd.f32 %v1278_v34, %v1210_v7  ;;  %v145_v59 = vmul.f32 %v4374_v35, %v5433_v60  ;;  %v6016_v60 = vld [vmem:[%s8394_s0 + $0xd0] sm:$0x3] }
  0xf5   :  { %v3252_v12 = vrot.slane %v3016_v30, 2  ;;  %v284_v63 = vmul.f32 %v4376_v36, %v5548_v14  ;;  %v8423_v28 = vrot.slane %v5999_v2, 2  ;;  %v769_v8 = vmul.f32 %v4378_v37, %v5548_v14 }
  0xf6   :  { %v2770_v44 = vsel %vm456_vm0, %v2768_v29, %v8420_v62  ;;  %v1247_v31 = vmul.f32 %v4381_v39, %v5667_v47  ;;  %v1826_v34 = vadd.f32 %v1670_v58, %v1342_v53  ;;  %v1386_v48 = vmul.f32 %v4383_v40, %v5782_v16 }
  0xf7   :  { %v490_v24 = vrot.slane %v284_v63, 1  ;;  %v1870_v3 = vmul.f32 %v4385_v41, %v5782_v16  ;;  %v3254_v14 = vsel %vm941_vm1, %v3252_v12, %v8423_v28  ;;  %v975_v7 = vrot.slane %v769_v8, 2 }
  0xf8   :  { %v2347_v58 = vmul.f32 %v4434_v0, %v5901_v57  ;;  %v2486_v30 = vmul.f32 %v4436_v1, %v6016_v60  ;;  %v2310_v29 = vadd.f32 %v2154_v15, %v1826_v34  ;;  %v1591_v63 = vrot.slane %v1386_v48, 1 }
  0xf9   :  { %v491_v53 = vsel %vm456_vm0, %v488_v55, %v490_v24  ;;  %v2075_v62 = vrot.slane %v1870_v3, 2  ;;  %v976_v33 = vsel %vm941_vm1, %v973_v46, %v975_v7  ;;  %v2970_v8 = vmul.f32 %v5287_v61, %v6016_v60 }
  0xfa   :  { %v694_v23 = vadd.f32 %v491_v53, %v145_v59  ;;  %v2691_v12 = vrot.slane %v2486_v30, 1  ;;  %v2442_v28 = vadd.f32 %v2378_v18, %v2310_v29  ;;  %v1592_v15 = vsel %vm456_vm0, %v1589_v6, %v1591_v63 }
  0xfb   :  { %v2076_v4 = vsel %vm941_vm1, %v2073_v56, %v2075_v62  ;;  %v177_v55 = vmul.f32 %v4374_v35, %v5507_v42  ;;  %v3175_v46 = vrot.slane %v2970_v8, 2  ;;  %v332_v18 = vmul.f32 %v4376_v36, %v5596_v10 }
  0xfc   :  { %v1179_v59 = vadd.f32 %v976_v33, %v694_v23  ;;  %v2692_v20 = vsel %vm456_vm0, %v2689_v51, %v2691_v12  ;;  %v2926_v34 = vadd.f32 %v2770_v44, %v2442_v28  ;;  %v817_v43 = vmul.f32 %v4378_v37, %v5596_v10  ;;  %v6064_v10 = vld [vmem:[%s8394_s0 + $0x280] sm:$0x3] }
  0xfd   :  { %v1279_v6 = vmul.f32 %v4381_v39, %v5741_v32  ;;  %v1434_v5 = vmul.f32 %v4383_v40, %v5830_v49  ;;  %v3176_v56 = vsel %vm941_vm1, %v3173_v17, %v3175_v46  ;;  %v570_v50 = vrot.slane %v332_v18, 1 }
  0xfe   :  { %v1311_v42 = vadd.f32 %v1247_v31, %v1179_v59  ;;  %v1918_v51 = vmul.f32 %v4385_v41, %v5830_v49  ;;  %v3410_v33 = vadd.f32 %v3254_v14, %v2926_v34  ;;  %v1055_v23 = vrot.slane %v817_v43, 2 }
  0xff   :  { %v1671_v62 = vrot.slane %v1434_v5, 1  ;;  %v2379_v44 = vmul.f32 %v4434_v0, %v5975_v25  ;;  %v571_v19 = vsel %vm456_vm0, %v568_v22, %v570_v50  ;;  %v2534_v31 = vmul.f32 %v4436_v1, %v6064_v10 }
 0x100   :  { %v1795_v28 = vadd.f32 %v1592_v15, %v1311_v42  ;;  %v2155_v17 = vrot.slane %v1918_v51, 2  ;;  %4162 = vmatprep.mubr.f32.mxu1 %v3410_v33  ;;  %v726_v24 = vadd.f32 %v571_v19, %v177_v55  ;;  %v1056_v48 = vsel %vm941_vm1, %v1053_v52, %v1055_v23  ;;  %v6125_v23 = vld [vmem:[%s8394_s0 + $0xd8] sm:$0xff]  ;;  %v6135_v19 = vld [vmem:[%s8394_s0 + $0xe0] sm:$0xff] }
 0x101   :  { %v8497_v3 = vrot.slane %v5959_v27, 1  ;;  %v3018_v7 = vmul.f32 %v5287_v61, %v6064_v10  ;;  %v8498_v22 = vrot.slane %v5968_v11, 2  ;;  %v2771_v29 = vrot.slane %v2534_v31, 1 }
 0x102   :  { %v2279_v45 = vadd.f32 %v2076_v4, %v1795_v28  ;;  %v146_v53 = vmul.f32 %v4374_v35, %v5657_v26  ;;  %v1211_v63 = vadd.f32 %v1056_v48, %v726_v24  ;;  %v285_v52 = vmul.f32 %v4376_v36, %v5657_v26 }
 0x103   :  { %v1672_v14 = vsel %vm456_vm0, %v8497_v3, %v1671_v62  ;;  %v2156_v30 = vsel %vm941_vm1, %v8498_v22, %v2155_v17  ;;  %v3255_v54 = vrot.slane %v3018_v7, 2  ;;  %v6090_v27 = vmul.f32 %v4376_v36, %v5667_v47 }
 0x104   :  { %v2411_v12 = vadd.f32 %v2347_v58, %v2279_v45  ;;  %v8499_v61 = vrot.slane %v5986_v21, 1  ;;  %v770_v8 = vmul.f32 %v4378_v37, %v5657_v26  ;;  %v6099_v15 = vmul.f32 %v4378_v37, %v5667_v47 }
 0x105   :  { %v1343_v4 = vadd.f32 %v1279_v6, %v1211_v63  ;;  %v8500_v55 = vrot.slane %v5999_v2, 2  ;;  %v492_v46 = vrot.slane %v285_v52, 1  ;;  %v493_v18 = vrot.slane %v6090_v27, 1 }
 0x106   :  { %v2772_v11 = vsel %vm456_vm0, %v8499_v61, %v2771_v29  ;;  %v2895_v58 = vadd.f32 %v2692_v20, %v2411_v12  ;;  %v977_v34 = vrot.slane %v770_v8, 2  ;;  %v978_v21 = vrot.slane %v6099_v15, 2  ;;  %v6152_v29 = vld [vmem:[%s8395_s1 + $0x8] ss:$0 sm:$0xff] }
 0x107   :  { %v3256_v59 = vsel %vm941_vm1, %v8500_v55, %v3255_v54  ;;  %v1248_v43 = vmul.f32 %v4381_v39, %v5891_v9  ;;  %v1827_v26 = vadd.f32 %v1672_v14, %v1343_v4  ;;  %v494_v5 = vsel %vm456_vm0, %v492_v46, %v493_v18 }
 0x108   :  { %v1387_v2 = vmul.f32 %v4383_v40, %v5891_v9  ;;  %v6115_v6 = vmul.f32 %v4383_v40, %v5901_v57  ;;  %v3379_v42 = vadd.f32 %v3176_v56, %v2895_v58  ;;  %v695_v20 = vadd.f32 %v494_v5, %v146_v53 }
 0x109   :  { %v979_v50 = vsel %vm941_vm1, %v977_v34, %v978_v21  ;;  %v1871_v51 = vmul.f32 %v4385_v41, %v5891_v9  ;;  %v2311_v33 = vadd.f32 %v2156_v30, %v1827_v26  ;;  %v6130_v56 = vmul.f32 %v4385_v41, %v5901_v57 }
 0x10a   :  { %v1593_v62 = vrot.slane %v1387_v2, 1  ;;  %v1594_v28 = vrot.slane %v6115_v6, 1  ;;  %4115 = vmatmul.mubr.f32.gmra.mrb[12].mxu0 %v3379_v42  ;;  %v1180_v17 = vadd.f32 %v979_v50, %v695_v20  ;;  %v2348_v24 = vmul.f32 %v4434_v0, %v6125_v23 }
 0x10b   :  { %v2077_v31 = vrot.slane %v1871_v51, 2  ;;  %v2487_v48 = vmul.f32 %v4436_v1, %v6125_v23  ;;  %v2443_v3 = vadd.f32 %v2379_v44, %v2311_v33  ;;  %v2078_v7 = vrot.slane %v6130_v56, 2  ;;  %v6193_v51 = vld [vmem:[%s8394_s0 + $0x288] sm:$0xff] }
 0x10c   :  { %v1595_v14 = vsel %vm456_vm0, %v1593_v62, %v1594_v28  ;;  %v6147_v45 = vmul.f32 %v4436_v1, %v6135_v19  ;;  %v1312_v22 = vadd.f32 %v1248_v43, %v1180_v17  ;;  %v2971_v44 = vmul.f32 %v6152_v29, %v6125_v23 }
 0x10d   :  { %v2693_v30 = vrot.slane %v2487_v48, 1  ;;  %v6158_v53 = vmul.f32 %v6152_v29, %v6135_v19  ;;  %v2927_v63 = vadd.f32 %v2772_v11, %v2443_v3  ;;  %v2079_v54 = vsel %vm941_vm1, %v2077_v31, %v2078_v7 }
 0x10e   :  { %v2694_v52 = vrot.slane %v6147_v45, 1  ;;  %v178_v12 = vmul.f32 %v4374_v35, %v5720_v13  ;;  %v1796_v61 = vadd.f32 %v1595_v14, %v1312_v22  ;;  %v3177_v8 = vrot.slane %v2971_v44, 2  ;;  %v6214_v22 = vld [vmem:[%s8394_s0 + $0x290] sm:$0xff] }
 0x10f   :  { %v3178_v4 = vrot.slane %v6158_v53, 2  ;;  %v333_v55 = vmul.f32 %v4376_v36, %v5720_v13  ;;  %v3411_v46 = vadd.f32 %v3256_v59, %v2927_v63  ;;  %v6174_v58 = vmul.f32 %v4376_v36, %v5741_v32 }
 0x110   :  { %v2695_v11 = vsel %vm456_vm0, %v2693_v30, %v2694_v52  ;;  %v818_v34 = vmul.f32 %v4378_v37, %v5720_v13  ;;  %v2280_v43 = vadd.f32 %v2079_v54, %v1796_v61  ;;  %v6183_v59 = vmul.f32 %v4378_v37, %v5741_v32 }
 0x111   :  { %v3179_v26 = vsel %vm941_vm1, %v3177_v8, %v3178_v4  ;;  %v572_v5 = vrot.slane %v333_v55, 1  ;;  %4163 = vmatmul.mubr.f32.gmra.mrb[12].mxu1 %v3411_v46  ;;  %v573_v2 = vrot.slane %v6174_v58, 1  ;;  %v1280_v20 = vmul.f32 %v4381_v39, %v5954_v38 }
 0x112   :  { %v1057_v42 = vrot.slane %v818_v34, 2  ;;  %v1435_v13 = vmul.f32 %v4383_v40, %v5954_v38  ;;  %v2412_v50 = vadd.f32 %v2348_v24, %v2280_v43  ;;  %v1058_v33 = vrot.slane %v6183_v59, 2 }
 0x113   :  { %v6198_v62 = vmul.f32 %v4383_v40, %v5975_v25  ;;  %v1919_v17 = vmul.f32 %v4385_v41, %v5954_v38  ;;  %v574_v31 = vsel %vm456_vm0, %v572_v5, %v573_v2  ;;  %v6207_v24 = vmul.f32 %v4385_v41, %v5975_v25 }
 0x114   :  { %v1673_v48 = vrot.slane %v1435_v13, 1  ;;  %v2380_v3 = vmul.f32 %v4434_v0, %v6193_v51  ;;  %v2896_v14 = vadd.f32 %v2695_v11, %v2412_v50  ;;  %v727_v30 = vadd.f32 %v574_v31, %v178_v12 }
 0x115   :  { %v1059_v44 = vsel %vm941_vm1, %v1057_v42, %v1058_v33  ;;  %v8426_v63 = vrot.slane %v6198_v62, 1  ;;  %v2157_v54 = vrot.slane %v1919_v17, 2  ;;  %v8425_v61 = vrot.slane %v6207_v24, 2 }
 0x116   :  { %v2535_v8 = vmul.f32 %v4436_v1, %v6193_v51  ;;  %v6225_v55 = vmul.f32 %v4436_v1, %v6214_v22  ;;  %v3380_v46 = vadd.f32 %v3179_v26, %v2896_v14  ;;  %v1212_v11 = vadd.f32 %v1059_v44, %v727_v30 }
 0x117   :  { %v1675_v12 = vsel %vm456_vm0, %v1673_v48, %v8426_v63  ;;  %v3019_v34 = vmul.f32 %v6152_v29, %v6193_v51  ;;  %v2159_v43 = vsel %vm941_vm1, %v2157_v54, %v8425_v61  ;;  %v6238_v13 = vmul.f32 %v6152_v29, %v6214_v22 }
 0x118   :  { %v2773_v5 = vrot.slane %v2535_v8, 1  ;;  %v8424_v42 = vrot.slane %v6225_v55, 1  ;;  %4117 = vmatprep.mubr.f32.mxu0 %v3380_v46  ;;  %v1344_v26 = vadd.f32 %v1280_v20, %v1212_v11  ;;  %v147_v17 = vmul.f32 %v4374_v35, %v5667_v47  ;;  %v6255_v47 = vld [vmem:[%s8394_s0 + $0xe8] sm:$0x3] }
 0x119   :  { %v3257_v50 = vrot.slane %v3019_v34, 2  ;;  %v287_v31 = vmul.f32 %v4376_v36, %v5782_v16  ;;  %v8427_v14 = vrot.slane %v6238_v13, 2  ;;  %v772_v30 = vmul.f32 %v4378_v37, %v5782_v16 }
 0x11a   :  { %v2775_v48 = vsel %vm456_vm0, %v2773_v5, %v8424_v42  ;;  %v1249_v44 = vmul.f32 %v4381_v39, %v5901_v57  ;;  %v1828_v20 = vadd.f32 %v1675_v12, %v1344_v26  ;;  %v1389_v8 = vmul.f32 %v4383_v40, %v6016_v60 }
 0x11b   :  { %v495_v54 = vrot.slane %v287_v31, 1  ;;  %v1873_v46 = vmul.f32 %v4385_v41, %v6016_v60  ;;  %v3259_v16 = vsel %vm941_vm1, %v3257_v50, %v8427_v14  ;;  %v980_v11 = vrot.slane %v772_v30, 2 }
 0x11c   :  { %v2349_v12 = vmul.f32 %v4434_v0, %v6135_v19  ;;  %v2489_v34 = vmul.f32 %v4436_v1, %v6255_v47  ;;  %v2312_v5 = vadd.f32 %v2159_v43, %v1828_v20  ;;  %v1596_v31 = vrot.slane %v1389_v8, 1 }
 0x11d   :  { %v496_v26 = vsel %vm456_vm0, %v493_v18, %v495_v54  ;;  %v2080_v42 = vrot.slane %v1873_v46, 2  ;;  %v981_v63 = vsel %vm941_vm1, %v978_v21, %v980_v11  ;;  %v2973_v30 = vmul.f32 %v6152_v29, %v6255_v47 }
 0x11e   :  { %v696_v61 = vadd.f32 %v496_v26, %v147_v17  ;;  %v2696_v50 = vrot.slane %v2489_v34, 1  ;;  %v2444_v14 = vadd.f32 %v2380_v3, %v2312_v5  ;;  %v1597_v43 = vsel %vm456_vm0, %v1594_v28, %v1596_v31 }
 0x11f   :  { %v2081_v27 = vsel %vm941_vm1, %v2078_v7, %v2080_v42  ;;  %v179_v18 = vmul.f32 %v4374_v35, %v5741_v32  ;;  %v3180_v21 = vrot.slane %v2973_v30, 2  ;;  %v335_v3 = vmul.f32 %v4376_v36, %v5830_v49 }
 0x120   :  { %v1181_v17 = vadd.f32 %v981_v63, %v696_v61  ;;  %v2697_v15 = vsel %vm456_vm0, %v2694_v52, %v2696_v50  ;;  %v2928_v20 = vadd.f32 %v2775_v48, %v2444_v14  ;;  %v820_v6 = vmul.f32 %v4378_v37, %v5830_v49  ;;  %v6303_v49 = vld [vmem:[%s8394_s0 + $0x298] sm:$0x3] }
 0x121   :  { %v1281_v28 = vmul.f32 %v4381_v39, %v5975_v25  ;;  %v1437_v56 = vmul.f32 %v4383_v40, %v6064_v10  ;;  %v3181_v7 = vsel %vm941_vm1, %v3178_v4, %v3180_v21  ;;  %v575_v45 = vrot.slane %v335_v3, 1 }
 0x122   :  { %v1313_v32 = vadd.f32 %v1249_v44, %v1181_v17  ;;  %v1921_v52 = vmul.f32 %v4385_v41, %v6064_v10  ;;  %v3412_v63 = vadd.f32 %v3259_v16, %v2928_v20  ;;  %v1060_v61 = vrot.slane %v820_v6, 2 }
 0x123   :  { %v1676_v42 = vrot.slane %v1437_v56, 1  ;;  %v2381_v48 = vmul.f32 %v4434_v0, %v6214_v22  ;;  %v576_v53 = vsel %vm456_vm0, %v573_v2, %v575_v45  ;;  %v2537_v44 = vmul.f32 %v4436_v1, %v6303_v49 }
 0x124   :  { %v1797_v14 = vadd.f32 %v1597_v43, %v1313_v32  ;;  %v2160_v4 = vrot.slane %v1921_v52, 2  ;;  %4165 = vmatprep.mubr.f32.mxu1 %v3412_v63  ;;  %v728_v54 = vadd.f32 %v576_v53, %v179_v18  ;;  %v1061_v8 = vsel %vm941_vm1, %v1058_v33, %v1060_v61 }
 0x125   :  { %v8501_v46 = vrot.slane %v6198_v62, 1  ;;  %v3021_v11 = vmul.f32 %v6152_v29, %v6303_v49  ;;  %v8502_v2 = vrot.slane %v6207_v24, 2  ;;  %v2776_v5 = vrot.slane %v2537_v44, 1 }
 0x126   :  { %v2281_v58 = vadd.f32 %v2081_v27, %v1797_v14  ;;  %v148_v26 = vmul.f32 %v4374_v35, %v5891_v9  ;;  %v1213_v31 = vadd.f32 %v1061_v8, %v728_v54  ;;  %v288_v33 = vmul.f32 %v4376_v36, %v5891_v9 }
 0x127   :  { %v1677_v16 = vsel %vm456_vm0, %v8501_v46, %v1676_v42  ;;  %v2161_v34 = vsel %vm941_vm1, %v8502_v2, %v2160_v4  ;;  %v3260_v59 = vrot.slane %v3021_v11, 2  ;;  %v6329_v62 = vmul.f32 %v4376_v36, %v5901_v57  ;;  %v6364_v42 = vld [vmem:[%s8394_s0 + $0xf0] sm:$0xff]  ;;  %v6374_v4 = vld [vmem:[%s8394_s0 + $0xf8] sm:$0xff] }
 0x128   :  { %v2413_v50 = vadd.f32 %v2349_v12, %v2281_v58  ;;  %v8503_v30 = vrot.slane %v6225_v55, 1  ;;  %v773_v43 = vmul.f32 %v4378_v37, %v5891_v9  ;;  %v6338_v27 = vmul.f32 %v4378_v37, %v5901_v57 }
 0x129   :  { %v1345_v18 = vadd.f32 %v1281_v28, %v1213_v31  ;;  %v8504_v17 = vrot.slane %v6238_v13, 2  ;;  %v497_v3 = vrot.slane %v288_v33, 1  ;;  %v498_v20 = vrot.slane %v6329_v62, 1 }
 0x12a   :  { %v2777_v24 = vsel %vm456_vm0, %v8503_v30, %v2776_v5  ;;  %v2897_v12 = vadd.f32 %v2697_v15, %v2413_v50  ;;  %v982_v6 = vrot.slane %v773_v43, 2  ;;  %v983_v55 = vrot.slane %v6338_v27, 2 }
 0x12b   :  { %v3261_v21 = vsel %vm941_vm1, %v8504_v17, %v3260_v59  ;;  %v1250_v56 = vmul.f32 %v4381_v39, %v6125_v23  ;;  %v1829_v9 = vadd.f32 %v1677_v16, %v1345_v18  ;;  %v499_v32 = vsel %vm456_vm0, %v497_v3, %v498_v20 }
 0x12c   :  { %v1390_v13 = vmul.f32 %v4383_v40, %v6125_v23  ;;  %v6354_v28 = vmul.f32 %v4383_v40, %v6135_v19  ;;  %v3381_v45 = vadd.f32 %v3181_v7, %v2897_v12  ;;  %v697_v15 = vadd.f32 %v499_v32, %v148_v26 }
 0x12d   :  { %v984_v52 = vsel %vm941_vm1, %v982_v6, %v983_v55  ;;  %v1874_v63 = vmul.f32 %v4385_v41, %v6125_v23  ;;  %v2313_v61 = vadd.f32 %v2161_v34, %v1829_v9  ;;  %v6369_v7 = vmul.f32 %v4385_v41, %v6135_v19 }
 0x12e   :  { %v1598_v14 = vrot.slane %v1390_v13, 1  ;;  %v1599_v53 = vrot.slane %v6354_v28, 1  ;;  %4118 = vmatmul.mubr.f32.gmra.mrb[14].mxu0 %v3381_v45  ;;  %v1182_v44 = vadd.f32 %v984_v52, %v697_v15  ;;  %v2350_v8 = vmul.f32 %v4434_v0, %v6364_v42 }
 0x12f   :  { %v2082_v54 = vrot.slane %v1874_v63, 2  ;;  %v2490_v46 = vmul.f32 %v4436_v1, %v6364_v42  ;;  %v2445_v16 = vadd.f32 %v2381_v48, %v2313_v61  ;;  %v2083_v58 = vrot.slane %v6369_v7, 2  ;;  %v6427_v63 = vld [vmem:[%s8394_s0 + $0x2a0] sm:$0xff] }
 0x130   :  { %v1600_v11 = vsel %vm456_vm0, %v1598_v14, %v1599_v53  ;;  %v6386_v2 = vmul.f32 %v4436_v1, %v6374_v4  ;;  %v1314_v34 = vadd.f32 %v1250_v56, %v1182_v44  ;;  %v2974_v26 = vmul.f32 %v6152_v29, %v6364_v42 }
 0x131   :  { %v2698_v5 = vrot.slane %v2490_v46, 1  ;;  %v6392_v31 = vmul.f32 %v6152_v29, %v6374_v4  ;;  %v2929_v48 = vadd.f32 %v2777_v24, %v2445_v16  ;;  %v2084_v59 = vsel %vm941_vm1, %v2082_v54, %v2083_v58 }
 0x132   :  { %v2699_v33 = vrot.slane %v6386_v2, 1  ;;  %v180_v50 = vmul.f32 %v4374_v35, %v5954_v38  ;;  %v1798_v30 = vadd.f32 %v1600_v11, %v1314_v34  ;;  %v3182_v43 = vrot.slane %v2974_v26, 2  ;;  %v6448_v34 = vld [vmem:[%s8394_s0 + $0x2a8] sm:$0xff] }
 0x133   :  { %v3183_v18 = vrot.slane %v6392_v31, 2  ;;  %v336_v17 = vmul.f32 %v4376_v36, %v5954_v38  ;;  %v3413_v3 = vadd.f32 %v3261_v21, %v2929_v48  ;;  %v6408_v12 = vmul.f32 %v4376_v36, %v5975_v25 }
 0x134   :  { %v2700_v24 = vsel %vm456_vm0, %v2698_v5, %v2699_v33  ;;  %v821_v6 = vmul.f32 %v4378_v37, %v5954_v38  ;;  %v2282_v56 = vadd.f32 %v2084_v59, %v1798_v30  ;;  %v6417_v21 = vmul.f32 %v4378_v37, %v5975_v25 }
 0x135   :  { %v3184_v9 = vsel %vm941_vm1, %v3182_v43, %v3183_v18  ;;  %v577_v32 = vrot.slane %v336_v17, 1  ;;  %4166 = vmatmul.mubr.f32.gmra.mrb[14].mxu1 %v3413_v3  ;;  %v578_v13 = vrot.slane %v6408_v12, 1  ;;  %v1282_v15 = vmul.f32 %v4381_v39, %v6193_v51 }
 0x136   :  { %v1062_v45 = vrot.slane %v821_v6, 2  ;;  %v1438_v38 = vmul.f32 %v4383_v40, %v6193_v51  ;;  %v2414_v52 = vadd.f32 %v2350_v8, %v2282_v56  ;;  %v1063_v61 = vrot.slane %v6417_v21, 2 }
 0x137   :  { %v6432_v14 = vmul.f32 %v4383_v40, %v6214_v22  ;;  %v1922_v44 = vmul.f32 %v4385_v41, %v6193_v51  ;;  %v579_v54 = vsel %vm456_vm0, %v577_v32, %v578_v13  ;;  %v6441_v8 = vmul.f32 %v4385_v41, %v6214_v22 }
 0x138   :  { %v1678_v46 = vrot.slane %v1438_v38, 1  ;;  %v2382_v16 = vmul.f32 %v4434_v0, %v6427_v63  ;;  %v2898_v11 = vadd.f32 %v2700_v24, %v2414_v52  ;;  %v729_v5 = vadd.f32 %v579_v54, %v180_v50 }
 0x139   :  { %v1064_v26 = vsel %vm941_vm1, %v1062_v45, %v1063_v61  ;;  %v8430_v48 = vrot.slane %v6432_v14, 1  ;;  %v2162_v59 = vrot.slane %v1922_v44, 2  ;;  %v8429_v30 = vrot.slane %v6441_v8, 2 }
 0x13a   :  { %v2538_v43 = vmul.f32 %v4436_v1, %v6427_v63  ;;  %v6459_v17 = vmul.f32 %v4436_v1, %v6448_v34  ;;  %v3382_v3 = vadd.f32 %v3184_v9, %v2898_v11  ;;  %v1214_v24 = vadd.f32 %v1064_v26, %v729_v5 }
 0x13b   :  { %v1680_v50 = vsel %vm456_vm0, %v1678_v46, %v8430_v48  ;;  %v3022_v6 = vmul.f32 %v6152_v29, %v6427_v63  ;;  %v2164_v56 = vsel %vm941_vm1, %v2162_v59, %v8429_v30  ;;  %v6472_v38 = vmul.f32 %v6152_v29, %v6448_v34 }
 0x13c   :  { %v2778_v32 = vrot.slane %v2538_v43, 1  ;;  %v8428_v45 = vrot.slane %v6459_v17, 1  ;;  %4120 = vmatprep.mubr.f32.mxu0 %v3382_v3  ;;  %v1346_v9 = vadd.f32 %v1282_v15, %v1214_v24  ;;  %v149_v44 = vmul.f32 %v4374_v35, %v5901_v57  ;;  %v6489_v57 = vld [vmem:[%s8394_s0 + $0x100] sm:$0x3] }
 0x13d   :  { %v3262_v52 = vrot.slane %v3022_v6, 2  ;;  %v290_v54 = vmul.f32 %v4376_v36, %v6016_v60  ;;  %v8431_v11 = vrot.slane %v6472_v38, 2  ;;  %v775_v5 = vmul.f32 %v4378_v37, %v6016_v60 }
 0x13e   :  { %v2780_v46 = vsel %vm456_vm0, %v2778_v32, %v8428_v45  ;;  %v1251_v26 = vmul.f32 %v4381_v39, %v6135_v19  ;;  %v1830_v15 = vadd.f32 %v1680_v50, %v1346_v9  ;;  %v1392_v43 = vmul.f32 %v4383_v40, %v6255_v47 }
 0x13f   :  { %v500_v59 = vrot.slane %v290_v54, 1  ;;  %v1876_v3 = vmul.f32 %v4385_v41, %v6255_v47  ;;  %v3264_v60 = vsel %vm941_vm1, %v3262_v52, %v8431_v11  ;;  %v985_v24 = vrot.slane %v775_v5, 2 }
 0x140   :  { %v2351_v50 = vmul.f32 %v4434_v0, %v6374_v4  ;;  %v2492_v6 = vmul.f32 %v4436_v1, %v6489_v57  ;;  %v2314_v32 = vadd.f32 %v2164_v56, %v1830_v15  ;;  %v1601_v54 = vrot.slane %v1392_v43, 1 }
 0x141   :  { %v501_v9 = vsel %vm456_vm0, %v498_v20, %v500_v59  ;;  %v2085_v45 = vrot.slane %v1876_v3, 2  ;;  %v986_v48 = vsel %vm941_vm1, %v983_v55, %v985_v24  ;;  %v2976_v5 = vmul.f32 %v6152_v29, %v6489_v57 }
 0x142   :  { %v698_v30 = vadd.f32 %v501_v9, %v149_v44  ;;  %v2701_v52 = vrot.slane %v2492_v6, 1  ;;  %v2446_v11 = vadd.f32 %v2382_v16, %v2314_v32  ;;  %v1602_v56 = vsel %vm456_vm0, %v1599_v53, %v1601_v54 }
 0x143   :  { %v2086_v62 = vsel %vm941_vm1, %v2083_v58, %v2085_v45  ;;  %v181_v20 = vmul.f32 %v4374_v35, %v5975_v25  ;;  %v3185_v55 = vrot.slane %v2976_v5, 2  ;;  %v338_v16 = vmul.f32 %v4376_v36, %v6064_v10 }
 0x144   :  { %v1183_v44 = vadd.f32 %v986_v48, %v698_v30  ;;  %v2702_v27 = vsel %vm456_vm0, %v2699_v33, %v2701_v52  ;;  %v2930_v15 = vadd.f32 %v2780_v46, %v2446_v11  ;;  %v823_v28 = vmul.f32 %v4378_v37, %v6064_v10  ;;  %v6537_v10 = vld [vmem:[%s8394_s0 + $0x2b0] sm:$0x3] }
 0x145   :  { %v1283_v53 = vmul.f32 %v4381_v39, %v6214_v22  ;;  %v1440_v7 = vmul.f32 %v4383_v40, %v6303_v49  ;;  %v3186_v58 = vsel %vm941_vm1, %v3183_v18, %v3185_v55  ;;  %v580_v2 = vrot.slane %v338_v16, 1 }
 0x146   :  { %v1315_v25 = vadd.f32 %v1251_v26, %v1183_v44  ;;  %v1924_v33 = vmul.f32 %v4385_v41, %v6303_v49  ;;  %v3414_v48 = vadd.f32 %v3264_v60, %v2930_v15  ;;  %v1065_v30 = vrot.slane %v823_v28, 2 }
 0x147   :  { %v1681_v45 = vrot.slane %v1440_v7, 1  ;;  %v2383_v46 = vmul.f32 %v4434_v0, %v6448_v34  ;;  %v581_v31 = vsel %vm456_vm0, %v578_v13, %v580_v2  ;;  %v2540_v26 = vmul.f32 %v4436_v1, %v6537_v10 }
 0x148   :  { %v1799_v11 = vadd.f32 %v1602_v56, %v1315_v25  ;;  %v2165_v18 = vrot.slane %v1924_v33, 2  ;;  %4168 = vmatprep.mubr.f32.mxu1 %v3414_v48  ;;  %v730_v59 = vadd.f32 %v581_v31, %v181_v20  ;;  %v1066_v43 = vsel %vm941_vm1, %v1063_v61, %v1065_v30 }
 0x149   :  { %v8505_v3 = vrot.slane %v6432_v14, 1  ;;  %v3024_v24 = vmul.f32 %v6152_v29, %v6537_v10  ;;  %v8506_v13 = vrot.slane %v6441_v8, 2  ;;  %v2781_v32 = vrot.slane %v2540_v26, 1 }
 0x14a   :  { %v2283_v12 = vadd.f32 %v2086_v62, %v1799_v11  ;;  %v150_v9 = vmul.f32 %v4374_v35, %v6125_v23  ;;  %v1215_v54 = vadd.f32 %v1066_v43, %v730_v59  ;;  %v291_v61 = vmul.f32 %v4376_v36, %v6125_v23 }
 0x14b   :  { %v1682_v60 = vsel %vm456_vm0, %v8505_v3, %v1681_v45  ;;  %v2166_v6 = vsel %vm941_vm1, %v8506_v13, %v2165_v18  ;;  %v3265_v21 = vrot.slane %v3024_v24, 2  ;;  %v6563_v14 = vmul.f32 %v4376_v36, %v6135_v19  ;;  %v6598_v45 = vld [vmem:[%s8394_s0 + $0x108] sm:$0xff]  ;;  %v6608_v18 = vld [vmem:[%s8394_s0 + $0x110] sm:$0xff] }
 0x14c   :  { %v2415_v52 = vadd.f32 %v2351_v50, %v2283_v12  ;;  %v8507_v5 = vrot.slane %v6459_v17, 1  ;;  %v776_v56 = vmul.f32 %v4378_v37, %v6125_v23  ;;  %v6572_v62 = vmul.f32 %v4378_v37, %v6135_v19 }
 0x14d   :  { %v1347_v20 = vadd.f32 %v1283_v53, %v1215_v54  ;;  %v8508_v44 = vrot.slane %v6472_v38, 2  ;;  %v502_v16 = vrot.slane %v291_v61, 1  ;;  %v503_v15 = vrot.slane %v6563_v14, 1 }
 0x14e   :  { %v2782_v8 = vsel %vm456_vm0, %v8507_v5, %v2781_v32  ;;  %v2899_v50 = vadd.f32 %v2702_v27, %v2415_v52  ;;  %v987_v28 = vrot.slane %v776_v56, 2  ;;  %v988_v17 = vrot.slane %v6572_v62, 2 }
 0x14f   :  { %v3266_v55 = vsel %vm941_vm1, %v8508_v44, %v3265_v21  ;;  %v1252_v7 = vmul.f32 %v4381_v39, %v6364_v42  ;;  %v1831_v23 = vadd.f32 %v1682_v60, %v1347_v20  ;;  %v504_v25 = vsel %vm456_vm0, %v502_v16, %v503_v15 }
 0x150   :  { %v1393_v38 = vmul.f32 %v4383_v40, %v6364_v42  ;;  %v6588_v53 = vmul.f32 %v4383_v40, %v6374_v4  ;;  %v3383_v2 = vadd.f32 %v3186_v58, %v2899_v50  ;;  %v699_v27 = vadd.f32 %v504_v25, %v150_v9 }
 0x151   :  { %v989_v33 = vsel %vm941_vm1, %v987_v28, %v988_v17  ;;  %v1877_v48 = vmul.f32 %v4385_v41, %v6364_v42  ;;  %v2315_v30 = vadd.f32 %v2166_v6, %v1831_v23  ;;  %v6603_v58 = vmul.f32 %v4385_v41, %v6374_v4 }
 0x152   :  { %v1603_v11 = vrot.slane %v1393_v38, 1  ;;  %v1604_v31 = vrot.slane %v6588_v53, 1  ;;  %4121 = vmatmul.mubr.f32.gmra.mrb[16].mxu0 %v3383_v2  ;;  %v1184_v26 = vadd.f32 %v989_v33, %v699_v27  ;;  %v2352_v43 = vmul.f32 %v4434_v0, %v6598_v45 }
 0x153   :  { %v2087_v59 = vrot.slane %v1877_v48, 2  ;;  %v2493_v3 = vmul.f32 %v4436_v1, %v6598_v45  ;;  %v2447_v60 = vadd.f32 %v2383_v46, %v2315_v30  ;;  %v2088_v12 = vrot.slane %v6603_v58, 2  ;;  %v6661_v48 = vld [vmem:[%s8394_s0 + $0x2b8] sm:$0xff] }
 0x154   :  { %v1605_v24 = vsel %vm456_vm0, %v1603_v11, %v1604_v31  ;;  %v6620_v13 = vmul.f32 %v4436_v1, %v6608_v18  ;;  %v1316_v6 = vadd.f32 %v1252_v7, %v1184_v26  ;;  %v2977_v9 = vmul.f32 %v6152_v29, %v6598_v45 }
 0x155   :  { %v2703_v32 = vrot.slane %v2493_v3, 1  ;;  %v6626_v54 = vmul.f32 %v6152_v29, %v6608_v18  ;;  %v2931_v46 = vadd.f32 %v2782_v8, %v2447_v60  ;;  %v2089_v21 = vsel %vm941_vm1, %v2087_v59, %v2088_v12 }
 0x156   :  { %v2704_v61 = vrot.slane %v6620_v13, 1  ;;  %v182_v52 = vmul.f32 %v4374_v35, %v6193_v51  ;;  %v1800_v5 = vadd.f32 %v1605_v24, %v1316_v6  ;;  %v3187_v56 = vrot.slane %v2977_v9, 2  ;;  %v6682_v6 = vld [vmem:[%s8394_s0 + $0x2c0] sm:$0xff] }
 0x157   :  { %v3188_v20 = vrot.slane %v6626_v54, 2  ;;  %v339_v44 = vmul.f32 %v4376_v36, %v6193_v51  ;;  %v3415_v16 = vadd.f32 %v3266_v55, %v2931_v46  ;;  %v6642_v50 = vmul.f32 %v4376_v36, %v6214_v22 }
 0x158   :  { %v2705_v8 = vsel %vm456_vm0, %v2703_v32, %v2704_v61  ;;  %v824_v28 = vmul.f32 %v4378_v37, %v6193_v51  ;;  %v2284_v7 = vadd.f32 %v2089_v21, %v1800_v5  ;;  %v6651_v55 = vmul.f32 %v4378_v37, %v6214_v22 }
 0x159   :  { %v3189_v23 = vsel %vm941_vm1, %v3187_v56, %v3188_v20  ;;  %v582_v25 = vrot.slane %v339_v44, 1  ;;  %4169 = vmatmul.mubr.f32.gmra.mrb[16].mxu1 %v3415_v16  ;;  %v583_v38 = vrot.slane %v6642_v50, 1  ;;  %v1284_v27 = vmul.f32 %v4381_v39, %v6427_v63 }
 0x15a   :  { %v1067_v2 = vrot.slane %v824_v28, 2  ;;  %v1441_v51 = vmul.f32 %v4383_v40, %v6427_v63  ;;  %v2416_v33 = vadd.f32 %v2352_v43, %v2284_v7  ;;  %v1068_v30 = vrot.slane %v6651_v55, 2 }
 0x15b   :  { %v6666_v11 = vmul.f32 %v4383_v40, %v6448_v34  ;;  %v1925_v26 = vmul.f32 %v4385_v41, %v6427_v63  ;;  %v584_v59 = vsel %vm456_vm0, %v582_v25, %v583_v38  ;;  %v6675_v43 = vmul.f32 %v4385_v41, %v6448_v34 }
 0x15c   :  { %v1683_v3 = vrot.slane %v1441_v51, 1  ;;  %v2384_v60 = vmul.f32 %v4434_v0, %v6661_v48  ;;  %v2900_v24 = vadd.f32 %v2705_v8, %v2416_v33  ;;  %v731_v32 = vadd.f32 %v584_v59, %v182_v52 }
 0x15d   :  { %v1069_v9 = vsel %vm941_vm1, %v1067_v2, %v1068_v30  ;;  %v8434_v46 = vrot.slane %v6666_v11, 1  ;;  %v2167_v21 = vrot.slane %v1925_v26, 2  ;;  %v8433_v5 = vrot.slane %v6675_v43, 2 }
 0x15e   :  { %v2541_v56 = vmul.f32 %v4436_v1, %v6661_v48  ;;  %v6693_v44 = vmul.f32 %v4436_v1, %v6682_v6  ;;  %v3384_v16 = vadd.f32 %v3189_v23, %v2900_v24  ;;  %v1216_v8 = vadd.f32 %v1069_v9, %v731_v32 }
 0x15f   :  { %v1685_v52 = vsel %vm456_vm0, %v1683_v3, %v8434_v46  ;;  %v3025_v28 = vmul.f32 %v6152_v29, %v6661_v48  ;;  %v2169_v7 = vsel %vm941_vm1, %v2167_v21, %v8433_v5  ;;  %v6706_v51 = vmul.f32 %v6152_v29, %v6682_v6 }
 0x160   :  { %v2783_v25 = vrot.slane %v2541_v56, 1  ;;  %v8432_v2 = vrot.slane %v6693_v44, 1  ;;  %4123 = vmatprep.mubr.f32.mxu0 %v3384_v16  ;;  %v1348_v23 = vadd.f32 %v1284_v27, %v1216_v8  ;;  %v151_v26 = vmul.f32 %v4374_v35, %v6135_v19  ;;  %v6723_v19 = vld [vmem:[%s8394_s0 + $0x118] sm:$0x3] }
 0x161   :  { %v3267_v33 = vrot.slane %v3025_v28, 2  ;;  %v293_v59 = vmul.f32 %v4376_v36, %v6255_v47  ;;  %v8435_v24 = vrot.slane %v6706_v51, 2  ;;  %v778_v32 = vmul.f32 %v4378_v37, %v6255_v47 }
 0x162   :  { %v2785_v3 = vsel %vm456_vm0, %v2783_v25, %v8432_v2  ;;  %v1253_v9 = vmul.f32 %v4381_v39, %v6374_v4  ;;  %v1832_v27 = vadd.f32 %v1685_v52, %v1348_v23  ;;  %v1395_v56 = vmul.f32 %v4383_v40, %v6489_v57 }
 0x163   :  { %v505_v21 = vrot.slane %v293_v59, 1  ;;  %v1879_v16 = vmul.f32 %v4385_v41, %v6489_v57  ;;  %v3269_v47 = vsel %vm941_vm1, %v3267_v33, %v8435_v24  ;;  %v990_v8 = vrot.slane %v778_v32, 2 }
 0x164   :  { %v2353_v52 = vmul.f32 %v4434_v0, %v6608_v18  ;;  %v2495_v28 = vmul.f32 %v4436_v1, %v6723_v19  ;;  %v2316_v25 = vadd.f32 %v2169_v7, %v1832_v27  ;;  %v1606_v59 = vrot.slane %v1395_v56, 1 }
 0x165   :  { %v506_v23 = vsel %vm456_vm0, %v503_v15, %v505_v21  ;;  %v2090_v2 = vrot.slane %v1879_v16, 2  ;;  %v991_v46 = vsel %vm941_vm1, %v988_v17, %v990_v8  ;;  %v2979_v32 = vmul.f32 %v6152_v29, %v6723_v19 }
 0x166   :  { %v700_v5 = vadd.f32 %v506_v23, %v151_v26  ;;  %v2706_v33 = vrot.slane %v2495_v28, 1  ;;  %v2448_v24 = vadd.f32 %v2384_v60, %v2316_v25  ;;  %v1607_v7 = vsel %vm456_vm0, %v1604_v31, %v1606_v59 }
 0x167   :  { %v2091_v14 = vsel %vm941_vm1, %v2088_v12, %v2090_v2  ;;  %v183_v15 = vmul.f32 %v4374_v35, %v6214_v22  ;;  %v3190_v17 = vrot.slane %v2979_v32, 2  ;;  %v341_v60 = vmul.f32 %v4376_v36, %v6303_v49 }
 0x168   :  { %v1185_v26 = vadd.f32 %v991_v46, %v700_v5  ;;  %v2707_v62 = vsel %vm456_vm0, %v2704_v61, %v2706_v33  ;;  %v2932_v27 = vadd.f32 %v2785_v3, %v2448_v24  ;;  %v826_v53 = vmul.f32 %v4378_v37, %v6303_v49  ;;  %v6771_v49 = vld [vmem:[%s8394_s0 + $0x2c8] sm:$0x3] }
 0x169   :  { %v1285_v31 = vmul.f32 %v4381_v39, %v6448_v34  ;;  %v1443_v58 = vmul.f32 %v4383_v40, %v6537_v10  ;;  %v3191_v12 = vsel %vm941_vm1, %v3188_v20, %v3190_v17  ;;  %v585_v13 = vrot.slane %v341_v60, 1 }
 0x16a   :  { %v1317_v22 = vadd.f32 %v1253_v9, %v1185_v26  ;;  %v1927_v61 = vmul.f32 %v4385_v41, %v6537_v10  ;;  %v3416_v46 = vadd.f32 %v3269_v47, %v2932_v27  ;;  %v1070_v5 = vrot.slane %v826_v53, 2 }
 0x16b   :  { %v1686_v2 = vrot.slane %v1443_v58, 1  ;;  %v2385_v3 = vmul.f32 %v4434_v0, %v6682_v6  ;;  %v586_v54 = vsel %vm456_vm0, %v583_v38, %v585_v13  ;;  %v2543_v9 = vmul.f32 %v4436_v1, %v6771_v49 }
 0x16c   :  { %v1801_v24 = vadd.f32 %v1607_v7, %v1317_v22  ;;  %v2170_v20 = vrot.slane %v1927_v61, 2  ;;  %4171 = vmatprep.mubr.f32.mxu1 %v3416_v46  ;;  %v732_v21 = vadd.f32 %v586_v54, %v183_v15  ;;  %v1071_v56 = vsel %vm941_vm1, %v1068_v30, %v1070_v5 }
 0x16d   :  { %v8509_v16 = vrot.slane %v6666_v11, 1  ;;  %v3027_v8 = vmul.f32 %v6152_v29, %v6771_v49  ;;  %v8510_v38 = vrot.slane %v6675_v43, 2  ;;  %v2786_v25 = vrot.slane %v2543_v9, 1 }
 0x16e   :  { %v2285_v50 = vadd.f32 %v2091_v14, %v1801_v24  ;;  %v152_v23 = vmul.f32 %v4374_v35, %v6364_v42  ;;  %v1217_v59 = vadd.f32 %v1071_v56, %v732_v21  ;;  %v294_v30 = vmul.f32 %v4376_v36, %v6364_v42 }
 0x16f   :  { %v1687_v47 = vsel %vm456_vm0, %v8509_v16, %v1686_v2  ;;  %v2171_v28 = vsel %vm941_vm1, %v8510_v38, %v2170_v20  ;;  %v3270_v55 = vrot.slane %v3027_v8, 2  ;;  %v6797_v11 = vmul.f32 %v4376_v36, %v6374_v4  ;;  %v6832_v2 = vld [vmem:[%s8394_s0 + $0x120] sm:$0xff]  ;;  %v6842_v20 = vld [vmem:[%s8394_s0 + $0x128] sm:$0xff] }
 0x170   :  { %v2417_v33 = vadd.f32 %v2353_v52, %v2285_v50  ;;  %v8511_v32 = vrot.slane %v6693_v44, 1  ;;  %v779_v7 = vmul.f32 %v4378_v37, %v6364_v42  ;;  %v6806_v14 = vmul.f32 %v4378_v37, %v6374_v4 }
 0x171   :  { %v1349_v15 = vadd.f32 %v1285_v31, %v1217_v59  ;;  %v8512_v26 = vrot.slane %v6706_v51, 2  ;;  %v507_v60 = vrot.slane %v294_v30, 1  ;;  %v508_v27 = vrot.slane %v6797_v11, 1 }
 0x172   :  { %v2787_v43 = vsel %vm456_vm0, %v8511_v32, %v2786_v25  ;;  %v2901_v52 = vadd.f32 %v2707_v62, %v2417_v33  ;;  %v992_v53 = vrot.slane %v779_v7, 2  ;;  %v993_v44 = vrot.slane %v6806_v14, 2 }
 0x173   :  { %v3271_v17 = vsel %vm941_vm1, %v8512_v26, %v3270_v55  ;;  %v1254_v58 = vmul.f32 %v4381_v39, %v6598_v45  ;;  %v1833_v42 = vadd.f32 %v1687_v47, %v1349_v15  ;;  %v509_v22 = vsel %vm456_vm0, %v507_v60, %v508_v27 }
 0x174   :  { %v1396_v51 = vmul.f32 %v4383_v40, %v6598_v45  ;;  %v6822_v31 = vmul.f32 %v4383_v40, %v6608_v18  ;;  %v3385_v13 = vadd.f32 %v3191_v12, %v2901_v52  ;;  %v701_v62 = vadd.f32 %v509_v22, %v152_v23 }
 0x175   :  { %v994_v61 = vsel %vm941_vm1, %v992_v53, %v993_v44  ;;  %v1880_v46 = vmul.f32 %v4385_v41, %v6598_v45  ;;  %v2317_v5 = vadd.f32 %v2171_v28, %v1833_v42  ;;  %v6837_v12 = vmul.f32 %v4385_v41, %v6608_v18 }
 0x176   :  { %v1608_v24 = vrot.slane %v1396_v51, 1  ;;  %v1609_v54 = vrot.slane %v6822_v31, 1  ;;  %4124 = vmatmul.mubr.f32.gmra.mrb[18].mxu0 %v3385_v13  ;;  %v1186_v9 = vadd.f32 %v994_v61, %v701_v62  ;;  %v2354_v56 = vmul.f32 %v4434_v0, %v6832_v2 }
 0x177   :  { %v2092_v21 = vrot.slane %v1880_v46, 2  ;;  %v2496_v16 = vmul.f32 %v4436_v1, %v6832_v2  ;;  %v2449_v47 = vadd.f32 %v2385_v3, %v2317_v5  ;;  %v2093_v50 = vrot.slane %v6837_v12, 2  ;;  %v6895_v46 = vld [vmem:[%s8394_s0 + $0x2d0] sm:$0xff] }
 0x178   :  { %v1610_v8 = vsel %vm456_vm0, %v1608_v24, %v1609_v54  ;;  %v6854_v38 = vmul.f32 %v4436_v1, %v6842_v20  ;;  %v1318_v28 = vadd.f32 %v1254_v58, %v1186_v9  ;;  %v2980_v23 = vmul.f32 %v6152_v29, %v6832_v2 }
 0x179   :  { %v2708_v25 = vrot.slane %v2496_v16, 1  ;;  %v6860_v59 = vmul.f32 %v6152_v29, %v6842_v20  ;;  %v2933_v3 = vadd.f32 %v2787_v43, %v2449_v47  ;;  %v2094_v55 = vsel %vm941_vm1, %v2092_v21, %v2093_v50 }
 0x17a   :  { %v2709_v30 = vrot.slane %v6854_v38, 1  ;;  %v184_v33 = vmul.f32 %v4374_v35, %v6427_v63  ;;  %v1802_v32 = vadd.f32 %v1610_v8, %v1318_v28  ;;  %v3192_v7 = vrot.slane %v2980_v23, 2  ;;  %v6916_v28 = vld [vmem:[%s8394_s0 + $0x2d8] sm:$0xff] }
 0x17b   :  { %v3193_v15 = vrot.slane %v6860_v59, 2  ;;  %v342_v26 = vmul.f32 %v4376_v36, %v6427_v63  ;;  %v3417_v60 = vadd.f32 %v3271_v17, %v2933_v3  ;;  %v6876_v52 = vmul.f32 %v4376_v36, %v6448_v34 }
 0x17c   :  { %v2710_v43 = vsel %vm456_vm0, %v2708_v25, %v2709_v30  ;;  %v827_v53 = vmul.f32 %v4378_v37, %v6427_v63  ;;  %v2286_v58 = vadd.f32 %v2094_v55, %v1802_v32  ;;  %v6885_v17 = vmul.f32 %v4378_v37, %v6448_v34 }
 0x17d   :  { %v3194_v42 = vsel %vm941_vm1, %v3192_v7, %v3193_v15  ;;  %v587_v22 = vrot.slane %v342_v26, 1  ;;  %4172 = vmatmul.mubr.f32.gmra.mrb[18].mxu1 %v3417_v60  ;;  %v588_v51 = vrot.slane %v6876_v52, 1  ;;  %v1286_v62 = vmul.f32 %v4381_v39, %v6661_v48 }
 0x17e   :  { %v1072_v13 = vrot.slane %v827_v53, 2  ;;  %v1444_v63 = vmul.f32 %v4383_v40, %v6661_v48  ;;  %v2418_v61 = vadd.f32 %v2354_v56, %v2286_v58  ;;  %v1073_v5 = vrot.slane %v6885_v17, 2 }
 0x17f   :  { %v6900_v24 = vmul.f32 %v4383_v40, %v6682_v6  ;;  %v1928_v9 = vmul.f32 %v4385_v41, %v6661_v48  ;;  %v589_v21 = vsel %vm456_vm0, %v587_v22, %v588_v51  ;;  %v6909_v56 = vmul.f32 %v4385_v41, %v6682_v6 }
 0x180   :  { %v1688_v16 = vrot.slane %v1444_v63, 1  ;;  %v2386_v47 = vmul.f32 %v4434_v0, %v6895_v46  ;;  %v2902_v8 = vadd.f32 %v2710_v43, %v2418_v61  ;;  %v733_v25 = vadd.f32 %v589_v21, %v184_v33 }
 0x181   :  { %v1074_v23 = vsel %vm941_vm1, %v1072_v13, %v1073_v5  ;;  %v1689_v3 = vrot.slane %v6900_v24, 1  ;;  %v2172_v55 = vrot.slane %v1928_v9, 2  ;;  %v8437_v32 = vrot.slane %v6909_v56, 2 }
 0x182   :  { %v2544_v7 = vmul.f32 %v4436_v1, %v6895_v46  ;;  %v6927_v26 = vmul.f32 %v4436_v1, %v6916_v28  ;;  %v3386_v60 = vadd.f32 %v3194_v42, %v2902_v8  ;;  %v1218_v43 = vadd.f32 %v1074_v23, %v733_v25 }
 0x183   :  { %v1690_v33 = vsel %vm456_vm0, %v1688_v16, %v1689_v3  ;;  %v3028_v53 = vmul.f32 %v6152_v29, %v6895_v46  ;;  %v2174_v58 = vsel %vm941_vm1, %v2172_v55, %v8437_v32  ;;  %v6940_v63 = vmul.f32 %v6152_v29, %v6916_v28 }
 0x184   :  { %v2788_v22 = vrot.slane %v2544_v7, 1  ;;  %v8436_v13 = vrot.slane %v6927_v26, 1  ;;  %4126 = vmatprep.mubr.f32.mxu0 %v3386_v60  ;;  %v1350_v42 = vadd.f32 %v1286_v62, %v1218_v43  ;;  %v153_v9 = vmul.f32 %v4374_v35, %v6374_v4  ;;  %v6957_v4 = vld [vmem:[%s8394_s0 + $0x130] sm:$0x3] }
 0x185   :  { %v3272_v61 = vrot.slane %v3028_v53, 2  ;;  %v296_v21 = vmul.f32 %v4376_v36, %v6489_v57  ;;  %v3273_v8 = vrot.slane %v6940_v63, 2  ;;  %v781_v25 = vmul.f32 %v4378_v37, %v6489_v57 }
 0x186   :  { %v2790_v16 = vsel %vm456_vm0, %v2788_v22, %v8436_v13  ;;  %v1255_v29 = vmul.f32 %v4381_v39, %v6608_v18  ;;  %v1834_v62 = vadd.f32 %v1690_v33, %v1350_v42  ;;  %v1398_v55 = vmul.f32 %v4383_v40, %v6723_v19 }
 0x187   :  { %v510_v23 = vrot.slane %v296_v21, 1  ;;  %v1882_v7 = vmul.f32 %v4385_v41, %v6723_v19  ;;  %v3274_v57 = vsel %vm941_vm1, %v3272_v61, %v3273_v8  ;;  %v995_v60 = vrot.slane %v781_v25, 2  ;;  %v6979_v25 = vld [vmem:[%s8395_s1 + $0x8] ss:$0 sm:$0xff] }
 0x188   :  { %v2355_v43 = vmul.f32 %v4434_v0, %v6842_v20  ;;  %v2498_v33 = vmul.f32 %v4436_v1, %v6957_v4  ;;  %v2318_v53 = vadd.f32 %v2174_v58, %v1834_v62  ;;  %v1611_v42 = vrot.slane %v1398_v55, 1 }
 0x189   :  { %v511_v22 = vsel %vm456_vm0, %v508_v27, %v510_v23  ;;  %v2095_v21 = vrot.slane %v1882_v7, 2  ;;  %v996_v32 = vsel %vm941_vm1, %v993_v44, %v995_v60  ;;  %v2982_v58 = vmul.f32 %v6979_v25, %v6957_v4 }
 0x18a   :  { %v702_v13 = vadd.f32 %v511_v22, %v153_v9  ;;  %v2711_v61 = vrot.slane %v2498_v33, 1  ;;  %v2450_v62 = vadd.f32 %v2386_v47, %v2318_v53  ;;  %v1612_v11 = vsel %vm456_vm0, %v1609_v54, %v1611_v42 }
 0x18b   :  { %v2096_v14 = vsel %vm941_vm1, %v2093_v50, %v2095_v21  ;;  %v185_v27 = vmul.f32 %v4374_v35, %v6448_v34  ;;  %v3195_v23 = vrot.slane %v2982_v58, 2  ;;  %v344_v47 = vmul.f32 %v4376_v36, %v6537_v10 }
 0x18c   :  { %v1187_v44 = vadd.f32 %v996_v32, %v702_v13  ;;  %v2712_v9 = vsel %vm456_vm0, %v2709_v30, %v2711_v61  ;;  %v2934_v55 = vadd.f32 %v2790_v16, %v2450_v62  ;;  %v829_v31 = vmul.f32 %v4378_v37, %v6537_v10  ;;  %v7010_v10 = vld [vmem:[%s8394_s0 + $0x2e0] sm:$0x3] }
 0x18d   :  { %v1287_v54 = vmul.f32 %v4381_v39, %v6682_v6  ;;  %v1446_v12 = vmul.f32 %v4383_v40, %v6771_v49  ;;  %v3196_v50 = vsel %vm941_vm1, %v3193_v15, %v3195_v23  ;;  %v590_v38 = vrot.slane %v344_v47, 1 }
 0x18e   :  { %v1319_v34 = vadd.f32 %v1255_v29, %v1187_v44  ;;  %v1930_v30 = vmul.f32 %v4385_v41, %v6771_v49  ;;  %v3418_v32 = vadd.f32 %v3274_v57, %v2934_v55  ;;  %v1075_v13 = vrot.slane %v829_v31, 2 }
 0x18f   :  { %v1691_v16 = vrot.slane %v1446_v12, 1  ;;  %v2387_v7 = vmul.f32 %v4434_v0, %v6916_v28  ;;  %v591_v59 = vsel %vm456_vm0, %v588_v51, %v590_v38  ;;  %v2546_v60 = vmul.f32 %v4436_v1, %v7010_v10 }
 0x190   :  { %v1803_v29 = vadd.f32 %v1612_v11, %v1319_v34  ;;  %v2175_v15 = vrot.slane %v1930_v30, 2  ;;  %4174 = vmatprep.mubr.f32.mxu1 %v3418_v32  ;;  %v734_v57 = vadd.f32 %v591_v59, %v185_v27  ;;  %v1076_v33 = vsel %vm941_vm1, %v1073_v5, %v1075_v13  ;;  %v7071_v32 = vld [vmem:[%s8394_s0 + $0x138] sm:$0xff] }
 0x191   :  { %v1692_v53 = vsel %vm456_vm0, %v1689_v3, %v1691_v16  ;;  %v3030_v22 = vmul.f32 %v6979_v25, %v7010_v10  ;;  %v8513_v51 = vrot.slane %v6909_v56, 2  ;;  %v2791_v21 = vrot.slane %v2546_v60, 1 }
 0x192   :  { %v2287_v52 = vadd.f32 %v2096_v14, %v1803_v29  ;;  %v154_v61 = vmul.f32 %v4374_v35, %v6598_v45  ;;  %v1219_v58 = vadd.f32 %v1076_v33, %v734_v57  ;;  %v297_v5 = vmul.f32 %v4376_v36, %v6598_v45  ;;  %v7081_v29 = vld [vmem:[%s8394_s0 + $0x140] sm:$0xff] }
 0x193   :  { %v2176_v42 = vsel %vm941_vm1, %v8513_v51, %v2175_v15  ;;  %v3275_v17 = vrot.slane %v3030_v22, 2  ;;  %v7036_v24 = vmul.f32 %v4376_v36, %v6608_v18  ;;  %v8514_v62 = vrot.slane %v6927_v26, 1 }
 0x194   :  { %v2419_v3 = vadd.f32 %v2355_v43, %v2287_v52  ;;  %v782_v11 = vmul.f32 %v4378_v37, %v6598_v45  ;;  %v7045_v14 = vmul.f32 %v4378_v37, %v6608_v18  ;;  %v1351_v27 = vadd.f32 %v1287_v54, %v1219_v58 }
 0x195   :  { %v2792_v56 = vsel %vm456_vm0, %v8514_v62, %v2791_v21  ;;  %v3276_v44 = vsel %vm941_vm1, %v3273_v8, %v3275_v17  ;;  %v512_v23 = vrot.slane %v297_v5, 1  ;;  %v513_v47 = vrot.slane %v7036_v24, 1 }
 0x196   :  { %v2903_v43 = vadd.f32 %v2712_v9, %v2419_v3  ;;  %v997_v55 = vrot.slane %v782_v11, 2  ;;  %v998_v26 = vrot.slane %v7045_v14, 2  ;;  %v1256_v31 = vmul.f32 %v4381_v39, %v6832_v2 }
 0x197   :  { %v1835_v45 = vadd.f32 %v1692_v53, %v1351_v27  ;;  %v514_v12 = vsel %vm456_vm0, %v512_v23, %v513_v47  ;;  %v1399_v63 = vmul.f32 %v4383_v40, %v6832_v2  ;;  %v7061_v8 = vmul.f32 %v4383_v40, %v6842_v20 }
 0x198   :  { %v3387_v54 = vadd.f32 %v3196_v50, %v2903_v43  ;;  %v703_v9 = vadd.f32 %v514_v12, %v154_v61  ;;  %v999_v34 = vsel %vm941_vm1, %v997_v55, %v998_v26  ;;  %v1883_v38 = vmul.f32 %v4385_v41, %v6832_v2 }
 0x199   :  { %v2319_v30 = vadd.f32 %v2176_v42, %v1835_v45  ;;  %v1613_v13 = vrot.slane %v1399_v63, 1  ;;  %v1614_v16 = vrot.slane %v7061_v8, 1  ;;  %v7076_v50 = vmul.f32 %v4385_v41, %v6842_v20 }
 0x19a   :  { %4127 = vmatmul.mubr.f32.gmra.mrb[20].mxu0 %v3387_v54  ;;  %v1188_v59 = vadd.f32 %v999_v34, %v703_v9  ;;  %v2097_v15 = vrot.slane %v1883_v38, 2  ;;  %v2356_v60 = vmul.f32 %v4434_v0, %v7071_v32  ;;  %v2499_v57 = vmul.f32 %v4436_v1, %v7071_v32  ;;  %v7134_v38 = vld [vmem:[%s8394_s0 + $0x2e8] sm:$0xff] }
 0x19b   :  { %v2451_v33 = vadd.f32 %v2387_v7, %v2319_v30  ;;  %v1615_v53 = vsel %vm456_vm0, %v1613_v13, %v1614_v16  ;;  %v2098_v22 = vrot.slane %v7076_v50, 2  ;;  %v7093_v52 = vmul.f32 %v4436_v1, %v7081_v29 }
 0x19c   :  { %v1320_v51 = vadd.f32 %v1256_v31, %v1188_v59  ;;  %v2713_v42 = vrot.slane %v2499_v57, 1  ;;  %v2983_v21 = vmul.f32 %v6979_v25, %v7071_v32  ;;  %v7099_v61 = vmul.f32 %v6979_v25, %v7081_v29 }
 0x19d   :  { %v2935_v7 = vadd.f32 %v2792_v56, %v2451_v33  ;;  %v2099_v58 = vsel %vm941_vm1, %v2097_v15, %v2098_v22  ;;  %v2714_v17 = vrot.slane %v7093_v52, 1  ;;  %v186_v5 = vmul.f32 %v4374_v35, %v6661_v48 }
 0x19e   :  { %v1804_v3 = vadd.f32 %v1615_v53, %v1320_v51  ;;  %v3197_v62 = vrot.slane %v2983_v21, 2  ;;  %v3198_v11 = vrot.slane %v7099_v61, 2  ;;  %v345_v27 = vmul.f32 %v4376_v36, %v6661_v48  ;;  %v7155_v51 = vld [vmem:[%s8394_s0 + $0x2f0] sm:$0xff] }
 0x19f   :  { %v3419_v23 = vadd.f32 %v3276_v44, %v2935_v7  ;;  %v2715_v56 = vsel %vm456_vm0, %v2713_v42, %v2714_v17  ;;  %v7115_v43 = vmul.f32 %v4376_v36, %v6682_v6  ;;  %v830_v55 = vmul.f32 %v4378_v37, %v6661_v48 }
 0x1a0   :  { %v2288_v31 = vadd.f32 %v2099_v58, %v1804_v3  ;;  %v3199_v45 = vsel %vm941_vm1, %v3197_v62, %v3198_v11  ;;  %v592_v12 = vrot.slane %v345_v27, 1  ;;  %v7124_v44 = vmul.f32 %v4378_v37, %v6682_v6 }
 0x1a1   :  { %4175 = vmatmul.mubr.f32.gmra.mrb[20].mxu1 %v3419_v23  ;;  %v593_v63 = vrot.slane %v7115_v43, 1  ;;  %v1077_v54 = vrot.slane %v830_v55, 2  ;;  %v1288_v9 = vmul.f32 %v4381_v39, %v6895_v46  ;;  %v1447_v48 = vmul.f32 %v4383_v40, %v6895_v46 }
 0x1a2   :  { %v2420_v34 = vadd.f32 %v2356_v60, %v2288_v31  ;;  %v1078_v30 = vrot.slane %v7124_v44, 2  ;;  %v7139_v13 = vmul.f32 %v4383_v40, %v6916_v28  ;;  %v1931_v59 = vmul.f32 %v4385_v41, %v6895_v46 }
 0x1a3   :  { %v594_v15 = vsel %vm456_vm0, %v592_v12, %v593_v63  ;;  %v1693_v57 = vrot.slane %v1447_v48, 1  ;;  %v7148_v60 = vmul.f32 %v4385_v41, %v6916_v28  ;;  %v2388_v33 = vmul.f32 %v4434_v0, %v7134_v38 }
 0x1a4   :  { %v2904_v53 = vadd.f32 %v2715_v56, %v2420_v34  ;;  %v735_v42 = vadd.f32 %v594_v15, %v186_v5  ;;  %v1079_v21 = vsel %vm941_vm1, %v1077_v54, %v1078_v30  ;;  %v8440_v7 = vrot.slane %v7139_v13, 1 }
 0x1a5   :  { %v2177_v58 = vrot.slane %v1931_v59, 2  ;;  %v8439_v3 = vrot.slane %v7148_v60, 2  ;;  %v2547_v62 = vmul.f32 %v4436_v1, %v7134_v38  ;;  %v7166_v27 = vmul.f32 %v4436_v1, %v7155_v51 }
 0x1a6   :  { %v3388_v23 = vadd.f32 %v3199_v45, %v2904_v53  ;;  %v1220_v56 = vadd.f32 %v1079_v21, %v735_v42  ;;  %v1695_v5 = vsel %vm456_vm0, %v1693_v57, %v8440_v7  ;;  %v3031_v55 = vmul.f32 %v6979_v25, %v7134_v38 }
 0x1a7   :  { %v2179_v31 = vsel %vm941_vm1, %v2177_v58, %v8439_v3  ;;  %v2793_v12 = vrot.slane %v2547_v62, 1  ;;  %v8438_v54 = vrot.slane %v7166_v27, 1  ;;  %v7179_v48 = vmul.f32 %v6979_v25, %v7155_v51 }
 0x1a8   :  { %4129 = vmatprep.mubr.f32.mxu0 %v3388_v23  ;;  %v1352_v45 = vadd.f32 %v1288_v9, %v1220_v56  ;;  %v3277_v34 = vrot.slane %v3031_v55, 2  ;;  %v155_v59 = vmul.f32 %v4374_v35, %v6608_v18  ;;  %v299_v15 = vmul.f32 %v4376_v36, %v6723_v19  ;;  %v7196_v18 = vld [vmem:[%s8394_s0 + $0x148] sm:$0x3] }
 0x1a9   :  { %v2795_v57 = vsel %vm456_vm0, %v2793_v12, %v8438_v54  ;;  %v8441_v53 = vrot.slane %v7179_v48, 2  ;;  %v784_v42 = vmul.f32 %v4378_v37, %v6723_v19  ;;  %v1257_v21 = vmul.f32 %v4381_v39, %v6842_v20 }
 0x1aa   :  { %v1836_v9 = vadd.f32 %v1695_v5, %v1352_v45  ;;  %v515_v58 = vrot.slane %v299_v15, 1  ;;  %v1401_v62 = vmul.f32 %v4383_v40, %v6957_v4  ;;  %v1885_v23 = vmul.f32 %v4385_v41, %v6957_v4 }
 0x1ab   :  { %v3279_v19 = vsel %vm941_vm1, %v3277_v34, %v8441_v53  ;;  %v1000_v56 = vrot.slane %v784_v42, 2  ;;  %v2357_v5 = vmul.f32 %v4434_v0, %v7081_v29  ;;  %v2501_v55 = vmul.f32 %v4436_v1, %v7196_v18 }
 0x1ac   :  { %v2320_v12 = vadd.f32 %v2179_v31, %v1836_v9  ;;  %v516_v45 = vsel %vm456_vm0, %v513_v47, %v515_v58  ;;  %v1616_v15 = vrot.slane %v1401_v62, 1  ;;  %v2100_v54 = vrot.slane %v1885_v23, 2 }
 0x1ad   :  { %v704_v3 = vadd.f32 %v516_v45, %v155_v59  ;;  %v1001_v7 = vsel %vm941_vm1, %v998_v26, %v1000_v56  ;;  %v2716_v34 = vrot.slane %v2501_v55, 1  ;;  %v2985_v42 = vmul.f32 %v6979_v25, %v7196_v18 }
 0x1ae   :  { %v2452_v53 = vadd.f32 %v2388_v33, %v2320_v12  ;;  %v1617_v31 = vsel %vm456_vm0, %v1614_v16, %v1616_v15  ;;  %v2101_v24 = vsel %vm941_vm1, %v2098_v22, %v2100_v54  ;;  %v187_v47 = vmul.f32 %v4374_v35, %v6682_v6 }
 0x1af   :  { %v1189_v59 = vadd.f32 %v1001_v7, %v704_v3  ;;  %v2717_v14 = vsel %vm456_vm0, %v2714_v17, %v2716_v34  ;;  %v3200_v26 = vrot.slane %v2985_v42, 2  ;;  %v347_v33 = vmul.f32 %v4376_v36, %v6771_v49 }
 0x1b0   :  { %v2936_v9 = vadd.f32 %v2795_v57, %v2452_v53  ;;  %v832_v8 = vmul.f32 %v4378_v37, %v6771_v49  ;;  %v1289_v16 = vmul.f32 %v4381_v39, %v6916_v28  ;;  %v1449_v50 = vmul.f32 %v4383_v40, %v7010_v10  ;;  %v7244_v49 = vld [vmem:[%s8394_s0 + $0x2f8] sm:$0x3] }
 0x1b1   :  { %v1321_v6 = vadd.f32 %v1257_v21, %v1189_v59  ;;  %v3201_v22 = vsel %vm941_vm1, %v3198_v11, %v3200_v26  ;;  %v595_v52 = vrot.slane %v347_v33, 1  ;;  %v1933_v17 = vmul.f32 %v4385_v41, %v7010_v10 }
 0x1b2   :  { %v3420_v7 = vadd.f32 %v3279_v19, %v2936_v9  ;;  %v1080_v3 = vrot.slane %v832_v8, 2  ;;  %v1696_v54 = vrot.slane %v1449_v50, 1  ;;  %v2389_v57 = vmul.f32 %v4434_v0, %v7155_v51 }
 0x1b3   :  { %v1805_v53 = vadd.f32 %v1617_v31, %v1321_v6  ;;  %v596_v61 = vsel %vm456_vm0, %v593_v63, %v595_v52  ;;  %v2180_v11 = vrot.slane %v1933_v17, 2  ;;  %v2549_v21 = vmul.f32 %v4436_v1, %v7244_v49 }
 0x1b4   :  { %4177 = vmatprep.mubr.f32.mxu1 %v3420_v7  ;;  %v736_v58 = vadd.f32 %v596_v61, %v187_v47  ;;  %v1081_v62 = vsel %vm941_vm1, %v1078_v30, %v1080_v3  ;;  %v8515_v23 = vrot.slane %v7139_v13, 1  ;;  %v3033_v56 = vmul.f32 %v6979_v25, %v7244_v49 }
 0x1b5   :  { %v2289_v43 = vadd.f32 %v2101_v24, %v1805_v53  ;;  %v8516_v63 = vrot.slane %v7148_v60, 2  ;;  %v2796_v12 = vrot.slane %v2549_v21, 1  ;;  %v156_v45 = vmul.f32 %v4374_v35, %v6832_v2 }
 0x1b6   :  { %v1697_v19 = vsel %vm456_vm0, %v8515_v23, %v1696_v54  ;;  %v1221_v15 = vadd.f32 %v1081_v62, %v736_v58  ;;  %v3280_v44 = vrot.slane %v3033_v56, 2  ;;  %v300_v30 = vmul.f32 %v4376_v36, %v6832_v2  ;;  %v7305_v54 = vld [vmem:[%s8394_s0 + $0x150] sm:$0xff] }
 0x1b7   :  { %v2181_v55 = vsel %vm941_vm1, %v8516_v63, %v2180_v11  ;;  %v7270_v13 = vmul.f32 %v4376_v36, %v6842_v20  ;;  %v2421_v34 = vadd.f32 %v2357_v5, %v2289_v43  ;;  %v8517_v42 = vrot.slane %v7166_v27, 1  ;;  %v7315_v11 = vld [vmem:[%s8394_s0 + $0x158] sm:$0xff] }
 0x1b8   :  { %v785_v31 = vmul.f32 %v4378_v37, %v6832_v2  ;;  %v7279_v24 = vmul.f32 %v4378_v37, %v6842_v20  ;;  %v1353_v47 = vadd.f32 %v1289_v16, %v1221_v15  ;;  %v8518_v59 = vrot.slane %v7179_v48, 2 }
 0x1b9   :  { %v2797_v60 = vsel %vm456_vm0, %v8517_v42, %v2796_v12  ;;  %v517_v33 = vrot.slane %v300_v30, 1  ;;  %v518_v9 = vrot.slane %v7270_v13, 1  ;;  %v2905_v5 = vadd.f32 %v2717_v14, %v2421_v34 }
 0x1ba   :  { %v3281_v26 = vsel %vm941_vm1, %v8518_v59, %v3280_v44  ;;  %v1002_v8 = vrot.slane %v785_v31, 2  ;;  %v1003_v27 = vrot.slane %v7279_v24, 2  ;;  %v1258_v50 = vmul.f32 %v4381_v39, %v7071_v32 }
 0x1bb   :  { %v1837_v2 = vadd.f32 %v1697_v19, %v1353_v47  ;;  %v519_v6 = vsel %vm456_vm0, %v517_v33, %v518_v9  ;;  %v1402_v48 = vmul.f32 %v4383_v40, %v7071_v32  ;;  %v7295_v16 = vmul.f32 %v4383_v40, %v7081_v29 }
 0x1bc   :  { %v3389_v52 = vadd.f32 %v3201_v22, %v2905_v5  ;;  %v705_v14 = vadd.f32 %v519_v6, %v156_v45  ;;  %v1004_v17 = vsel %vm941_vm1, %v1002_v8, %v1003_v27  ;;  %v1886_v7 = vmul.f32 %v4385_v41, %v7071_v32 }
 0x1bd   :  { %v2321_v3 = vadd.f32 %v2181_v55, %v1837_v2  ;;  %v1618_v53 = vrot.slane %v1402_v48, 1  ;;  %v1619_v61 = vrot.slane %v7295_v16, 1  ;;  %v7310_v22 = vmul.f32 %v4385_v41, %v7081_v29 }
 0x1be   :  { %4130 = vmatmul.mubr.f32.gmra.mrb[22].mxu0 %v3389_v52  ;;  %v1190_v21 = vadd.f32 %v1004_v17, %v705_v14  ;;  %v2102_v58 = vrot.slane %v1886_v7, 2  ;;  %v2358_v62 = vmul.f32 %v4434_v0, %v7305_v54  ;;  %v2502_v23 = vmul.f32 %v4436_v1, %v7305_v54  ;;  %v7368_v7 = vld [vmem:[%s8394_s0 + $0x300] sm:$0xff] }
 0x1bf   :  { %v2453_v19 = vadd.f32 %v2389_v57, %v2321_v3  ;;  %v1620_v56 = vsel %vm456_vm0, %v1618_v53, %v1619_v61  ;;  %v2103_v43 = vrot.slane %v7310_v22, 2  ;;  %v7327_v63 = vmul.f32 %v4436_v1, %v7315_v11 }
 0x1c0   :  { %v1322_v55 = vadd.f32 %v1258_v50, %v1190_v21  ;;  %v2718_v12 = vrot.slane %v2502_v23, 1  ;;  %v2986_v45 = vmul.f32 %v6979_v25, %v7305_v54  ;;  %v7333_v15 = vmul.f32 %v6979_v25, %v7315_v11 }
 0x1c1   :  { %v2937_v57 = vadd.f32 %v2797_v60, %v2453_v19  ;;  %v2104_v44 = vsel %vm941_vm1, %v2102_v58, %v2103_v43  ;;  %v2719_v30 = vrot.slane %v7327_v63, 1  ;;  %v188_v34 = vmul.f32 %v4374_v35, %v6895_v46 }
 0x1c2   :  { %v1806_v42 = vadd.f32 %v1620_v56, %v1322_v55  ;;  %v3202_v31 = vrot.slane %v2986_v45, 2  ;;  %v3203_v47 = vrot.slane %v7333_v15, 2  ;;  %v348_v59 = vmul.f32 %v4376_v36, %v6895_v46  ;;  %v7389_v55 = vld [vmem:[%s8394_s0 + $0x308] sm:$0xff] }
 0x1c3   :  { %v3421_v33 = vadd.f32 %v3281_v26, %v2937_v57  ;;  %v2720_v60 = vsel %vm456_vm0, %v2718_v12, %v2719_v30  ;;  %v7349_v5 = vmul.f32 %v4376_v36, %v6916_v28  ;;  %v833_v8 = vmul.f32 %v4378_v37, %v6895_v46 }
 0x1c4   :  { %v2290_v50 = vadd.f32 %v2104_v44, %v1806_v42  ;;  %v3204_v2 = vsel %vm941_vm1, %v3202_v31, %v3203_v47  ;;  %v597_v6 = vrot.slane %v348_v59, 1  ;;  %v7358_v26 = vmul.f32 %v4378_v37, %v6916_v28 }
 0x1c5   :  { %4178 = vmatmul.mubr.f32.gmra.mrb[22].mxu1 %v3421_v33  ;;  %v598_v48 = vrot.slane %v7349_v5, 1  ;;  %v1082_v52 = vrot.slane %v833_v8, 2  ;;  %v1290_v14 = vmul.f32 %v4381_v39, %v7134_v38  ;;  %v1450_v46 = vmul.f32 %v4383_v40, %v7134_v38 }
 0x1c6   :  { %v2422_v17 = vadd.f32 %v2358_v62, %v2290_v50  ;;  %v8446_v3 = vrot.slane %v7358_v26, 2  ;;  %v7373_v53 = vmul.f32 %v4383_v40, %v7155_v51  ;;  %v1934_v21 = vmul.f32 %v4385_v41, %v7134_v38 }
 0x1c7   :  { %v599_v58 = vsel %vm456_vm0, %v597_v6, %v598_v48  ;;  %v1698_v23 = vrot.slane %v1450_v46, 1  ;;  %v7382_v62 = vmul.f32 %v4385_v41, %v7155_v51  ;;  %v2390_v19 = vmul.f32 %v4434_v0, %v7368_v7 }
 0x1c8   :  { %v2906_v56 = vadd.f32 %v2720_v60, %v2422_v17  ;;  %v737_v12 = vadd.f32 %v599_v58, %v188_v34  ;;  %v1084_v45 = vsel %vm941_vm1, %v1082_v52, %v8446_v3  ;;  %v8445_v57 = vrot.slane %v7373_v53, 1  ;;  %v7455_v3 = vpop.f32.mrb[0].mxu1 }
 0x1c9   :  { %v2182_v44 = vrot.slane %v1934_v21, 2  ;;  %v8443_v42 = vrot.slane %v7382_v62, 2  ;;  %v2550_v31 = vmul.f32 %v4436_v1, %v7368_v7  ;;  %v7400_v59 = vmul.f32 %v4436_v1, %v7389_v55 }
 0x1ca   :  { %v3390_v33 = vadd.f32 %v3204_v2, %v2906_v56  ;;  %v1222_v60 = vadd.f32 %v1084_v45, %v737_v12  ;;  %v1700_v34 = vsel %vm456_vm0, %v1698_v23, %v8445_v57  ;;  %v3034_v8 = vmul.f32 %v6979_v25, %v7368_v7  ;;  %v7453_v57 = vpop.f32.mrb[0].mxu0 }
 0x1cb   :  { %v2184_v50 = vsel %vm941_vm1, %v2182_v44, %v8443_v42  ;;  %v2798_v6 = vrot.slane %v2550_v31, 1  ;;  %v8442_v52 = vrot.slane %v7400_v59, 1  ;;  %v7413_v46 = vmul.f32 %v6979_v25, %v7389_v55 }
 0x1cc   :  { %4132 = vmatprep.mubr.f32.mxu0 %v3390_v33  ;;  %v1354_v2 = vadd.f32 %v1290_v14, %v1222_v60  ;;  %v3282_v17 = vrot.slane %v3034_v8, 2  ;;  %v157_v21 = vmul.f32 %v4374_v35, %v6842_v20  ;;  %v302_v58 = vmul.f32 %v4376_v36, %v6957_v4  ;;  %v7430_v20 = vld [vmem:[%s8394_s0 + $0x160] sm:$0x3] }
 0x1cd   :  { %v2800_v23 = vsel %vm456_vm0, %v2798_v6, %v8442_v52  ;;  %v8444_v56 = vrot.slane %v7413_v46, 2  ;;  %v787_v12 = vmul.f32 %v4378_v37, %v6957_v4  ;;  %v1259_v45 = vmul.f32 %v4381_v39, %v7081_v29 }
 0x1ce   :  { %v1838_v14 = vadd.f32 %v1700_v34, %v1354_v2  ;;  %v520_v44 = vrot.slane %v302_v58, 1  ;;  %v1404_v31 = vmul.f32 %v4383_v40, %v7196_v18  ;;  %v1888_v33 = vmul.f32 %v4385_v41, %v7196_v18 }
 0x1cf   :  { %v3284_v4 = vsel %vm941_vm1, %v3282_v17, %v8444_v56  ;;  %v1005_v60 = vrot.slane %v787_v12, 2  ;;  %v7441_v34 = vmul.f32 %v4434_v0, %v7315_v11  ;;  %v2504_v8 = vmul.f32 %v4436_v1, %v7430_v20 }
 0x1d0   :  { %v2322_v6 = vadd.f32 %v2184_v50, %v1838_v14  ;;  %v521_v2 = vsel %vm456_vm0, %v518_v9, %v520_v44  ;;  %v1621_v58 = vrot.slane %v1404_v31, 1  ;;  %v2105_v52 = vrot.slane %v1888_v33, 2 }
 0x1d1   :  { %v706_v42 = vadd.f32 %v521_v2, %v157_v21  ;;  %v1006_v17 = vsel %vm941_vm1, %v1003_v27, %v1005_v60  ;;  %v2721_v12 = vrot.slane %v2504_v8, 1  ;;  %v2988_v56 = vmul.f32 %v6979_v25, %v7430_v20  ;;  %v7465_v27 = vpop.f32.mrb[1].mxu0  ;;  %v7467_v21 = vpop.f32.mrb[1].mxu1 }
 0x1d2   :  { %v2454_v50 = vadd.f32 %v2390_v19, %v2322_v6  ;;  %v1622_v13 = vsel %vm456_vm0, %v1619_v61, %v1621_v58  ;;  %v2106_v9 = vsel %vm941_vm1, %v2103_v43, %v2105_v52  ;;  %v189_v24 = vmul.f32 %v4374_v35, %v6916_v28  ;;  %v7474_v61 = vpop.f32.mrb[2].mxu0  ;;  %v7476_v22 = vpop.f32.mrb[2].mxu1  ;;  %v7500_v6 = vld [vmem:[%s8394_s0 + $0x310] sm:$0x3] }
 0x1d3   :  { %v1191_v14 = vadd.f32 %v1006_v17, %v706_v42  ;;  %v2722_v19 = vsel %vm456_vm0, %v2719_v30, %v2721_v12  ;;  %v3205_v44 = vrot.slane %v2988_v56, 2  ;;  %v350_v16 = vmul.f32 %v4376_v36, %v7010_v10  ;;  %8519 = vst [vmem:[#allocation5_spill] sm:$0xff] %v7476_v22  ;;  %v7484_v42 = vpop.f32.mrb[3].mxu0  ;;  %v7486_v30 = vpop.f32.mrb[3].mxu1 }
 0x1d4   :  { %v2938_v43 = vadd.f32 %v2800_v23, %v2454_v50  ;;  %v835_v28 = vmul.f32 %v4378_v37, %v7010_v10  ;;  %v1291_v52 = vmul.f32 %v4381_v39, %v7155_v51  ;;  %v1452_v63 = vmul.f32 %v4383_v40, %v7244_v49  ;;  %8520 = vst [vmem:[#allocation6_spill] sm:$0xff] %v7484_v42  ;;  %v7493_v10 = vpop.f32.mrb[4].mxu0  ;;  %v7495_v60 = vpop.f32.mrb[4].mxu1 }
 0x1d5   :  { %8521 = vst [vmem:[#allocation7_spill] sm:$0xff] %v7486_v30  ;;  %v1323_v56 = vadd.f32 %v1259_v45, %v1191_v14  ;;  %v3206_v31 = vsel %vm941_vm1, %v3203_v47, %v3205_v44  ;;  %v600_v33 = vrot.slane %v350_v16, 1  ;;  %v1936_v23 = vmul.f32 %v4385_v41, %v7244_v49  ;;  %8522 = vst [vmem:[#allocation8_spill] sm:$0xff] %v7493_v10  ;;  %v7506_v47 = vpop.f32.mrb[5].mxu0  ;;  %v7508_v58 = vpop.f32.mrb[5].mxu1 }
 0x1d6   :  { %8523 = vst [vmem:[#allocation9_spill] sm:$0xff] %v7495_v60  ;;  %v3422_v8 = vadd.f32 %v3284_v4, %v2938_v43  ;;  %v1085_v2 = vrot.slane %v835_v28, 2  ;;  %v1701_v45 = vrot.slane %v1452_v63, 1  ;;  %v7504_v15 = vmul.f32 %v4434_v0, %v7389_v55  ;;  %8524 = vst [vmem:[#allocation10_spill] sm:$0xff] %v7506_v47  ;;  %v7515_v14 = vpop.f32.mrb[6].mxu0  ;;  %v7517_v44 = vpop.f32.mrb[6].mxu1 }
 0x1d7   :  { %8525 = vst [vmem:[#allocation11_spill] sm:$0xff] %v7508_v58  ;;  %v1807_v17 = vadd.f32 %v1622_v13, %v1323_v56  ;;  %v601_v4 = vsel %vm456_vm0, %v598_v48, %v600_v33  ;;  %v2185_v12 = vrot.slane %v1936_v23, 2  ;;  %v2552_v50 = vmul.f32 %v4436_v1, %v7500_v6  ;;  %8526 = vst [vmem:[#allocation12_spill] sm:$0xff] %v7515_v14  ;;  %v7527_v63 = vpop.f32.mrb[7].mxu0  ;;  %v7529_v56 = vpop.f32.mrb[7].mxu1 }
 0x1d8   :  { %8527 = vst [vmem:[#allocation13_spill] sm:$0xff] %v7517_v44  ;;  %4180 = vmatprep.mubr.f32.mxu1 %v3422_v8  ;;  %v738_v16 = vadd.f32 %v601_v4, %v189_v24  ;;  %v8528_v43 = vrot.slane %v7358_v26, 2  ;;  %v8529_v13 = vrot.slane %v7373_v53, 1  ;;  %v3036_v48 = vmul.f32 %v6979_v25, %v7500_v6  ;;  %8530 = vst [vmem:[#allocation14_spill] sm:$0xff] %v7527_v63  ;;  %v7538_v53 = vpop.f32.mrb[8].mxu1 }
 0x1d9   :  { %8531 = vst [vmem:[#allocation15_spill] sm:$0xff] %v7529_v56  ;;  %v2291_v33 = vadd.f32 %v2106_v9, %v1807_v17  ;;  %v8532_v23 = vrot.slane %v7382_v62, 2  ;;  %v2801_v8 = vrot.slane %v2552_v50, 1  ;;  %v158_v26 = vmul.f32 %v4374_v35, %v7071_v32  ;;  %8534 = vst [vmem:[#allocation17_spill] sm:$0xff] %v7538_v53  ;;  %v7548_v17 = vpop.f32.mrb[9].mxu1  ;;  %v7685_v56 = vld [vmem:[%s8394_s0 + $0x320] sm:$0xff] }
 0x1da   :  { %v1086_v28 = vsel %vm941_vm1, %v8528_v43, %v1085_v2  ;;  %v1702_v5 = vsel %vm456_vm0, %v8529_v13, %v1701_v45  ;;  %v7536_v2 = vpop.f32.mrb[8].mxu0  ;;  %v3285_v4 = vrot.slane %v3036_v48, 2  ;;  %v303_v43 = vmul.f32 %v4376_v36, %v7071_v32  ;;  %8536 = vst [vmem:[#allocation19_spill] sm:$0xff] %v7548_v17 }
 0x1db   :  { %v2186_v24 = vsel %vm941_vm1, %v8532_v23, %v2185_v12  ;;  %8533 = vst [vmem:[#allocation16_spill] sm:$0xff] %v7536_v2  ;;  %v1223_v45 = vadd.f32 %v1086_v28, %v738_v16  ;;  %v7544_v9 = vmul.f32 %v4376_v36, %v7081_v29  ;;  %v7546_v62 = vpop.f32.mrb[9].mxu0  ;;  %v2423_v12 = vadd.f32 %v7441_v34, %v2291_v33  ;;  %v7562_v23 = vpop.f32.mrb[10].mxu1 }
 0x1dc   :  { %8535 = vst [vmem:[#allocation18_spill] sm:$0xff] %v7546_v62  ;;  %v8537_v50 = vrot.slane %v7400_v59, 1  ;;  %v788_v16 = vmul.f32 %v4378_v37, %v7071_v32  ;;  %v7558_v28 = vmul.f32 %v4378_v37, %v7081_v29  ;;  %v7560_v48 = vpop.f32.mrb[10].mxu0  ;;  %8539 = vst [vmem:[#allocation21_spill] sm:$0xff] %v7562_v23  ;;  %v8540_v17 = vrot.slane %v7413_v46, 2 }
 0x1dd   :  { %8538 = vst [vmem:[#allocation20_spill] sm:$0xff] %v7560_v48  ;;  %v1355_v62 = vadd.f32 %v1291_v52, %v1223_v45  ;;  %v522_v33 = vrot.slane %v303_v43, 1  ;;  %v8449_v59 = vrot.slane %v7544_v9, 1  ;;  %v2907_v32 = vadd.f32 %v2722_v19, %v2423_v12 }
 0x1de   :  { %v2802_v13 = vsel %vm456_vm0, %v8537_v50, %v2801_v8  ;;  %v3286_v34 = vsel %vm941_vm1, %v8540_v17, %v3285_v4  ;;  %v7568_v8 = vpop.f32.mrb[11].mxu0  ;;  %v7570_v50 = vpop.f32.mrb[11].mxu1  ;;  %v1007_v53 = vrot.slane %v788_v16, 2  ;;  %v8447_v2 = vrot.slane %v7558_v28, 2  ;;  %v7592_v17 = vld [vmem:[%s8394_s0 + $0x168] sm:$0xff] }
 0x1df   :  { %8541 = vst [vmem:[#allocation22_spill] sm:$0xff] %v7568_v8  ;;  %8542 = vst [vmem:[#allocation23_spill] sm:$0xff] %v7570_v50  ;;  %v1260_v48 = vmul.f32 %v4381_v39, %v7305_v54  ;;  %v1839_v23 = vadd.f32 %v1702_v5, %v1355_v62  ;;  %v524_v46 = vsel %vm456_vm0, %v522_v33, %v8449_v59  ;;  %v8549_v30 = vrot.slane %v7558_v28, 2 }
 0x1e0   :  { %v1405_v52 = vmul.f32 %v4383_v40, %v7305_v54  ;;  %v7582_v45 = vmul.f32 %v4383_v40, %v7315_v11  ;;  %v3391_v4 = vadd.f32 %v3206_v31, %v2907_v32  ;;  %v707_v19 = vadd.f32 %v524_v46, %v158_v26  ;;  %v7602_v26 = vld [vmem:[%s8394_s0 + $0x170] sm:$0xff] }
 0x1e1   :  { %v1009_v43 = vsel %vm941_vm1, %v1007_v53, %v8447_v2  ;;  %v1889_v5 = vmul.f32 %v4385_v41, %v7305_v54  ;;  %v2323_v62 = vadd.f32 %v2186_v24, %v1839_v23  ;;  %v7597_v31 = vmul.f32 %v4385_v41, %v7315_v11 }
 0x1e2   :  { %v1623_v12 = vrot.slane %v1405_v52, 1  ;;  %v8448_v16 = vrot.slane %v7582_v45, 1  ;;  %4133 = vmatmul.mubr.f32.gmra.mrb[24].mxu0 %v3391_v4  ;;  %v1192_v53 = vadd.f32 %v1009_v43, %v707_v19  ;;  %v2360_v23 = vmul.f32 %v4434_v0, %v7592_v17  ;;  %v7617_v19 = vpop.f32.mrb[12].mxu0 }
 0x1e3   :  { %v2107_v24 = vrot.slane %v1889_v5, 2  ;;  %v2505_v33 = vmul.f32 %v4436_v1, %v7592_v17  ;;  %v2455_v32 = vadd.f32 %v7504_v15, %v2323_v62  ;;  %v8450_v52 = vrot.slane %v7597_v31, 2  ;;  %8543 = vst [vmem:[#allocation24_spill] sm:$0xff] %v7617_v19  ;;  %v7625_v62 = vpop.f32.mrb[13].mxu0 }
 0x1e4   :  { %v1625_v46 = vsel %vm456_vm0, %v1623_v12, %v8448_v16  ;;  %v7615_v4 = vmul.f32 %v4436_v1, %v7602_v26  ;;  %v1324_v43 = vadd.f32 %v1260_v48, %v1192_v53  ;;  %v2989_v2 = vmul.f32 %v6979_v25, %v7592_v17  ;;  %8544 = vst [vmem:[#allocation25_spill] sm:$0xff] %v7625_v62 }
 0x1e5   :  { %v2723_v5 = vrot.slane %v2505_v33, 1  ;;  %v7623_v15 = vmul.f32 %v6979_v25, %v7602_v26  ;;  %v2939_v12 = vadd.f32 %v2802_v13, %v2455_v32  ;;  %v2109_v16 = vsel %vm941_vm1, %v2107_v24, %v8450_v52 }
 0x1e6   :  { %v8452_v59 = vrot.slane %v7615_v4, 1  ;;  %v190_v48 = vmul.f32 %v4374_v35, %v7134_v38  ;;  %v1808_v53 = vadd.f32 %v1625_v46, %v1324_v43  ;;  %v3207_v33 = vrot.slane %v2989_v2, 2 }
 0x1e7   :  { %v8451_v19 = vrot.slane %v7623_v15, 2  ;;  %v351_v50 = vmul.f32 %v4376_v36, %v7134_v38  ;;  %v3423_v8 = vadd.f32 %v3286_v34, %v2939_v12  ;;  %v7641_v24 = vmul.f32 %v4376_v36, %v7155_v51 }
 0x1e8   :  { %v2725_v13 = vsel %vm456_vm0, %v2723_v5, %v8452_v59  ;;  %v836_v32 = vmul.f32 %v4378_v37, %v7134_v38  ;;  %v2292_v52 = vadd.f32 %v2109_v16, %v1808_v53  ;;  %v7650_v34 = vmul.f32 %v4378_v37, %v7155_v51  ;;  %v7660_v53 = vld [vmem:[%s8394_s0 + $0x318] sm:$0xff] }
 0x1e9   :  { %v3209_v2 = vsel %vm941_vm1, %v3207_v33, %v8451_v19  ;;  %v602_v46 = vrot.slane %v351_v50, 1  ;;  %4181 = vmatmul.mubr.f32.gmra.mrb[24].mxu1 %v3423_v8  ;;  %v8453_v43 = vrot.slane %v7641_v24, 1  ;;  %v1292_v12 = vmul.f32 %v4381_v39, %v7368_v7 }
 0x1ea   :  { %v1087_v5 = vrot.slane %v836_v32, 2  ;;  %v1453_v38 = vmul.f32 %v4383_v40, %v7368_v7  ;;  %v2424_v16 = vadd.f32 %v2360_v23, %v2292_v52  ;;  %v7665_v8 = vmul.f32 %v4383_v40, %v7389_v55  ;;  %v7669_v32 = vpop.f32.mrb[12].mxu1 }
 0x1eb   :  { %v1937_v33 = vmul.f32 %v4385_v41, %v7368_v7  ;;  %8545 = vst [vmem:[#allocation26_spill] sm:$0xff] %v7669_v32  ;;  %v604_v23 = vsel %vm456_vm0, %v602_v46, %v8453_v43  ;;  %v7676_v19 = vmul.f32 %v4385_v41, %v7389_v55  ;;  %v2392_v59 = vmul.f32 %v4434_v0, %v7660_v53  ;;  %v7680_v50 = vpop.f32.mrb[13].mxu1 }
 0x1ec   :  { %v1703_v52 = vrot.slane %v1453_v38, 1  ;;  %8546 = vst [vmem:[#allocation27_spill] sm:$0xff] %v7680_v50  ;;  %v2908_v62 = vadd.f32 %v2725_v13, %v2424_v16  ;;  %v739_v32 = vadd.f32 %v604_v23, %v190_v48  ;;  %v8547_v63 = vrot.slane %v7650_v34, 2 }
 0x1ed   :  { %v8456_v38 = vrot.slane %v7665_v8, 1  ;;  %v2187_v43 = vrot.slane %v1937_v33, 2  ;;  %v8455_v44 = vrot.slane %v7676_v19, 2  ;;  %v2553_v14 = vmul.f32 %v4436_v1, %v7660_v53 }
 0x1ee   :  { %v1089_v46 = vsel %vm941_vm1, %v1087_v5, %v8547_v63  ;;  %v7696_v13 = vmul.f32 %v4436_v1, %v7685_v56  ;;  %v3392_v16 = vadd.f32 %v3209_v2, %v2908_v62  ;;  %v3037_v63 = vmul.f32 %v6979_v25, %v7660_v53 }
 0x1ef   :  { %v1224_v50 = vadd.f32 %v1089_v46, %v739_v32  ;;  %v1705_v48 = vsel %vm456_vm0, %v1703_v52, %v8456_v38  ;;  %v2189_v5 = vsel %vm941_vm1, %v2187_v43, %v8455_v44  ;;  %v2803_v33 = vrot.slane %v2553_v14, 1 }
 0x1f0   :  { %v8454_v23 = vrot.slane %v7696_v13, 1  ;;  %v7709_v58 = vmul.f32 %v6979_v25, %v7685_v56  ;;  %4135 = vmatprep.mubr.f32.mxu0 %v3392_v16  ;;  %v3287_v2 = vrot.slane %v3037_v63, 2  ;;  %v159_v32 = vmul.f32 %v4374_v35, %v7081_v29  ;;  %v7726_v29 = vld [vmem:[%s8394_s0 + $0x178] sm:$0x3] }
 0x1f1   :  { %v1356_v62 = vadd.f32 %v1292_v12, %v1224_v50  ;;  %v305_v52 = vmul.f32 %v4376_v36, %v7196_v18  ;;  %v790_v46 = vmul.f32 %v4378_v37, %v7196_v18  ;;  %v1261_v16 = vmul.f32 %v4381_v39, %v7315_v11 }
 0x1f2   :  { %v2805_v43 = vsel %vm456_vm0, %v2803_v33, %v8454_v23  ;;  %v8457_v14 = vrot.slane %v7709_v58, 2  ;;  %v1407_v63 = vmul.f32 %v4383_v40, %v7430_v20  ;;  %v1891_v33 = vmul.f32 %v4385_v41, %v7430_v20 }
 0x1f3   :  { %v1840_v12 = vadd.f32 %v1705_v48, %v1356_v62  ;;  %v525_v50 = vrot.slane %v305_v52, 1  ;;  %v1010_v23 = vrot.slane %v790_v46, 2  ;;  %v2361_v48 = vmul.f32 %v4434_v0, %v7602_v26 }
 0x1f4   :  { %v3289_v18 = vsel %vm941_vm1, %v3287_v2, %v8457_v14  ;;  %v2507_v62 = vmul.f32 %v4436_v1, %v7726_v29  ;;  %v8548_v52 = vrot.slane %v7544_v9, 1  ;;  %v1626_v47 = vrot.slane %v1407_v63, 1 }
 0x1f5   :  { %v2324_v44 = vadd.f32 %v2189_v5, %v1840_v12  ;;  %v2110_v60 = vrot.slane %v1891_v33, 2  ;;  %v1011_v42 = vsel %vm941_vm1, %v8549_v30, %v1010_v23  ;;  %v2991_v46 = vmul.f32 %v6979_v25, %v7726_v29 }
 0x1f6   :  { %v526_v38 = vsel %vm456_vm0, %v8548_v52, %v525_v50  ;;  %v2726_v2 = vrot.slane %v2507_v62, 1  ;;  %v8550_v22 = vrot.slane %v7582_v45, 1  ;;  %v8551_v9 = vrot.slane %v7597_v31, 2 }
 0x1f7   :  { %v708_v10 = vadd.f32 %v526_v38, %v159_v32  ;;  %v2456_v14 = vadd.f32 %v2392_v59, %v2324_v44  ;;  %v191_v38 = vmul.f32 %v4374_v35, %v7155_v51  ;;  %v8552_v28 = vrot.slane %v7615_v4, 1 }
 0x1f8   :  { %v1627_v5 = vsel %vm456_vm0, %v8550_v22, %v1626_v47  ;;  %v2111_v12 = vsel %vm941_vm1, %v8551_v9, %v2110_v60  ;;  %v3210_v23 = vrot.slane %v2991_v46, 2  ;;  %v353_v44 = vmul.f32 %v4376_v36, %v7244_v49 }
 0x1f9   :  { %v1193_v32 = vadd.f32 %v1011_v42, %v708_v10  ;;  %v2727_v30 = vsel %vm456_vm0, %v8552_v28, %v2726_v2  ;;  %v2940_v59 = vadd.f32 %v2805_v43, %v2456_v14  ;;  %v838_v22 = vmul.f32 %v4378_v37, %v7244_v49  ;;  %v7774_v49 = vld [vmem:[%s8394_s0 + $0x328] sm:$0x3] }
 0x1fa   :  { %v1293_v47 = vmul.f32 %v4381_v39, %v7389_v55  ;;  %v1455_v60 = vmul.f32 %v4383_v40, %v7500_v6  ;;  %v8553_v42 = vrot.slane %v7623_v15, 2  ;;  %v605_v45 = vrot.slane %v353_v44, 1 }
 0x1fb   :  { %v1325_v51 = vadd.f32 %v1261_v16, %v1193_v32  ;;  %v1939_v31 = vmul.f32 %v4385_v41, %v7500_v6  ;;  %v3424_v4 = vadd.f32 %v3289_v18, %v2940_v59  ;;  %v1090_v43 = vrot.slane %v838_v22, 2 }
 0x1fc   :  { %v3211_v10 = vsel %vm941_vm1, %v8553_v42, %v3210_v23  ;;  %v1706_v14 = vrot.slane %v1455_v60, 1  ;;  %v2393_v50 = vmul.f32 %v4434_v0, %v7685_v56  ;;  %v8554_v15 = vrot.slane %v7641_v24, 1 }
 0x1fd   :  { %v1809_v16 = vadd.f32 %v1627_v5, %v1325_v51  ;;  %v2190_v33 = vrot.slane %v1939_v31, 2  ;;  %v2555_v62 = vmul.f32 %v4436_v1, %v7774_v49  ;;  %4183 = vmatprep.mubr.f32.mxu1 %v3424_v4  ;;  %v8555_v52 = vrot.slane %v7650_v34, 2 }
 0x1fe   :  { %v606_v63 = vsel %vm456_vm0, %v8554_v15, %v605_v45  ;;  %v8556_v46 = vrot.slane %v7665_v8, 1  ;;  %v3039_v5 = vmul.f32 %v6979_v25, %v7774_v49  ;;  %v8557_v32 = vrot.slane %v7676_v19, 2 }
 0x1ff   :  { %v740_v18 = vadd.f32 %v606_v63, %v191_v38  ;;  %v1091_v2 = vsel %vm941_vm1, %v8555_v52, %v1090_v43  ;;  %v2293_v24 = vadd.f32 %v2111_v12, %v1809_v16  ;;  %v2806_v23 = vrot.slane %v2555_v62, 1 }
 0x200   :  { %v1707_v9 = vsel %vm456_vm0, %v8556_v46, %v1706_v14  ;;  %v2191_v28 = vsel %vm941_vm1, %v8557_v32, %v2190_v33  ;;  %v160_v38 = vmul.f32 %v4374_v35, %v7305_v54  ;;  %v3290_v34 = vrot.slane %v3039_v5, 2  ;;  %v7845_v46 = vld [vmem:[%s8394_s0 + $0x188] sm:$0xff] }
 0x201   :  { %v1225_v44 = vadd.f32 %v1091_v2, %v740_v18  ;;  %v306_v59 = vmul.f32 %v4376_v36, %v7305_v54  ;;  %v7800_v8 = vmul.f32 %v4376_v36, %v7315_v11  ;;  %v2425_v22 = vadd.f32 %v2361_v48, %v2293_v24  ;;  %v7835_v18 = vld [vmem:[%s8394_s0 + $0x180] sm:$0xff] }
 0x202   :  { %v8558_v25 = vrot.slane %v7696_v13, 1  ;;  %v791_v12 = vmul.f32 %v4378_v37, %v7305_v54  ;;  %v7809_v60 = vmul.f32 %v4378_v37, %v7315_v11  ;;  %v8559_v42 = vrot.slane %v7709_v58, 2 }
 0x203   :  { %v1357_v51 = vadd.f32 %v1293_v47, %v1225_v44  ;;  %v527_v31 = vrot.slane %v306_v59, 1  ;;  %v528_v4 = vrot.slane %v7800_v8, 1  ;;  %v2909_v48 = vadd.f32 %v2727_v30, %v2425_v22 }
 0x204   :  { %v2807_v19 = vsel %vm456_vm0, %v8558_v25, %v2806_v23  ;;  %v3291_v45 = vsel %vm941_vm1, %v8559_v42, %v3290_v34  ;;  %v1012_v43 = vrot.slane %v791_v12, 2  ;;  %v8467_v13 = vrot.slane %v7809_v60, 2  ;;  %v7859_v34 = vpop.f32.mrb[14].mxu0  ;;  %v7864_v25 = vld [vmem:[%s8395_s1 + $0x8] ss:$0 sm:$0xff] }
 0x205   :  { %v1262_v14 = vmul.f32 %v4381_v39, %v7592_v17  ;;  %v1841_v54 = vadd.f32 %v1707_v9, %v1357_v51  ;;  %v529_v16 = vsel %vm456_vm0, %v527_v31, %v528_v4  ;;  %v1408_v58 = vmul.f32 %v4383_v40, %v7592_v17  ;;  %8560 = vst [vmem:[#allocation28_spill] sm:$0xff] %v7859_v34  ;;  %v7872_v51 = vpop.f32.mrb[15].mxu0 }
 0x206   :  { %v7825_v47 = vmul.f32 %v4383_v40, %v7602_v26  ;;  %v3393_v15 = vadd.f32 %v3211_v10, %v2909_v48  ;;  %v709_v30 = vadd.f32 %v529_v16, %v160_v38  ;;  %v1014_v63 = vsel %vm941_vm1, %v1012_v43, %v8467_v13  ;;  %8561 = vst [vmem:[#allocation29_spill] sm:$0xff] %v7872_v51 }
 0x207   :  { %v1892_v33 = vmul.f32 %v4385_v41, %v7592_v17  ;;  %v2325_v62 = vadd.f32 %v2191_v28, %v1841_v54  ;;  %v1628_v52 = vrot.slane %v1408_v58, 1  ;;  %v7840_v10 = vmul.f32 %v4385_v41, %v7602_v26 }
 0x208   :  { %v8463_v2 = vrot.slane %v7825_v47, 1  ;;  %4136 = vmatmul.mubr.f32.gmra.mrb[26].mxu0 %v3393_v15  ;;  %v1194_v9 = vadd.f32 %v1014_v63, %v709_v30  ;;  %v2362_v24 = vmul.f32 %v4434_v0, %v7835_v18  ;;  %v2508_v32 = vmul.f32 %v4436_v1, %v7835_v18 }
 0x209   :  { %v2112_v5 = vrot.slane %v1892_v33, 2  ;;  %v2457_v28 = vadd.f32 %v2393_v50, %v2325_v62  ;;  %v8461_v38 = vrot.slane %v7840_v10, 2  ;;  %v7857_v44 = vmul.f32 %v4436_v1, %v7845_v46 }
 0x20a   :  { %v1630_v23 = vsel %vm456_vm0, %v1628_v52, %v8463_v2  ;;  %v1326_v59 = vadd.f32 %v1262_v14, %v1194_v9  ;;  %v2728_v22 = vrot.slane %v2508_v32, 1  ;;  %v2992_v50 = vmul.f32 %v7864_v25, %v7835_v18 }
 0x20b   :  { %v7870_v12 = vmul.f32 %v7864_v25, %v7845_v46  ;;  %v2941_v42 = vadd.f32 %v2807_v19, %v2457_v28  ;;  %v2114_v31 = vsel %vm941_vm1, %v2112_v5, %v8461_v38  ;;  %v8460_v48 = vrot.slane %v7857_v44, 1 }
 0x20c   :  { %v192_v43 = vmul.f32 %v4374_v35, %v7368_v7  ;;  %v1810_v14 = vadd.f32 %v1630_v23, %v1326_v59  ;;  %v3212_v54 = vrot.slane %v2992_v50, 2  ;;  %v354_v58 = vmul.f32 %v4376_v36, %v7368_v7  ;;  %v7907_v23 = vld [vmem:[%s8394_s0 + $0x330] sm:$0xff] }
 0x20d   :  { %v8459_v16 = vrot.slane %v7870_v12, 2  ;;  %v3425_v15 = vadd.f32 %v3291_v45, %v2941_v42  ;;  %v2730_v19 = vsel %vm456_vm0, %v2728_v22, %v8460_v48  ;;  %v7888_v30 = vmul.f32 %v4376_v36, %v7389_v55  ;;  %v7916_v42 = vpop.f32.mrb[14].mxu1 }
 0x20e   :  { %v839_v63 = vmul.f32 %v4378_v37, %v7368_v7  ;;  %v2294_v33 = vadd.f32 %v2114_v31, %v1810_v14  ;;  %v607_v52 = vrot.slane %v354_v58, 1  ;;  %v7897_v45 = vmul.f32 %v4378_v37, %v7389_v55  ;;  %8562 = vst [vmem:[#allocation30_spill] sm:$0xff] %v7916_v42  ;;  %v7927_v58 = vpop.f32.mrb[15].mxu1 }
 0x20f   :  { %v3214_v62 = vsel %vm941_vm1, %v3212_v54, %v8459_v16  ;;  %4184 = vmatmul.mubr.f32.gmra.mrb[26].mxu1 %v3425_v15  ;;  %v8458_v9 = vrot.slane %v7888_v30, 1  ;;  %v1294_v32 = vmul.f32 %v4381_v39, %v7660_v53  ;;  %v1456_v7 = vmul.f32 %v4383_v40, %v7660_v53  ;;  %8563 = vst [vmem:[#allocation31_spill] sm:$0xff] %v7927_v58 }
 0x210   :  { %v1092_v5 = vrot.slane %v839_v63, 2  ;;  %v2426_v28 = vadd.f32 %v2362_v24, %v2294_v33  ;;  %v8462_v59 = vrot.slane %v7897_v45, 2  ;;  %v7912_v22 = vmul.f32 %v4383_v40, %v7685_v56  ;;  %v7932_v63 = vld [vmem:[%s8394_s0 + $0x338] sm:$0xff] }
 0x211   :  { %v1940_v50 = vmul.f32 %v4385_v41, %v7660_v53  ;;  %v609_v24 = vsel %vm456_vm0, %v607_v52, %v8458_v9  ;;  %v1708_v31 = vrot.slane %v1456_v7, 1  ;;  %v7923_v14 = vmul.f32 %v4385_v41, %v7685_v56 }
 0x212   :  { %v2394_v54 = vmul.f32 %v4434_v0, %v7907_v23  ;;  %v2910_v15 = vadd.f32 %v2730_v19, %v2426_v28  ;;  %v741_v33 = vadd.f32 %v609_v24, %v192_v43  ;;  %v1094_v52 = vsel %vm941_vm1, %v1092_v5, %v8462_v59 }
 0x213   :  { %v8466_v7 = vrot.slane %v7912_v22, 1  ;;  %v2192_v9 = vrot.slane %v1940_v50, 2  ;;  %v8465_v16 = vrot.slane %v7923_v14, 2  ;;  %v2556_v48 = vmul.f32 %v4436_v1, %v7907_v23 }
 0x214   :  { %v7943_v19 = vmul.f32 %v4436_v1, %v7932_v63  ;;  %v3394_v28 = vadd.f32 %v3214_v62, %v2910_v15  ;;  %v1226_v38 = vadd.f32 %v1094_v52, %v741_v33  ;;  %v3040_v5 = vmul.f32 %v7864_v25, %v7907_v23 }
 0x215   :  { %v1710_v43 = vsel %vm456_vm0, %v1708_v31, %v8466_v7  ;;  %v2194_v50 = vsel %vm941_vm1, %v2192_v9, %v8465_v16  ;;  %v2808_v24 = vrot.slane %v2556_v48, 1  ;;  %v7956_v2 = vmul.f32 %v7864_v25, %v7932_v63 }
 0x216   :  { %v8464_v59 = vrot.slane %v7943_v19, 1  ;;  %4138 = vmatprep.mubr.f32.mxu0 %v3394_v28  ;;  %v1358_v62 = vadd.f32 %v1294_v32, %v1226_v38  ;;  %v3292_v15 = vrot.slane %v3040_v5, 2  ;;  %v161_v31 = vmul.f32 %v4374_v35, %v7315_v11  ;;  %v7973_v11 = vld [vmem:[%s8394_s0 + $0x190] sm:$0x3] }
 0x217   :  { %v308_v33 = vmul.f32 %v4376_v36, %v7430_v20  ;;  %v8468_v48 = vrot.slane %v7956_v2, 2  ;;  %v793_v52 = vmul.f32 %v4378_v37, %v7430_v20  ;;  %v1263_v28 = vmul.f32 %v4381_v39, %v7602_v26 }
 0x218   :  { %v2810_v9 = vsel %vm456_vm0, %v2808_v24, %v8464_v59  ;;  %v1842_v38 = vadd.f32 %v1710_v43, %v1358_v62  ;;  %v1410_v5 = vmul.f32 %v4383_v40, %v7726_v29  ;;  %v1894_v24 = vmul.f32 %v4385_v41, %v7726_v29 }
 0x219   :  { %v530_v32 = vrot.slane %v308_v33, 1  ;;  %v3294_v20 = vsel %vm941_vm1, %v3292_v15, %v8468_v48  ;;  %v1015_v59 = vrot.slane %v793_v52, 2  ;;  %v2363_v43 = vmul.f32 %v4434_v0, %v7845_v46 }
 0x21a   :  { %v2510_v62 = vmul.f32 %v4436_v1, %v7973_v11  ;;  %v2326_v16 = vadd.f32 %v2194_v50, %v1842_v38  ;;  %v1631_v7 = vrot.slane %v1410_v5, 1  ;;  %v2115_v13 = vrot.slane %v1894_v24, 2 }
 0x21b   :  { %v531_v33 = vsel %vm456_vm0, %v528_v4, %v530_v32  ;;  %v8564_v51 = vrot.slane %v7809_v60, 2  ;;  %v2994_v52 = vmul.f32 %v7864_v25, %v7973_v11  ;;  %v8565_v34 = vrot.slane %v7825_v47, 1 }
 0x21c   :  { %v710_v58 = vadd.f32 %v531_v33, %v161_v31  ;;  %v2731_v15 = vrot.slane %v2510_v62, 1  ;;  %v2458_v48 = vadd.f32 %v2394_v54, %v2326_v16  ;;  %v8566_v8 = vrot.slane %v7840_v10, 2 }
 0x21d   :  { %v1016_v42 = vsel %vm941_vm1, %v8564_v51, %v1015_v59  ;;  %v1632_v50 = vsel %vm456_vm0, %v8565_v34, %v1631_v7  ;;  %v193_v31 = vmul.f32 %v4374_v35, %v7389_v55  ;;  %v8567_v60 = vrot.slane %v7857_v44, 1 }
 0x21e   :  { %v2116_v4 = vsel %vm941_vm1, %v8566_v8, %v2115_v13  ;;  %v1195_v38 = vadd.f32 %v1016_v42, %v710_v58  ;;  %v3215_v59 = vrot.slane %v2994_v52, 2  ;;  %v356_v16 = vmul.f32 %v4376_v36, %v7500_v6 }
 0x21f   :  { %v2732_v51 = vsel %vm456_vm0, %v8567_v60, %v2731_v15  ;;  %v2942_v54 = vadd.f32 %v2810_v9, %v2458_v48  ;;  %v841_v47 = vmul.f32 %v4378_v37, %v7500_v6  ;;  %v1295_v10 = vmul.f32 %v4381_v39, %v7685_v56  ;;  %v8021_v6 = vld [vmem:[%s8394_s0 + $0x340] sm:$0x3] }
 0x220   :  { %v1458_v13 = vmul.f32 %v4383_v40, %v7774_v49  ;;  %v1327_v55 = vadd.f32 %v1263_v28, %v1195_v38  ;;  %v8568_v34 = vrot.slane %v7870_v12, 2  ;;  %v610_v42 = vrot.slane %v356_v16, 1 }
 0x221   :  { %v1942_v58 = vmul.f32 %v4385_v41, %v7774_v49  ;;  %v3426_v7 = vadd.f32 %v3294_v20, %v2942_v54  ;;  %v1095_v9 = vrot.slane %v841_v47, 2  ;;  %v2395_v32 = vmul.f32 %v4434_v0, %v7932_v63 }
 0x222   :  { %v3216_v44 = vsel %vm941_vm1, %v8568_v34, %v3215_v59  ;;  %v1711_v48 = vrot.slane %v1458_v13, 1  ;;  %v1811_v28 = vadd.f32 %v1632_v50, %v1327_v55  ;;  %v8569_v12 = vrot.slane %v7888_v30, 1 }
 0x223   :  { %v2195_v24 = vrot.slane %v1942_v58, 2  ;;  %v2558_v62 = vmul.f32 %v4436_v1, %v8021_v6  ;;  %4186 = vmatprep.mubr.f32.mxu1 %v3426_v7  ;;  %v8570_v33 = vrot.slane %v7897_v45, 2  ;;  %v8571_v52 = vrot.slane %v7912_v22, 1 }
 0x224   :  { %v611_v5 = vsel %vm456_vm0, %v8569_v12, %v610_v42  ;;  %v3042_v50 = vmul.f32 %v7864_v25, %v8021_v6  ;;  %v2295_v30 = vadd.f32 %v2116_v4, %v1811_v28  ;;  %v8572_v38 = vrot.slane %v7923_v14, 2  ;;  %v69_v12 = vld [vmem:[%s8394_s0 + $0x198] sm:$0xff] }
 0x225   :  { %v742_v20 = vadd.f32 %v611_v5, %v193_v31  ;;  %v1096_v15 = vsel %vm941_vm1, %v8570_v33, %v1095_v9  ;;  %v1712_v8 = vsel %vm456_vm0, %v8571_v52, %v1711_v48  ;;  %v2811_v59 = vrot.slane %v2558_v62, 1 }
 0x226   :  { %v2196_v60 = vsel %vm941_vm1, %v8572_v38, %v2195_v24  ;;  %v162_v31 = vmul.f32 %v4374_v35, %v7592_v17  ;;  %v3295_v45 = vrot.slane %v3042_v50, 2  ;;  %v309_v54 = vmul.f32 %v4376_v36, %v7592_v17  ;;  %v8080_v24 = vld [vmem:[%s8394_s0 + $0x1a0] sm:$0xff] }
 0x227   :  { %v1227_v16 = vadd.f32 %v1096_v15, %v742_v20  ;;  %v8047_v22 = vmul.f32 %v4376_v36, %v7602_v26  ;;  %v2427_v47 = vadd.f32 %v2363_v43, %v2295_v30  ;;  %v8573_v4 = vrot.slane %v7943_v19, 1 }
 0x228   :  { %v794_v13 = vmul.f32 %v4378_v37, %v7592_v17  ;;  %v8056_v55 = vmul.f32 %v4378_v37, %v7602_v26  ;;  %v8574_v42 = vrot.slane %v7956_v2, 2  ;;  %v532_v7 = vrot.slane %v309_v54, 1 }
 0x229   :  { %v2812_v14 = vsel %vm456_vm0, %v8573_v4, %v2811_v59  ;;  %v1359_v34 = vadd.f32 %v1295_v10, %v1227_v16  ;;  %v533_v9 = vrot.slane %v8047_v22, 1  ;;  %v2911_v43 = vadd.f32 %v2732_v51, %v2427_v47 }
 0x22a   :  { %v3296_v58 = vsel %vm941_vm1, %v8574_v42, %v3295_v45  ;;  %v1017_v48 = vrot.slane %v794_v13, 2  ;;  %v1018_v19 = vrot.slane %v8056_v55, 2  ;;  %v1264_v28 = vmul.f32 %v4381_v39, %v7835_v18  ;;  %v8102_v45 = vpop.f32.mrb[16].mxu0 }
 0x22b   :  { %v1843_v17 = vadd.f32 %v1712_v8, %v1359_v34  ;;  %v534_v2 = vsel %vm456_vm0, %v532_v7, %v533_v9  ;;  %v1411_v10 = vmul.f32 %v4383_v40, %v7835_v18  ;;  %v8075_v51 = vmul.f32 %v4383_v40, %v7845_v46 }
 0x22c   :  { %v3395_v5 = vadd.f32 %v3216_v44, %v2911_v43  ;;  %v711_v62 = vadd.f32 %v534_v2, %v162_v31  ;;  %v1019_v20 = vsel %vm941_vm1, %v1017_v48, %v1018_v19  ;;  %v1895_v33 = vmul.f32 %v4385_v41, %v7835_v18 }
 0x22d   :  { %v2327_v15 = vadd.f32 %v2196_v60, %v1843_v17  ;;  %v1633_v52 = vrot.slane %v1411_v10, 1  ;;  %v1634_v8 = vrot.slane %v8075_v51, 1  ;;  %v8090_v44 = vmul.f32 %v4385_v41, %v7845_v46  ;;  %v125_v51 = vld [vmem:[%s8394_s0 + $0x358] sm:$0x3] }
 0x22e   :  { %4139 = vmatmul.mubr.f32.gmra.mrb[28].mxu0 %v3395_v5  ;;  %v1196_v50 = vadd.f32 %v1019_v20, %v711_v62  ;;  %v2117_v30 = vrot.slane %v1895_v33, 2  ;;  %v2364_v38 = vmul.f32 %v4434_v0, %v69_v12  ;;  %v2511_v59 = vmul.f32 %v4436_v1, %v69_v12 }
 0x22f   :  { %v2459_v31 = vadd.f32 %v2395_v32, %v2327_v15  ;;  %v1635_v18 = vsel %vm456_vm0, %v1633_v52, %v1634_v8  ;;  %v2118_v60 = vrot.slane %v8090_v44, 2  ;;  %v8100_v16 = vmul.f32 %v4436_v1, %v8080_v24  ;;  %v8109_v32 = vpop.f32.mrb[17].mxu0 }
 0x230   :  { %v1328_v54 = vadd.f32 %v1264_v28, %v1196_v50  ;;  %v2733_v47 = vrot.slane %v2511_v59, 1  ;;  %v2995_v4 = vmul.f32 %v7864_v25, %v69_v12  ;;  %v8107_v13 = vmul.f32 %v7864_v25, %v8080_v24 }
 0x231   :  { %v2943_v34 = vadd.f32 %v2812_v14, %v2459_v31  ;;  %v2119_v42 = vsel %vm941_vm1, %v2117_v30, %v2118_v60  ;;  %v8471_v7 = vrot.slane %v8100_v16, 1  ;;  %v194_v43 = vmul.f32 %v4374_v35, %v7660_v53  ;;  %v8147_v31 = vld [vmem:[%s8394_s0 + $0x350] sm:$0xff] }
 0x232   :  { %v1812_v48 = vadd.f32 %v1635_v18, %v1328_v54  ;;  %v3217_v28 = vrot.slane %v2995_v4, 2  ;;  %v8470_v17 = vrot.slane %v8107_v13, 2  ;;  %v357_v12 = vmul.f32 %v4376_v36, %v7660_v53  ;;  %v8156_v4 = vpop.f32.mrb[16].mxu1 }
 0x233   :  { %v3427_v2 = vadd.f32 %v3296_v58, %v2943_v34  ;;  %v2735_v14 = vsel %vm456_vm0, %v2733_v47, %v8471_v7  ;;  %v8125_v10 = vmul.f32 %v4376_v36, %v7685_v56  ;;  %v842_v5 = vmul.f32 %v4378_v37, %v7660_v53  ;;  %v123_v58 = vld [vmem:[%s8394_s0 + $0x348] sm:$0xff] }
 0x234   :  { %v2296_v62 = vadd.f32 %v2119_v42, %v1812_v48  ;;  %v3219_v20 = vsel %vm941_vm1, %v3217_v28, %v8470_v17  ;;  %v612_v33 = vrot.slane %v357_v12, 1  ;;  %v8137_v15 = vmul.f32 %v4378_v37, %v7685_v56  ;;  %v8166_v28 = vpop.f32.mrb[17].mxu1 }
 0x235   :  { %4187 = vmatmul.mubr.f32.gmra.mrb[28].mxu1 %v3427_v2  ;;  %v8469_v52 = vrot.slane %v8125_v10, 1  ;;  %v1097_v50 = vrot.slane %v842_v5, 2  ;;  %v1296_v53 = vmul.f32 %v4381_v39, %v7907_v23  ;;  %v1459_v30 = vmul.f32 %v4383_v40, %v7907_v23 }
 0x236   :  { %v2428_v59 = vadd.f32 %v2364_v38, %v2296_v62  ;;  %v8475_v18 = vrot.slane %v8137_v15, 2  ;;  %v8152_v54 = vmul.f32 %v4383_v40, %v7932_v63  ;;  %v1943_v47 = vmul.f32 %v4385_v41, %v7907_v23 }
 0x237   :  { %v614_v38 = vsel %vm456_vm0, %v612_v33, %v8469_v52  ;;  %v1713_v34 = vrot.slane %v1459_v30, 1  ;;  %v8163_v42 = vmul.f32 %v4385_v41, %v7932_v63  ;;  %v2396_v48 = vmul.f32 %v4434_v0, %v123_v58 }
 0x238   :  { %v2912_v12 = vadd.f32 %v2735_v14, %v2428_v59  ;;  %v743_v2 = vadd.f32 %v614_v38, %v194_v43  ;;  %v1099_v23 = vsel %vm941_vm1, %v1097_v50, %v8475_v18  ;;  %v8474_v5 = vrot.slane %v8152_v54, 1 }
 0x239   :  { %v2197_v62 = vrot.slane %v1943_v47, 2  ;;  %v8473_v33 = vrot.slane %v8163_v42, 2  ;;  %v2559_v30 = vmul.f32 %v4436_v1, %v123_v58  ;;  %v8176_v52 = vmul.f32 %v4436_v1, %v8147_v31 }
 0x23a   :  { %v3396_v17 = vadd.f32 %v3219_v20, %v2912_v12  ;;  %v1228_v7 = vadd.f32 %v1099_v23, %v743_v2  ;;  %v1715_v43 = vsel %vm456_vm0, %v1713_v34, %v8474_v5  ;;  %v3043_v14 = vmul.f32 %v7864_v25, %v123_v58  ;;  %v71_v34 = vld [vmem:[%s8394_s0 + $0x1a8] sm:$0x3] }
 0x23b   :  { %v2199_v50 = vsel %vm941_vm1, %v2197_v62, %v8473_v33  ;;  %v2813_v59 = vrot.slane %v2559_v30, 1  ;;  %v8472_v47 = vrot.slane %v8176_v52, 1  ;;  %v8188_v38 = vmul.f32 %v7864_v25, %v8147_v31 }
 0x23c   :  { %4141 = vmatprep.mubr.f32.mxu0 %v3396_v17  ;;  %v1360_v20 = vadd.f32 %v1296_v53, %v1228_v7  ;;  %v3297_v12 = vrot.slane %v3043_v14, 2  ;;  %v163_v58 = vmul.f32 %v4374_v35, %v7602_v26  ;;  %v311_v2 = vmul.f32 %v4376_v36, %v7726_v29 }
 0x23d   :  { %v2815_v23 = vsel %vm456_vm0, %v2813_v59, %v8472_v47  ;;  %v3298_v62 = vrot.slane %v8188_v38, 2  ;;  %v796_v7 = vmul.f32 %v4378_v37, %v7726_v29  ;;  %v1265_v17 = vmul.f32 %v4381_v39, %v7845_v46  ;;  %v8584_v38 = vld [vmem:[#allocation7_spill] sm:$0xff] }
 0x23e   :  { %v1844_v53 = vadd.f32 %v1715_v43, %v1360_v20  ;;  %v535_v30 = vrot.slane %v311_v2, 1  ;;  %v1413_v26 = vmul.f32 %v4383_v40, %v7973_v11  ;;  %v1897_v14 = vmul.f32 %v4385_v41, %v7973_v11 }
 0x23f   :  { %v3299_v59 = vsel %vm941_vm1, %v3297_v12, %v3298_v62  ;;  %v1020_v47 = vrot.slane %v796_v7, 2  ;;  %v2365_v33 = vmul.f32 %v4434_v0, %v8080_v24  ;;  %v2513_v29 = vmul.f32 %v4436_v1, %v71_v34 }
 0x240   :  { %v2328_v5 = vadd.f32 %v2199_v50, %v1844_v53  ;;  %v536_v46 = vsel %vm456_vm0, %v533_v9, %v535_v30  ;;  %v1636_v43 = vrot.slane %v1413_v26, 1  ;;  %v2120_v20 = vrot.slane %v1897_v14, 2 }
 0x241   :  { %v712_v2 = vadd.f32 %v536_v46, %v163_v58  ;;  %v1021_v11 = vsel %vm941_vm1, %v1018_v19, %v1020_v47  ;;  %v2736_v18 = vrot.slane %v2513_v29, 1  ;;  %v2997_v12 = vmul.f32 %v7864_v25, %v71_v34 }
 0x242   :  { %v2460_v7 = vadd.f32 %v2396_v48, %v2328_v5  ;;  %v1637_v24 = vsel %vm456_vm0, %v1634_v8, %v1636_v43  ;;  %v2121_v22 = vsel %vm941_vm1, %v2118_v60, %v2120_v20  ;;  %v195_v9 = vmul.f32 %v4374_v35, %v7685_v56 }
 0x243   :  { %v1197_v50 = vadd.f32 %v1021_v11, %v712_v2  ;;  %v8575_v55 = vrot.slane %v8100_v16, 1  ;;  %v3220_v47 = vrot.slane %v2997_v12, 2  ;;  %v359_v48 = vmul.f32 %v4376_v36, %v7774_v49 }
 0x244   :  { %v2944_v5 = vadd.f32 %v2815_v23, %v2460_v7  ;;  %v844_v8 = vmul.f32 %v4378_v37, %v7774_v49  ;;  %v1297_v35 = vmul.f32 %v4381_v39, %v7932_v63  ;;  %v1461_v56 = vmul.f32 %v4383_v40, %v8021_v6  ;;  %v8254_v39 = vld [vmem:[%s8397_s3] ss:$0 sm:$0xff]  ;;  %s4271_s3 = smov [#allocation2]  }
 0x245   :  { %v2737_v19 = vsel %vm456_vm0, %v8575_v55, %v2736_v18  ;;  %v1329_v44 = vadd.f32 %v1265_v17, %v1197_v50  ;;  %v8576_v60 = vrot.slane %v8107_v13, 2  ;;  %v615_v36 = vrot.slane %v359_v48, 1  ;;  %v8585_v50 = vld [vmem:[#allocation8_spill] sm:$0xff]  ;;  %s3971_s6 = sshll.u32 %s4271_s3, 4  ;;  %s3972_s6 = int_to_ptr.vmem [resolvable:$true] %s3971_s6 }
 0x246   :  { %v1945_v18 = vmul.f32 %v4385_v41, %v8021_v6  ;;  %v3428_v34 = vadd.f32 %v3299_v59, %v2944_v5  ;;  %v1100_v58 = vrot.slane %v844_v8, 2  ;;  %v1716_v23 = vrot.slane %v1461_v56, 1  ;;  %s4247_s7 = scalar_lea.vmem %s3972_s6, 8192  ;;  %p4252_p1 = scmp.lt.s32.totalorder %s3972_s6, %s3972_s6 }
 0x247   :  { %v3221_v16 = vsel %vm941_vm1, %v8576_v60, %v3220_v47  ;;  %v2397_v37 = vmul.f32 %v4434_v0, %v8147_v31  ;;  %v1813_v40 = vadd.f32 %v1637_v24, %v1329_v44  ;;  %v8577_v49 = vrot.slane %v8125_v10, 1  ;;  %v8587_v60 = vld [vmem:[#allocation10_spill] sm:$0xff]  ;;  %p4248_p0 = scmp.ne.s32.totalorder %s3972_s6, %s4247_s7  ;;  %p4253_p2 = scmp.lt.s32.totalorder %s4247_s7, %s4247_s7 }
 0x248   :  { %v2200_v13 = vrot.slane %v1945_v18, 2  ;;  %v2561_v17 = vmul.f32 %v4436_v1, %v125_v51  ;;  %4189 = vmatprep.mubr.f32.mxu1 %v3428_v34  ;;  %v8578_v6 = vrot.slane %v8137_v15, 2  ;;  %v8579_v0 = vrot.slane %v8152_v54, 1  ;;  %v8588_v18 = vld [vmem:[#allocation11_spill] sm:$0xff]  ;;  %v8589_v34 = vld [vmem:[#allocation12_spill] sm:$0xff] }
 0x249   :  { %v616_v63 = vsel %vm456_vm0, %v8577_v49, %v615_v36  ;;  %v3045_v30 = vmul.f32 %v7864_v25, %v125_v51  ;;  %v2297_v26 = vadd.f32 %v2121_v22, %v1813_v40  ;;  %v8580_v10 = vrot.slane %v8163_v42, 2  ;;  %v8590_v40 = vld [vmem:[#allocation13_spill] sm:$0xff]  ;;  %p4254_p3 = por %p4253_p2, %p4252_p1 }
 0x24a   :  { %v744_v41 = vadd.f32 %v616_v63, %v195_v9  ;;  %v1101_v53 = vsel %vm941_vm1, %v8578_v6, %v1100_v58  ;;  %v1717_v31 = vsel %vm456_vm0, %v8579_v0, %v1716_v23  ;;  %v2816_v59 = vrot.slane %v2561_v17, 1  ;;  %v8591_v63 = vld [vmem:[#allocation14_spill] sm:$0xff]  ;;  %v8592_v17 = vld [vmem:[#allocation15_spill] sm:$0xff]  ;;  %v8308_v6 = vpop.f32.mrb[18].mxu0 }
 0x24b   :  { %v2201_v14 = vsel %vm941_vm1, %v8580_v10, %v2200_v13  ;;  %v3525_v1 = vadd.f32 %v7453_v57, %v8254_v39  ;;  %v3300_v46 = vrot.slane %v3045_v30, 2  ;;  %v3685_v15 = vadd.f32 %v7455_v3, %v8254_v39  ;;  %p4255_p4 = pnand %p4254_p3, %p4248_p0 }
 0x24c   :  { %v1229_v29 = vadd.f32 %v1101_v53, %v744_v41  ;;  %v3520_v54 = vadd.f32 %v8254_v39, %v7465_v27  ;;  %v2429_v43 = vadd.f32 %v2365_v33, %v2297_v26  ;;  %v8581_v25 = vrot.slane %v8176_v52, 1  ;;  %v8582_v52 = vld [vmem:[#allocation5_spill] sm:$0xff]  ;;  %v8312_v26 = vpop.f32.mrb[19].mxu0 }
 0x24d   :  { %v3839_v42 = vmax.f32 %v3525_v1, 0.0  ;;  %v3680_v2 = vadd.f32 %v8254_v39, %v7467_v21  ;;  %v3301_v57 = vsel %vm941_vm1, %v3298_v62, %v3300_v46  ;;  %v3871_v12 = vmax.f32 %v3685_v15, 0.0  ;;  %v8583_v21 = vld [vmem:[#allocation6_spill] sm:$0xff]  ;;  %v8594_v46 = vld [vmem:[#allocation17_spill] sm:$0xff] }
 0x24e   :  { %v2817_v20 = vsel %vm456_vm0, %v8581_v25, %v2816_v59  ;;  %v1361_v11 = vadd.f32 %v1297_v35, %v1229_v29  ;;  %v3838_v7 = vmax.f32 %v3520_v54, 0.0  ;;  %v2913_v3 = vadd.f32 %v2737_v19, %v2429_v43  ;;  %v8595_v54 = vld [vmem:[#allocation18_spill] sm:$0xff]  ;;  %v8596_v25 = vld [vmem:[#allocation19_spill] sm:$0xff] }
 0x24f   :  { %3903 = vst [vmem:[#allocation2 + $0x8] sm:$0xff] %v3839_v42  ;;  %v3870_v24 = vmax.f32 %v3680_v2, 0.0  ;;  %v3535_v27 = vadd.f32 %v7474_v61, %v8254_v39  ;;  %v3695_v33 = vadd.f32 %v8582_v52, %v8254_v39  ;;  %3935 = vst [vmem:[#allocation2 + $0x108] sm:$0xff] %v3871_v12  ;;  %v3530_v9 = vadd.f32 %v8254_v39, %v8583_v21  ;;  %v8586_v61 = vld [vmem:[#allocation9_spill] sm:$0xff] }
 0x250   :  { %v1845_v22 = vadd.f32 %v1717_v31, %v1361_v11  ;;  %3902 = vst [vmem:[#allocation2] sm:$0xff] %v3838_v7  ;;  %v3690_v62 = vadd.f32 %v8254_v39, %v8584_v38  ;;  %v3545_v55 = vadd.f32 %v8585_v50, %v8254_v39  ;;  %v3397_v19 = vadd.f32 %v3221_v16, %v2913_v3  ;;  %v8598_v12 = vld [vmem:[#allocation21_spill] sm:$0xff]  ;;  %v8599_v3 = vld [vmem:[#allocation22_spill] sm:$0xff] }
 0x251   :  { %3934 = vst [vmem:[#allocation2 + $0x100] sm:$0xff] %v3870_v24  ;;  %v3841_v47 = vmax.f32 %v3535_v27, 0.0  ;;  %v3873_v48 = vmax.f32 %v3695_v33, 0.0  ;;  %v3705_v5 = vadd.f32 %v8586_v61, %v8254_v39  ;;  %v3840_v8 = vmax.f32 %v3530_v9, 0.0 }
 0x252   :  { %v2329_v51 = vadd.f32 %v2201_v14, %v1845_v22  ;;  %v3872_v35 = vmax.f32 %v3690_v62, 0.0  ;;  %v3843_v56 = vmax.f32 %v3545_v55, 0.0  ;;  %4142 = vmatmul.mubr.f32.gmra.mrb[30].mxu0 %v3397_v19  ;;  %v3540_v36 = vadd.f32 %v8254_v39, %v8587_v60  ;;  %v8600_v22 = vld [vmem:[#allocation23_spill] sm:$0xff]  ;;  %v8601_v62 = vld [vmem:[#allocation24_spill] sm:$0xff]  ;;  %v8602_v19 = vld [vmem:[#allocation26_spill] sm:$0xff] }
 0x253   :  { %3905 = vst [vmem:[#allocation2 + $0x18] sm:$0xff] %v3841_v47  ;;  %3937 = vst [vmem:[#allocation2 + $0x118] sm:$0xff] %v3873_v48  ;;  %v3875_v44 = vmax.f32 %v3705_v5, 0.0  ;;  %v3700_v16 = vadd.f32 %v8254_v39, %v8588_v18  ;;  %v3555_v58 = vadd.f32 %v8589_v34, %v8254_v39  ;;  %v3715_v49 = vadd.f32 %v8590_v40, %v8254_v39  ;;  %v8603_v48 = vld [vmem:[#allocation25_spill] sm:$0xff]  ;;  %v8604_v5 = vld [vmem:[#allocation27_spill] sm:$0xff] }
 0x254   :  { %v2461_v23 = vadd.f32 %v2397_v37, %v2329_v51  ;;  %3904 = vst [vmem:[#allocation2 + $0x10] sm:$0xff] %v3840_v8  ;;  %3936 = vst [vmem:[#allocation2 + $0x110] sm:$0xff] %v3872_v35  ;;  %v3550_v13 = vadd.f32 %v8254_v39, %v8591_v63  ;;  %v3710_v41 = vadd.f32 %v8254_v39, %v8592_v17  ;;  %v3842_v53 = vmax.f32 %v3540_v36, 0.0  ;;  %v8593_v37 = vld [vmem:[#allocation16_spill] sm:$0xff]  ;;  %v4173_v8 = vpop.f32.mrb[18].mxu1  ;;  %v8606_v60 = vld [vmem:[#allocation30_spill] sm:$0xff] }
 0x255   :  { %3907 = vst [vmem:[#allocation2 + $0x28] sm:$0xff] %v3843_v56  ;;  %3939 = vst [vmem:[#allocation2 + $0x128] sm:$0xff] %v3875_v44  ;;  %v3874_v0 = vmax.f32 %v3700_v16, 0.0  ;;  %v3845_v31 = vmax.f32 %v3555_v58, 0.0  ;;  %v3565_v30 = vadd.f32 %v8593_v37, %v8254_v39  ;;  %v3877_v14 = vmax.f32 %v3715_v49, 0.0  ;;  %v8605_v56 = vld [vmem:[#allocation28_spill] sm:$0xff] }
 0x256   :  { %v2945_v10 = vadd.f32 %v2817_v20, %v2461_v23  ;;  %v3844_v59 = vmax.f32 %v3550_v13, 0.0  ;;  %v3876_v1 = vmax.f32 %v3710_v41, 0.0  ;;  %3906 = vst [vmem:[#allocation2 + $0x20] sm:$0xff] %v3842_v53  ;;  %v3725_v15 = vadd.f32 %v8594_v46, %v8254_v39  ;;  %v8597_v20 = vld [vmem:[#allocation20_spill] sm:$0xff]  ;;  %v8607_v18 = vld [vmem:[#allocation29_spill] sm:$0xff]  ;;  %v3769_v34 = vpop.f32.mrb[19].mxu1 }
 0x257   :  { %3938 = vst [vmem:[#allocation2 + $0x120] sm:$0xff] %v3874_v0  ;;  %3909 = vst [vmem:[#allocation2 + $0x38] sm:$0xff] %v3845_v31  ;;  %v3847_v29 = vmax.f32 %v3565_v30, 0.0  ;;  %v3560_v43 = vadd.f32 %v8254_v39, %v8595_v54  ;;  %v3720_v42 = vadd.f32 %v8254_v39, %v8596_v25  ;;  %v3575_v11 = vadd.f32 %v8597_v20, %v8254_v39  ;;  %v8608_v49 = vld [vmem:[#allocation31_spill] sm:$0xff] }
 0x258   :  { %v3429_v2 = vadd.f32 %v3301_v57, %v2945_v10  ;;  %3941 = vst [vmem:[#allocation2 + $0x138] sm:$0xff] %v3877_v14  ;;  %3908 = vst [vmem:[#allocation2 + $0x30] sm:$0xff] %v3844_v59  ;;  %v3735_v7 = vadd.f32 %v8598_v12, %v8254_v39  ;;  %v3570_v24 = vadd.f32 %v8254_v39, %v8599_v3  ;;  %v3879_v27 = vmax.f32 %v3725_v15, 0.0 }
 0x259   :  { %3940 = vst [vmem:[#allocation2 + $0x130] sm:$0xff] %v3876_v1  ;;  %3911 = vst [vmem:[#allocation2 + $0x48] sm:$0xff] %v3847_v29  ;;  %v3846_v52 = vmax.f32 %v3560_v43, 0.0  ;;  %v3878_v33 = vmax.f32 %v3720_v42, 0.0  ;;  %v3730_v21 = vadd.f32 %v8254_v39, %v8600_v22  ;;  %v3849_v57 = vmax.f32 %v3575_v11, 0.0 }
 0x25a   :  { %4190 = vmatmul.mubr.f32.gmra.mrb[30].mxu1 %v3429_v2  ;;  %v3881_v9 = vmax.f32 %v3735_v7, 0.0  ;;  %v3848_v38 = vmax.f32 %v3570_v24, 0.0  ;;  %v3585_v50 = vadd.f32 %v8601_v62, %v8254_v39  ;;  %3943 = vst [vmem:[#allocation2 + $0x148] sm:$0xff] %v3879_v27  ;;  %v3745_v47 = vadd.f32 %v8602_v19, %v8254_v39 }
 0x25b   :  { %3910 = vst [vmem:[#allocation2 + $0x40] sm:$0xff] %v3846_v52  ;;  %3942 = vst [vmem:[#allocation2 + $0x140] sm:$0xff] %v3878_v33  ;;  %v3880_v55 = vmax.f32 %v3730_v21, 0.0  ;;  %v3580_v61 = vadd.f32 %v8254_v39, %v8603_v48  ;;  %v3740_v51 = vadd.f32 %v8254_v39, %v8604_v5  ;;  %v3595_v44 = vadd.f32 %v8605_v56, %v8254_v39 }
 0x25c   :  { %3913 = vst [vmem:[#allocation2 + $0x58] sm:$0xff] %v3849_v57  ;;  %3945 = vst [vmem:[#allocation2 + $0x158] sm:$0xff] %v3881_v9  ;;  %v3851_v35 = vmax.f32 %v3585_v50, 0.0  ;;  %v3755_v36 = vadd.f32 %v8606_v60, %v8254_v39  ;;  %v3590_v16 = vadd.f32 %v8254_v39, %v8607_v18  ;;  %v3883_v58 = vmax.f32 %v3745_v47, 0.0 }
 0x25d   :  { %3912 = vst [vmem:[#allocation2 + $0x50] sm:$0xff] %v3848_v38  ;;  %3944 = vst [vmem:[#allocation2 + $0x150] sm:$0xff] %v3880_v55  ;;  %v3850_v23 = vmax.f32 %v3580_v61, 0.0  ;;  %v3882_v40 = vmax.f32 %v3740_v51, 0.0  ;;  %v3750_v63 = vadd.f32 %v8254_v39, %v8608_v49  ;;  %v3853_v13 = vmax.f32 %v3595_v44, 0.0 }
 0x25e   :  { %3915 = vst [vmem:[#allocation2 + $0x68] sm:$0xff] %v3851_v35  ;;  %v3885_v17 = vmax.f32 %v3755_v36, 0.0  ;;  %v3852_v41 = vmax.f32 %v3590_v16, 0.0  ;;  %v3605_v53 = vadd.f32 %v8102_v45, %v8254_v39  ;;  %3947 = vst [vmem:[#allocation2 + $0x168] sm:$0xff] %v3883_v58  ;;  %v3765_v31 = vadd.f32 %v8156_v4, %v8254_v39 }
 0x25f   :  { %3914 = vst [vmem:[#allocation2 + $0x60] sm:$0xff] %v3850_v23  ;;  %3946 = vst [vmem:[#allocation2 + $0x160] sm:$0xff] %v3882_v40  ;;  %v3884_v0 = vmax.f32 %v3750_v63, 0.0  ;;  %v3600_v37 = vadd.f32 %v8254_v39, %v8109_v32  ;;  %v3760_v30 = vadd.f32 %v8254_v39, %v8166_v28  ;;  %v3615_v45 = vadd.f32 %v8308_v6, %v8254_v39 }
 0x260   :  { %3917 = vst [vmem:[#allocation2 + $0x78] sm:$0xff] %v3853_v13  ;;  %3949 = vst [vmem:[#allocation2 + $0x178] sm:$0xff] %v3885_v17  ;;  %v3855_v10 = vmax.f32 %v3605_v53, 0.0  ;;  %v3775_v14 = vadd.f32 %v4173_v8, %v8254_v39  ;;  %v3610_v59 = vadd.f32 %v8254_v39, %v8312_v26  ;;  %v3887_v4 = vmax.f32 %v3765_v31, 0.0 }
 0x261   :  { %3916 = vst [vmem:[#allocation2 + $0x70] sm:$0xff] %v3852_v41  ;;  %3948 = vst [vmem:[#allocation2 + $0x170] sm:$0xff] %v3884_v0  ;;  %v3854_v1 = vmax.f32 %v3600_v37, 0.0  ;;  %v3886_v29 = vmax.f32 %v3760_v30, 0.0  ;;  %v3770_v32 = vadd.f32 %v8254_v39, %v3769_v34  ;;  %v3857_v28 = vmax.f32 %v3615_v45, 0.0 }
 0x262   :  { %3919 = vst [vmem:[#allocation2 + $0x88] sm:$0xff] %v3855_v10  ;;  %v3889_v46 = vmax.f32 %v3775_v14, 0.0  ;;  %v3856_v15 = vmax.f32 %v3610_v59, 0.0  ;;  %3951 = vst [vmem:[#allocation2 + $0x188] sm:$0xff] %v3887_v4 }
 0x263   :  { %3918 = vst [vmem:[#allocation2 + $0x80] sm:$0xff] %v3854_v1  ;;  %3950 = vst [vmem:[#allocation2 + $0x180] sm:$0xff] %v3886_v29  ;;  %v3888_v54 = vmax.f32 %v3770_v32, 0.0 }
 0x264   :  { %3921 = vst [vmem:[#allocation2 + $0x98] sm:$0xff] %v3857_v28  ;;  %3953 = vst [vmem:[#allocation2 + $0x198] sm:$0xff] %v3889_v46 }
 0x265   :  { %3920 = vst [vmem:[#allocation2 + $0x90] sm:$0xff] %v3856_v15  ;;  %3952 = vst [vmem:[#allocation2 + $0x190] sm:$0xff] %v3888_v54 }
 0x26d   :  { %v4128_v6 = vpop.f32.mrb[20].mxu0 }
 0x26e   :  { %v3625_v26 = vadd.f32 %v4128_v6, %v8254_v39  ;;  %v3619_v43 = vpop.f32.mrb[21].mxu0 }
 0x26f   :  { %v3620_v25 = vadd.f32 %v8254_v39, %v3619_v43 }
 0x270   :  { %v3859_v42 = vmax.f32 %v3625_v26, 0.0 }
 0x271   :  { %v3858_v2 = vmax.f32 %v3620_v25, 0.0 }
 0x272   :  { %3923 = vst [vmem:[#allocation2 + $0xa8] sm:$0xff] %v3859_v42 }
 0x273   :  { %3922 = vst [vmem:[#allocation2 + $0xa0] sm:$0xff] %v3858_v2 }
 0x274   :  { %v4176_v20 = vpop.f32.mrb[20].mxu1 }
 0x275   :  { %v3785_v11 = vadd.f32 %v4176_v20, %v8254_v39  ;;  %v3779_v12 = vpop.f32.mrb[21].mxu1 }
 0x276   :  { %v3780_v7 = vadd.f32 %v8254_v39, %v3779_v12 }
 0x277   :  { %v3891_v3 = vmax.f32 %v3785_v11, 0.0 }
 0x278   :  { %v3890_v24 = vmax.f32 %v3780_v7, 0.0 }
 0x279   :  { %3955 = vst [vmem:[#allocation2 + $0x1a8] sm:$0xff] %v3891_v3 }
 0x27a   :  { %3954 = vst [vmem:[#allocation2 + $0x1a0] sm:$0xff] %v3890_v24 }
 0x291   :  { %v4131_v27 = vpop.f32.mrb[22].mxu0 }
 0x292   :  { %v3635_v52 = vadd.f32 %v4131_v27, %v8254_v39  ;;  %v3629_v33 = vpop.f32.mrb[23].mxu0 }
 0x293   :  { %v3630_v22 = vadd.f32 %v8254_v39, %v3629_v33 }
 0x294   :  { %v3861_v21 = vmax.f32 %v3635_v52, 0.0 }
 0x295   :  { %v3860_v57 = vmax.f32 %v3630_v22, 0.0 }
 0x296   :  { %3925 = vst [vmem:[#allocation2 + $0xb8] sm:$0xff] %v3861_v21 }
 0x297   :  { %3924 = vst [vmem:[#allocation2 + $0xb0] sm:$0xff] %v3860_v57 }
 0x298   :  { %v4179_v9 = vpop.f32.mrb[22].mxu1 }
 0x299   :  { %v3795_v38 = vadd.f32 %v4179_v9, %v8254_v39  ;;  %v3789_v62 = vpop.f32.mrb[23].mxu1 }
 0x29a   :  { %v3790_v50 = vadd.f32 %v8254_v39, %v3789_v62 }
 0x29b   :  { %v3893_v55 = vmax.f32 %v3795_v38, 0.0 }
 0x29c   :  { %v3892_v19 = vmax.f32 %v3790_v50, 0.0 }
 0x29d   :  { %3957 = vst [vmem:[#allocation2 + $0x1b8] sm:$0xff] %v3893_v55 }
 0x29e   :  { %3956 = vst [vmem:[#allocation2 + $0x1b0] sm:$0xff] %v3892_v19 }
 0x2b5   :  { %v4134_v47 = vpop.f32.mrb[24].mxu0 }
 0x2b6   :  { %v3645_v48 = vadd.f32 %v4134_v47, %v8254_v39  ;;  %v3639_v61 = vpop.f32.mrb[25].mxu0 }
 0x2b7   :  { %v3640_v5 = vadd.f32 %v8254_v39, %v3639_v61 }
 0x2b8   :  { %v3863_v51 = vmax.f32 %v3645_v48, 0.0 }
 0x2b9   :  { %v3862_v8 = vmax.f32 %v3640_v5, 0.0 }
 0x2ba   :  { %3927 = vst [vmem:[#allocation2 + $0xc8] sm:$0xff] %v3863_v51 }
 0x2bb   :  { %3926 = vst [vmem:[#allocation2 + $0xc0] sm:$0xff] %v3862_v8 }
 0x2bc   :  { %v4182_v35 = vpop.f32.mrb[24].mxu1 }
 0x2bd   :  { %v3805_v56 = vadd.f32 %v4182_v35, %v8254_v39  ;;  %v3799_v44 = vpop.f32.mrb[25].mxu1 }
 0x2be   :  { %v3800_v60 = vadd.f32 %v8254_v39, %v3799_v44 }
 0x2bf   :  { %v3895_v36 = vmax.f32 %v3805_v56, 0.0 }
 0x2c0   :  { %v3894_v18 = vmax.f32 %v3800_v60, 0.0 }
 0x2c1   :  { %3959 = vst [vmem:[#allocation2 + $0x1c8] sm:$0xff] %v3895_v36 }
 0x2c2   :  { %3958 = vst [vmem:[#allocation2 + $0x1c0] sm:$0xff] %v3894_v18 }
 0x2db   :  { %v4137_v16 = vpop.f32.mrb[26].mxu0 }
 0x2dc   :  { %v3655_v34 = vadd.f32 %v4137_v16, %v8254_v39  ;;  %v3649_v58 = vpop.f32.mrb[27].mxu0 }
 0x2dd   :  { %v3650_v23 = vadd.f32 %v8254_v39, %v3649_v58 }
 0x2de   :  { %v3865_v40 = vmax.f32 %v3655_v34, 0.0 }
 0x2df   :  { %v3864_v49 = vmax.f32 %v3650_v23, 0.0 }
 0x2e0   :  { %3929 = vst [vmem:[#allocation2 + $0xd8] sm:$0xff] %v3865_v40 }
 0x2e1   :  { %3928 = vst [vmem:[#allocation2 + $0xd0] sm:$0xff] %v3864_v49 }
 0x2e2   :  { %v4185_v63 = vpop.f32.mrb[26].mxu1 }
 0x2e3   :  { %v3815_v13 = vadd.f32 %v4185_v63, %v8254_v39  ;;  %v3809_v17 = vpop.f32.mrb[27].mxu1 }
 0x2e4   :  { %v3810_v41 = vadd.f32 %v8254_v39, %v3809_v17 }
 0x2e5   :  { %v3897_v53 = vmax.f32 %v3815_v13, 0.0 }
 0x2e6   :  { %v3896_v0 = vmax.f32 %v3810_v41, 0.0 }
 0x2e7   :  { %3961 = vst [vmem:[#allocation2 + $0x1d8] sm:$0xff] %v3897_v53 }
 0x2e8   :  { %3960 = vst [vmem:[#allocation2 + $0x1d0] sm:$0xff] %v3896_v0 }
 0x301   :  { %v4140_v31 = vpop.f32.mrb[28].mxu0 }
 0x302   :  { %v3665_v37 = vadd.f32 %v4140_v31, %v8254_v39  ;;  %v3659_v30 = vpop.f32.mrb[29].mxu0 }
 0x303   :  { %v3660_v10 = vadd.f32 %v8254_v39, %v3659_v30 }
 0x304   :  { %v3867_v45 = vmax.f32 %v3665_v37, 0.0 }
 0x305   :  { %v3866_v14 = vmax.f32 %v3660_v10, 0.0 }
 0x306   :  { %3931 = vst [vmem:[#allocation2 + $0xe8] sm:$0xff] %v3867_v45 }
 0x307   :  { %3930 = vst [vmem:[#allocation2 + $0xe0] sm:$0xff] %v3866_v14 }
 0x308   :  { %v4188_v59 = vpop.f32.mrb[28].mxu1 }
 0x309   :  { %v3825_v4 = vadd.f32 %v4188_v59, %v8254_v39  ;;  %v3819_v1 = vpop.f32.mrb[29].mxu1 }
 0x30a   :  { %v3820_v29 = vadd.f32 %v8254_v39, %v3819_v1 }
 0x30b   :  { %v3899_v32 = vmax.f32 %v3825_v4, 0.0 }
 0x30c   :  { %v3898_v28 = vmax.f32 %v3820_v29, 0.0 }
 0x30d   :  { %3963 = vst [vmem:[#allocation2 + $0x1e8] sm:$0xff] %v3899_v32 }
 0x30e   :  { %3962 = vst [vmem:[#allocation2 + $0x1e0] sm:$0xff] %v3898_v28 }
 0x325   :  { %v4143_v46 = vpop.f32.mrb[30].mxu0 }
 0x326   :  { %v3675_v15 = vadd.f32 %v4143_v46, %v8254_v39  ;;  %v3669_v54 = vpop.f32.mrb[31].mxu0 }
 0x327   :  { %v3670_v6 = vadd.f32 %v8254_v39, %v3669_v54 }
 0x328   :  { %v3869_v26 = vmax.f32 %v3675_v15, 0.0 }
 0x329   :  { %v3868_v43 = vmax.f32 %v3670_v6, 0.0 }
 0x32a   :  { %3933 = vst [vmem:[#allocation2 + $0xf8] sm:$0xff] %v3869_v26 }
 0x32b   :  { %3932 = vst [vmem:[#allocation2 + $0xf0] sm:$0xff] %v3868_v43 }
 0x32d   :  { %v4191_v25 = vpop.f32.mrb[30].mxu1 }
 0x32e   :  { %v3835_v42 = vadd.f32 %v4191_v25, %v8254_v39  ;;  %v3829_v2 = vpop.f32.mrb[31].mxu1 }
 0x32f   :  { %v3830_v20 = vadd.f32 %v8254_v39, %v3829_v2 }
 0x330   :  { %v3901_v11 = vmax.f32 %v3835_v42, 0.0 }
 0x331   :  { %v3900_v12 = vmax.f32 %v3830_v20, 0.0 }
 0x332   :  { %3965 = vst [vmem:[#allocation2 + $0x1f8] sm:$0xff] %v3901_v11 }
 0x333   :  { %3964 = vst [vmem:[#allocation2 + $0x1f0] sm:$0xff] %v3900_v12 }
 0x334   :  { %4258 = shalt.err (!%p4255_p4)
}
 0x335   :  { %s4259_s10 = scalar_lea.hbm %s8398_s4, 8192 }
 0x336   :  { %p4260_p5 = scmp.ne.s32.totalorder %s8398_s4, %s4259_s10  ;;  %p4263_p6 = scmp.lt.u32.totalorder %s4259_s10, %s8398_s4 }
 0x338   :  { %p4265_p7 = pnand %p4263_p6, %p4260_p5 }
 0x33a   :  { %4268 = shalt.err (!%p4265_p7)
}
 0x33b   :  { %s4272_s14 = smov 128   ;;  %s4273_s15 = smov 8  }
 0x33c   :  { %3977 = dma.vmem_to_hbm [thread:$0]  %s3972_s6, 8192, %s8398_s4, [#allocation3], %s4272_s14, %s4272_s14, %s4273_s15  }
 0x33d   :  { %4269 = dma.done.wait [#allocation3], 8192  }
 0x33e   :  { %4270 = vsyncadd [#allocation3], 4294959104 }
 0x33f   :  { %3981 = vsyncpa [#allocation3], 1 }

</bundles_post_ra>
